<compile_context>
chip_gen: v5e
topology: v5e:2x2
jax: 0.10.0
libtpu: 0.0.40
codegen_flags: <defaults>
</compile_context>

<pallas_src>
import jax
import jax.numpy as jnp
from jax.experimental import pallas as pl
from jax.experimental.pallas import tpu as pltpu

N_ACTIONS = 4
OUT_PAD = 128        # lane-dense final layer (pad 4 -> 128, slice outside)
IN_FEATURES = 16
H1 = 3136
H2 = 512
SUBLANE = 8
TB_MAX = 128         # max batch rows processed per grid step


def dqn_mlp_kernel(x_ref, w1_ref, b1_ref, w2_ref, b2_ref, w3_ref, b3_ref, o_ref):
    # Fused: (TB,16)@(16,3136)+b -> relu -> @(3136,512)+b -> relu -> @(512,128)+b
    # bf16 operands on the MXU, f32 accumulation, f32 bias add.
    x = x_ref[...]
    h1 = jnp.dot(x, w1_ref[...], preferred_element_type=jnp.float32) + b1_ref[...]
    h1 = jnp.maximum(h1, 0.0).astype(jnp.bfloat16)
    h2 = jnp.dot(h1, w2_ref[...], preferred_element_type=jnp.float32) + b2_ref[...]
    h2 = jnp.maximum(h2, 0.0).astype(jnp.bfloat16)
    out = jnp.dot(h2, w3_ref[...], preferred_element_type=jnp.float32) + b3_ref[...]
    o_ref[...] = out.astype(o_ref.dtype)


def prepare_params(params):
    """Canonical f32 (in,out) params -> kernel layout:
    bf16 weights, f32 biases, final layer padded from N_ACTIONS to OUT_PAD lanes."""
    w1, b1, w2, b2, w3, b3 = params
    w3p = jnp.zeros((H2, OUT_PAD), jnp.float32).at[:, :N_ACTIONS].set(w3)
    b3p = jnp.zeros((1, OUT_PAD), jnp.float32).at[:, :N_ACTIONS].set(b3)
    return (
        w1.astype(jnp.bfloat16), b1.astype(jnp.float32),
        w2.astype(jnp.bfloat16), b2.astype(jnp.float32),
        w3p.astype(jnp.bfloat16), b3p.astype(jnp.float32),
    )


def _round_up(n, m):
    return ((n + m - 1) // m) * m


def dqn_forward(x, kparams):
    """x: any shape (B, ...) that flattens to (B, 16). Returns (B, n_actions) f32."""
    w1, b1, w2, b2, w3, b3 = kparams
    B = x.shape[0]
    # torch: x.view(B, -1).float(); bf16 on the MXU input side to match weights.
    x_flat = x.reshape(B, -1).astype(jnp.bfloat16)
    assert x_flat.shape[1] == IN_FEATURES

    # Pad batch to a sublane multiple; tile in chunks of TB_MAX for large B.
    B_pad = _round_up(B, SUBLANE)
    if B_pad > TB_MAX:
        B_pad = _round_up(B_pad, TB_MAX)
        tb = TB_MAX
    else:
        tb = B_pad
    nb = B_pad // tb

    if B_pad != B:
        x_flat = jnp.zeros((B_pad, IN_FEATURES), jnp.bfloat16).at[:B].set(x_flat)

    # Batch-tiled specs; weights/biases use a constant block index so they stay
    # resident in VMEM across batch steps.
    tiled = lambda shape: pl.BlockSpec(shape, lambda i: (i, 0))
    pinned = lambda shape: pl.BlockSpec(shape, lambda i: (0, 0))

    out = pl.pallas_call(
        dqn_mlp_kernel,
        out_shape=jax.ShapeDtypeStruct((B_pad, OUT_PAD), jnp.float32),
        grid=(nb,),
        in_specs=[
            tiled((tb, IN_FEATURES)),
            pinned((IN_FEATURES, H1)),
            pinned((1, H1)),
            pinned((H1, H2)),
            pinned((1, H2)),
            pinned((H2, OUT_PAD)),
            pinned((1, OUT_PAD)),
        ],
        out_specs=tiled((tb, OUT_PAD)),
        compiler_params=pltpu.CompilerParams(
            dimension_semantics=("parallel",),
            vmem_limit_bytes=32 << 20,
        ),
    )(x_flat, w1, b1, w2, b2, w3, b3)

    return out[:B, :N_ACTIONS]


def init_params(key):
    """Deterministic init mimicking torch.nn.Linear defaults (uniform +-1/sqrt(fan_in)).
    Weights are stored as (in, out) = torch_weight.T, in f32 (canonical)."""
    ks = jax.random.split(key, 6)

    def linear(kw, kb, fan_in, fan_out):
        bound = 1.0 / jnp.sqrt(float(fan_in))
        w = jax.random.uniform(kw, (fan_in, fan_out), jnp.float32, -bound, bound)
        b = jax.random.uniform(kb, (1, fan_out), jnp.float32, -bound, bound)
        return w, b

    w1, b1 = linear(ks[0], ks[1], IN_FEATURES, H1)
    w2, b2 = linear(ks[2], ks[3], H1, H2)
    w3, b3 = linear(ks[4], ks[5], H2, N_ACTIONS)
    return (w1, b1, w2, b2, w3, b3)


if __name__ == "__main__":
    key = jax.random.PRNGKey(0)
    k_params, k_x = jax.random.split(key)
    params = init_params(k_params)
    kparams = prepare_params(params)

    # Small NCHW input that flattens to 16 features per sample: (2, 4, 2, 2)
    x = jax.random.normal(k_x, (2, 4, 2, 2), dtype=jnp.float32)

    out = dqn_forward(x, kparams)
    out = jax.block_until_ready(out)

    # Reference check in plain JAX mirroring the kernel's bf16 weight path.
    w1, b1, w2, b2, w3, b3 = params
    f32 = lambda a: a.astype(jnp.bfloat16).astype(jnp.float32)
    xf = f32(x.reshape(2, -1))
    h1 = f32(jnp.maximum(xf @ f32(w1) + b1, 0.0))
    h2 = f32(jnp.maximum(h1 @ f32(w2) + b2, 0.0))
    ref = h2 @ f32(w3) + b3

    assert out.shape == (2, N_ACTIONS)
    assert jnp.allclose(out, ref, atol=1e-3, rtol=1e-3)

    print("KERNEL_OK")
</pallas_src>

<mosaic_0001>
module attributes {stable_mosaic.version = 11 : i64} {
  func.func @dqn_mlp_kernel(%arg0: i32, %arg1: memref<8x16xbf16, #tpu.memory_space<vmem>>, %arg2: memref<16x3136xbf16, #tpu.memory_space<vmem>>, %arg3: memref<1x3136xf32, #tpu.memory_space<vmem>>, %arg4: memref<3136x512xbf16, #tpu.memory_space<vmem>>, %arg5: memref<1x512xf32, #tpu.memory_space<vmem>>, %arg6: memref<512x128xbf16, #tpu.memory_space<vmem>>, %arg7: memref<1x128xf32, #tpu.memory_space<vmem>>, %arg8: memref<8x128xf32, #tpu.memory_space<vmem>>) attributes {dimension_semantics = [#tpu.dimension_semantics<parallel>], iteration_bounds = array<i64: 1>, scalar_prefetch = 0 : i64, scratch_operands = 0 : i64, tpu.core_type = #tpu.core_type<tc>, window_params = [{transform_indices = @transform_0, window_bounds = array<i64: 8, 16>}, {pipeline_mode = #tpu.pipeline_mode<synchronous>, transform_indices = @transform_1, window_bounds = array<i64: 16, 3136>}, {pipeline_mode = #tpu.pipeline_mode<synchronous>, transform_indices = @transform_2, window_bounds = array<i64: 1, 3136>}, {pipeline_mode = #tpu.pipeline_mode<synchronous>, transform_indices = @transform_3, window_bounds = array<i64: 3136, 512>}, {pipeline_mode = #tpu.pipeline_mode<synchronous>, transform_indices = @transform_4, window_bounds = array<i64: 1, 512>}, {pipeline_mode = #tpu.pipeline_mode<synchronous>, transform_indices = @transform_5, window_bounds = array<i64: 512, 128>}, {pipeline_mode = #tpu.pipeline_mode<synchronous>, transform_indices = @transform_6, window_bounds = array<i64: 1, 128>}, {transform_indices = @transform_7, window_bounds = array<i64: 8, 128>}]} {
    %c0 = arith.constant 0 : index
    %c0_0 = arith.constant 0 : index
    %0 = vector.load %arg1[%c0, %c0_0] : memref<8x16xbf16, #tpu.memory_space<vmem>>, vector<8x16xbf16>
    %c0_1 = arith.constant 0 : index
    %c0_2 = arith.constant 0 : index
    %1 = vector.load %arg2[%c0_1, %c0_2] : memref<16x3136xbf16, #tpu.memory_space<vmem>>, vector<16x3136xbf16>
    %cst = arith.constant dense<0.000000e+00> : vector<8x3136xf32>
    %2 = tpu.matmul %0, %1, %cst {dimension_numbers = #tpu.dot_dimension_numbers<[1], [0], [0], [1], [0, 0, 1, 1], [], []>} : vector<8x16xbf16>, vector<16x3136xbf16>, vector<8x3136xf32> -> vector<8x3136xf32>
    %c0_3 = arith.constant 0 : index
    %c0_4 = arith.constant 0 : index
    %3 = vector.load %arg3[%c0_3, %c0_4] : memref<1x3136xf32, #tpu.memory_space<vmem>>, vector<1x3136xf32>
    %4 = vector.broadcast %3 : vector<1x3136xf32> to vector<8x3136xf32>
    %5 = arith.addf %2, %4 : vector<8x3136xf32>
    %cst_5 = arith.constant 0.000000e+00 : f32
    %6 = vector.broadcast %cst_5 : f32 to vector<8x3136xf32>
    %7 = arith.maximumf %5, %6 : vector<8x3136xf32>
    %8 = arith.truncf %7 : vector<8x3136xf32> to vector<8x3136xbf16>
    %c0_6 = arith.constant 0 : index
    %c0_7 = arith.constant 0 : index
    %9 = vector.load %arg4[%c0_6, %c0_7] : memref<3136x512xbf16, #tpu.memory_space<vmem>>, vector<3136x512xbf16>
    %cst_8 = arith.constant dense<0.000000e+00> : vector<8x512xf32>
    %10 = tpu.matmul %8, %9, %cst_8 {dimension_numbers = #tpu.dot_dimension_numbers<[1], [0], [0], [1], [0, 0, 1, 1], [], []>} : vector<8x3136xbf16>, vector<3136x512xbf16>, vector<8x512xf32> -> vector<8x512xf32>
    %c0_9 = arith.constant 0 : index
    %c0_10 = arith.constant 0 : index
    %11 = vector.load %arg5[%c0_9, %c0_10] : memref<1x512xf32, #tpu.memory_space<vmem>>, vector<1x512xf32>
    %12 = vector.broadcast %11 : vector<1x512xf32> to vector<8x512xf32>
    %13 = arith.addf %10, %12 : vector<8x512xf32>
    %cst_11 = arith.constant 0.000000e+00 : f32
    %14 = vector.broadcast %cst_11 : f32 to vector<8x512xf32>
    %15 = arith.maximumf %13, %14 : vector<8x512xf32>
    %16 = arith.truncf %15 : vector<8x512xf32> to vector<8x512xbf16>
    %c0_12 = arith.constant 0 : index
    %c0_13 = arith.constant 0 : index
    %17 = vector.load %arg6[%c0_12, %c0_13] : memref<512x128xbf16, #tpu.memory_space<vmem>>, vector<512x128xbf16>
    %cst_14 = arith.constant dense<0.000000e+00> : vector<8x128xf32>
    %18 = tpu.matmul %16, %17, %cst_14 {dimension_numbers = #tpu.dot_dimension_numbers<[1], [0], [0], [1], [0, 0, 1, 1], [], []>} : vector<8x512xbf16>, vector<512x128xbf16>, vector<8x128xf32> -> vector<8x128xf32>
    %c0_15 = arith.constant 0 : index
    %c0_16 = arith.constant 0 : index
    %19 = vector.load %arg7[%c0_15, %c0_16] : memref<1x128xf32, #tpu.memory_space<vmem>>, vector<1x128xf32>
    %20 = vector.broadcast %19 : vector<1x128xf32> to vector<8x128xf32>
    %21 = arith.addf %18, %20 : vector<8x128xf32>
    %c0_17 = arith.constant 0 : index
    %c0_18 = arith.constant 0 : index
    %22 = vector.load %arg8[%c0_17, %c0_18] : memref<8x128xf32, #tpu.memory_space<vmem>>, vector<8x128xf32>
    tpu.vector_store %arg8[%c0_17, %c0_18], %21 {strides = array<i32>} : memref<8x128xf32, #tpu.memory_space<vmem>>, vector<8x128xf32>,
    return
  }
  func.func @transform_0(%arg0: i32) -> (i32, i32) {
    %c0_i32 = arith.constant 0 : i32
    %c0_i32_0 = arith.constant 0 : i32
    return %arg0, %c0_i32 : i32, i32
  }
  func.func @transform_1(%arg0: i32) -> (i32, i32) {
    %c0_i32 = arith.constant 0 : i32
    %c0_i32_0 = arith.constant 0 : i32
    %c0_i32_1 = arith.constant 0 : i32
    return %c0_i32, %c0_i32_0 : i32, i32
  }
  func.func @transform_2(%arg0: i32) -> (i32, i32) {
    %c0_i32 = arith.constant 0 : i32
    %c0_i32_0 = arith.constant 0 : i32
    %c0_i32_1 = arith.constant 0 : i32
    return %c0_i32, %c0_i32_0 : i32, i32
  }
  func.func @transform_3(%arg0: i32) -> (i32, i32) {
    %c0_i32 = arith.constant 0 : i32
    %c0_i32_0 = arith.constant 0 : i32
    %c0_i32_1 = arith.constant 0 : i32
    return %c0_i32, %c0_i32_0 : i32, i32
  }
  func.func @transform_4(%arg0: i32) -> (i32, i32) {
    %c0_i32 = arith.constant 0 : i32
    %c0_i32_0 = arith.constant 0 : i32
    %c0_i32_1 = arith.constant 0 : i32
    return %c0_i32, %c0_i32_0 : i32, i32
  }
  func.func @transform_5(%arg0: i32) -> (i32, i32) {
    %c0_i32 = arith.constant 0 : i32
    %c0_i32_0 = arith.constant 0 : i32
    %c0_i32_1 = arith.constant 0 : i32
    return %c0_i32, %c0_i32_0 : i32, i32
  }
  func.func @transform_6(%arg0: i32) -> (i32, i32) {
    %c0_i32 = arith.constant 0 : i32
    %c0_i32_0 = arith.constant 0 : i32
    %c0_i32_1 = arith.constant 0 : i32
    return %c0_i32, %c0_i32_0 : i32, i32
  }
  func.func @transform_7(%arg0: i32) -> (i32, i32) {
    %c0_i32 = arith.constant 0 : i32
    %c0_i32_0 = arith.constant 0 : i32
    return %arg0, %c0_i32 : i32, i32
  }
}

</mosaic_0001>

<bundles_post_ra>
// kernel: tpu_custom_call.1
= control target key start
LH: loop header
LB: loop body
LE: loop exit
PB: predicated region body
PF: predicated region fallthrough
CT: control target
= control target key end

     0   :  { %12 = vsyncpa [#allocation3], 0  ;;  %s11925_s0 = inlined_call_operand.hbm [shape: bf16[8,16], index: 0, kind: input, shape index: {}]   ;;  %s11926_s1 = inlined_call_operand.hbm [shape: bf16[16,3136], index: 1, kind: input, shape index: {}]   ;;  %s11927_s2 = inlined_call_operand.hbm [shape: f32[1,3136], index: 2, kind: input, shape index: {}]   ;;  %s11928_s3 = inlined_call_operand.hbm [shape: bf16[3136,512], index: 3, kind: input, shape index: {}]   ;;  %s11929_s4 = inlined_call_operand.hbm [shape: f32[1,512], index: 4, kind: input, shape index: {}]   ;;  %s11930_s5 = inlined_call_operand.hbm [shape: bf16[512,128], index: 5, kind: input, shape index: {}]   ;;  %s11931_s6 = inlined_call_operand.hbm [shape: f32[1,128], index: 6, kind: input, shape index: {}]   ;;  %s11932_s7 = inlined_call_operand.hbm [shape: f32[8,128], index: 7, kind: output, shape index: {}]  }
   0x1   :  { %13 = vsyncpa [#allocation6], 0 }
   0x2   :  { %14 = vsyncpa [#allocation9], 0 }
   0x3   :  { %15 = vsyncpa [#allocation12], 0  ;;  %s32_s26 = sshll.u32 %s11926_s1, 4  ;;  %s33_s26 = int_to_ptr.hbm [resolvable:$true] %s32_s26 }
   0x4   :  { %16 = vsyncpa [#allocation4], 0  ;;  %s11533_s27 = smov [#allocation5]   ;;  %s56_s8 = sshll.u32 %s11928_s3, 4  ;;  %s57_s8 = int_to_ptr.hbm [resolvable:$true] %s56_s8 }
   0x5   :  { %s34_s28 = sshll.u32 %s11533_s27, 4  ;;  %s11534_s9 = smov 1600   ;;  %s35_s28 = int_to_ptr.vmem [resolvable:$true] %s34_s28 }
   0x6   :  { %s11535_s10 = smov 100   ;;  %s11536_s11 = smov [#allocation8]  }
   0x7   :  { %40 = dma.hbm_to_vmem [thread:$0]  %s33_s26, 3200, %s35_s28, [#allocation6], %s11534_s9, %s11534_s9, %s11535_s10  }
   0x8   :  { %s58_s12 = sshll.u32 %s11536_s11, 4  ;;  %s11537_s13 = smov 256   ;;  %s59_s12 = int_to_ptr.vmem [resolvable:$true] %s58_s12 }
   0x9   :  { %s11538_s14 = smov 16   ;;  %s80_s16 = sshll.u32 %s11930_s5, 4  ;;  %s81_s16 = int_to_ptr.hbm [resolvable:$true] %s80_s16 }
   0xa   :  { %64 = dma.hbm_to_vmem [thread:$0]  %s57_s8, 100352, %s59_s12, [#allocation9], %s11537_s13, %s11537_s13, %s11538_s14  }
   0xb   :  { %s11539_s17 = smov [#allocation11]   ;;  %s22_s20 = sshll.u32 %s11925_s0, 4  ;;  %s23_s20 = int_to_ptr.hbm [resolvable:$true] %s22_s20 }
   0xc   :  { %s82_s18 = sshll.u32 %s11539_s17, 4  ;;  %s11540_s21 = smov 64   ;;  %s83_s18 = int_to_ptr.vmem [resolvable:$true] %s82_s18 }
   0xd   :  { %s11541_s22 = smov 4   ;;  %s11542_s23 = smov [#allocation2]  }
   0xe   :  { %88 = dma.hbm_to_vmem [thread:$0]  %s81_s16, 4096, %s83_s18, [#allocation12], %s11540_s21, %s11540_s21, %s11541_s22  }
   0xf   :  { %s24_s24 = sshll.u32 %s11542_s23, 4  ;;  %s46_s27 = sshll.u32 %s11927_s2, 4  ;;  %s25_s24 = int_to_ptr.vmem [resolvable:$true] %s24_s24  ;;  %s47_s27 = int_to_ptr.hbm [resolvable:$true] %s46_s27 }
  0x10   :  { %27 = dma.hbm_to_vmem [thread:$0]  %s23_s20, 64, %s25_s24, [#allocation3]  }
  0x11   :  { %s70_s29 = sshll.u32 %s11929_s4, 4  ;;  %s11543_s30 = smov [#allocation7]   ;;  %s71_s29 = int_to_ptr.hbm [resolvable:$true] %s70_s29 }
  0x12   :  { %s48_s8 = sshll.u32 %s11543_s30, 4  ;;  %s11544_s0 = smov [#allocation10]   ;;  %s49_s8 = int_to_ptr.vmem [resolvable:$true] %s48_s8 }
  0x13   :  { %51 = dma.hbm_to_vmem [thread:$0]  %s47_s27, 400, %s49_s8, [#allocation6]  }
  0x14   :  { %s72_s9 = sshll.u32 %s11544_s0, 4  ;;  %s94_s12 = sshll.u32 %s11931_s6, 4  ;;  %s73_s9 = int_to_ptr.vmem [resolvable:$true] %s72_s9  ;;  %s95_s12 = int_to_ptr.hbm [resolvable:$true] %s94_s12 }
  0x15   :  { %75 = dma.hbm_to_vmem [thread:$0]  %s71_s29, 64, %s73_s9, [#allocation9]  }
  0x16   :  { %s11545_s2 = smov [#allocation13]  }
  0x17   :  { %s96_s13 = sshll.u32 %s11545_s2, 4  ;;  %s97_s13 = int_to_ptr.vmem [resolvable:$true] %s96_s13 }
  0x18   :  { %99 = dma.hbm_to_vmem [thread:$0]  %s95_s12, 16, %s97_s13, [#allocation12]  }
  0x19   :  { %11523 = dma.done.wait [#allocation3], 64  }
  0x1a   :  { %11524 = vsyncadd [#allocation3], 4294967232 }
  0x1b   :  { %11525 = dma.done.wait [#allocation6], 3600  }
  0x1c   :  { %11526 = vsyncadd [#allocation6], 4294963696 }
  0x1d   :  { %11527 = dma.done.wait [#allocation9], 100416  }
  0x1e   :  { %11528 = vsyncadd [#allocation9], 4294866880 }
  0x1f   :  { %11529 = dma.done.wait [#allocation12], 4112  }
  0x20   :  { %11530 = vsyncadd [#allocation12], 4294963184  ;;  %vm340_vm0 = vcmask 130048   ;;  %v7080_v0 = vld [vmem:[#allocation5] sm:$0xf]  ;;  %vm5433_vm1 = vcmask 523264  }
  0x21   :  { %v10483_v1 = vld [vmem:[#allocation5 + $0x60] sm:$0xf0]  ;;  %v7082_v4 = vld [vmem:[#allocation5 + $0x64] sm:$0xf0]  ;;  %v10484_v6 = vld [vmem:[#allocation5 + $0x68] sm:$0xf0] }
  0x22   :  { %v10471_v2 = vld [vmem:[#allocation5 + $0x4] sm:$0xf]  ;;  %v7081_v3 = vor.u32 %v10483_v1, %v7080_v0  ;;  %v7088_v5 = vld [vmem:[#allocation5 + $0x8] sm:$0xf]  ;;  %v10472_v9 = vld [vmem:[#allocation5 + $0xc] sm:$0xf] }
  0x23   :  { %v7085_v7 = vor.u32 %v10471_v2, %v7082_v4  ;;  %v7089_v8 = vor.u32 %v10484_v6, %v7088_v5  ;;  %v7090_v10 = vld [vmem:[#allocation5 + $0x6c] sm:$0xf0]  ;;  %v11608_v11 = vld [vmem:[#allocation2] sm:$0xf]  ;;  %v10485_v14 = vld [vmem:[#allocation5 + $0x70] sm:$0xf0] }
  0x24   :  { %351 = vmatpush.bf16.msra.mxu0 %v7081_v3  ;;  %v7093_v12 = vor.u32 %v10472_v9, %v7090_v10  ;;  %v7096_v13 = vld [vmem:[#allocation5 + $0x10] sm:$0xf]  ;;  %v10473_v15 = vld [vmem:[#allocation5 + $0x14] sm:$0xf]  ;;  %v7098_v17 = vld [vmem:[#allocation5 + $0x74] sm:$0xf0] }
  0x25   :  { %364 = vmatpush.bf16.msra.mxu1 %v7085_v7  ;;  %377 = vmatpush.bf16.msra.mxu2 %v7089_v8  ;;  %v7097_v16 = vor.u32 %v10485_v14, %v7096_v13  ;;  %v7104_v18 = vld [vmem:[#allocation5 + $0x18] sm:$0xf]  ;;  %v10486_v19 = vld [vmem:[#allocation5 + $0x78] sm:$0xf0]  ;;  %v7101_v20 = vor.u32 %v10473_v15, %v7098_v17  ;;  %v7106_v23 = vld [vmem:[#allocation5 + $0x7c] sm:$0xf0] }
  0x26   :  { %390 = vmatpush.bf16.msra.mxu3 %v7093_v12  ;;  %v7105_v21 = vor.u32 %v10486_v19, %v7104_v18  ;;  %v10474_v22 = vld [vmem:[#allocation5 + $0x1c] sm:$0xf]  ;;  %v7112_v24 = vld [vmem:[#allocation5 + $0x20] sm:$0xf]  ;;  %v10487_v26 = vld [vmem:[#allocation5 + $0x80] sm:$0xf0] }
  0x27   :  { %7178 = vmatmul.msk.bf16.vlgmr.msra.gmra.mxu0 %vm340_vm0, %v11608_v11  ;;  %v7109_v25 = vor.u32 %v10474_v22, %v7106_v23  ;;  %v10475_v27 = vld [vmem:[#allocation5 + $0x24] sm:$0xf]  ;;  %v7114_v28 = vld [vmem:[#allocation5 + $0x84] sm:$0xf0]  ;;  %v7113_v29 = vor.u32 %v10487_v26, %v7112_v24  ;;  %v10488_v32 = vld [vmem:[#allocation5 + $0x88] sm:$0xf0] }
  0x28   :  { %7179 = vmatmul.msk.bf16.vlgmr.msra.gmra.mxu1 %vm340_vm0, %v11608_v11  ;;  %7180 = vmatmul.msk.bf16.vlgmr.msra.gmra.mxu2 %vm340_vm0, %v11608_v11  ;;  %v7117_v30 = vor.u32 %v10475_v27, %v7114_v28  ;;  %v7120_v31 = vld [vmem:[#allocation5 + $0x28] sm:$0xf]  ;;  %v10476_v33 = vld [vmem:[#allocation5 + $0x2c] sm:$0xf]  ;;  %v7122_v35 = vld [vmem:[#allocation5 + $0x8c] sm:$0xf0] }
  0x29   :  { %7181 = vmatmul.msk.bf16.vlgmr.msra.gmra.mxu3 %vm340_vm0, %v11608_v11  ;;  %403 = vmatpush.bf16.msrb.mxu0 %v7097_v16  ;;  %v7121_v34 = vor.u32 %v10488_v32, %v7120_v31  ;;  %v7125_v36 = vor.u32 %v10476_v33, %v7122_v35  ;;  %v7128_v37 = vld [vmem:[#allocation5 + $0x30] sm:$0xf]  ;;  %v10489_v38 = vld [vmem:[#allocation5 + $0x90] sm:$0xf0]  ;;  %v7136_v40 = vld [vmem:[#allocation5 + $0x38] sm:$0xf] }
  0x2a   :  { %416 = vmatpush.bf16.msrb.mxu1 %v7101_v20  ;;  %429 = vmatpush.bf16.msrb.mxu2 %v7105_v21  ;;  %v7129_v39 = vor.u32 %v10489_v38, %v7128_v37  ;;  %v10490_v41 = vld [vmem:[#allocation5 + $0x98] sm:$0xf0]  ;;  %v7138_v44 = vld [vmem:[#allocation5 + $0x9c] sm:$0xf0]  ;;  %v10477_v45 = vld [vmem:[#allocation5 + $0x34] sm:$0xf] }
  0x2b   :  { %442 = vmatpush.bf16.msrb.mxu3 %v7109_v25  ;;  %v10478_v42 = vld [vmem:[#allocation5 + $0x3c] sm:$0xf]  ;;  %v7137_v43 = vor.u32 %v10490_v41, %v7136_v40  ;;  %v7130_v46 = vld [vmem:[#allocation5 + $0x94] sm:$0xf0]  ;;  %v7144_v49 = vld [vmem:[#allocation5 + $0x40] sm:$0xf] }
  0x2c   :  { %v7141_v47 = vor.u32 %v10478_v42, %v7138_v44  ;;  %v7133_v48 = vor.u32 %v10477_v45, %v7130_v46  ;;  %v10491_v50 = vld [vmem:[#allocation5 + $0xa0] sm:$0xf0]  ;;  %v7152_v52 = vld [vmem:[#allocation5 + $0x48] sm:$0xf]  ;;  %v10492_v53 = vld [vmem:[#allocation5 + $0xa8] sm:$0xf0] }
  0x2d   :  { %455 = vmatpush.bf16.msra.mxu0 %v7113_v29  ;;  %v7145_v51 = vor.u32 %v10491_v50, %v7144_v49  ;;  %v10480_v54 = vld [vmem:[#allocation5 + $0x4c] sm:$0xf]  ;;  %v7153_v55 = vor.u32 %v10492_v53, %v7152_v52  ;;  %v7154_v56 = vld [vmem:[#allocation5 + $0xac] sm:$0xf0]  ;;  %v10479_v57 = vld [vmem:[#allocation5 + $0x44] sm:$0xf] }
  0x2e   :  { %468 = vmatpush.bf16.msra.mxu1 %v7117_v30  ;;  %481 = vmatpush.bf16.msra.mxu2 %v7121_v34  ;;  %v7146_v58 = vld [vmem:[#allocation5 + $0xa4] sm:$0xf0]  ;;  %v7157_v59 = vor.u32 %v10480_v54, %v7154_v56  ;;  %v10481_v61 = vld [vmem:[#allocation5 + $0x54] sm:$0xf]  ;;  %v7162_v62 = vld [vmem:[#allocation5 + $0xb4] sm:$0xf0] }
  0x2f   :  { %494 = vmatpush.bf16.msra.mxu3 %v7125_v36  ;;  %v7149_v60 = vor.u32 %v10479_v57, %v7146_v58  ;;  %v7168_v63 = vld [vmem:[#allocation5 + $0x58] sm:$0xf]  ;;  %v10494_v0 = vld [vmem:[#allocation5 + $0xb8] sm:$0xf0]  ;;  %v7160_v1 = vld [vmem:[#allocation5 + $0x50] sm:$0xf]  ;;  %v7165_v5 = vor.u32 %v10481_v61, %v7162_v62 }
  0x30   :  { %v10493_v2 = vld [vmem:[#allocation5 + $0xb0] sm:$0xf0]  ;;  %v10482_v3 = vld [vmem:[#allocation5 + $0x5c] sm:$0xf]  ;;  %v7170_v4 = vld [vmem:[#allocation5 + $0xbc] sm:$0xf0]  ;;  %v7169_v6 = vor.u32 %v10494_v0, %v7168_v63 }
  0x31   :  { %v7161_v7 = vor.u32 %v10493_v2, %v7160_v1  ;;  %v7173_v8 = vor.u32 %v10482_v3, %v7170_v4  ;;  %v7317_v9 = vld [vmem:[#allocation8 + $0xe0] sm:$0xf]  ;;  %v10526_v10 = vld [vmem:[#allocation8 + $0xec] sm:$0xf0]  ;;  %s11546_s4 = smov [#allocation14]   ;;  %s7065_s15 = sshll.u32 %s11932_s7, 4  ;;  %s7066_s15 = int_to_ptr.hbm [resolvable:$true] %s7065_s15 }
  0x32   :  { %v7445_v12 = vld [vmem:[#allocation8 + $0x1e0] sm:$0xf]  ;;  %v10558_v13 = vld [vmem:[#allocation8 + $0x1ec] sm:$0xf0]  ;;  %v7318_v18 = vor.u32 %v10526_v10, %v7317_v9  ;;  %s7063_s6 = sshll.u32 %s11546_s4, 4  ;;  %s7064_s6 = int_to_ptr.vmem [resolvable:$true] %s7063_s6 }
  0x33   :  { %v7176_v14 = vld [vmem:[#allocation5 + $0x60] sm:$0xf]  ;;  %v10495_v15 = vld [vmem:[#allocation5 + $0xc0] sm:$0xf0]  ;;  %v10590_v17 = vld [vmem:[#allocation8 + $0x2ec] sm:$0xf0]  ;;  %v7446_v19 = vor.u32 %v10558_v13, %v7445_v12 }
  0x34   :  { %v7573_v16 = vld [vmem:[#allocation8 + $0x2e0] sm:$0xf]  ;;  %v10522_v21 = vld [vmem:[#allocation8 + $0xcc] sm:$0xf0]  ;;  %v7177_v22 = vor.u32 %v10495_v15, %v7176_v14 }
  0x35   :  { %v7301_v20 = vld [vmem:[#allocation8 + $0xc0] sm:$0xf]  ;;  %v10554_v24 = vld [vmem:[#allocation8 + $0x1cc] sm:$0xf0]  ;;  %v7574_v25 = vor.u32 %v10590_v17, %v7573_v16 }
  0x36   :  { %v7429_v23 = vld [vmem:[#allocation8 + $0x1c0] sm:$0xf]  ;;  %v10586_v27 = vld [vmem:[#allocation8 + $0x2cc] sm:$0xf0]  ;;  %v7302_v28 = vor.u32 %v10522_v21, %v7301_v20 }
  0x37   :  { %7182 = vmatmul.msk.bf16.vlgmr.msrb.gmra.mxu0 %vm340_vm0, %v11608_v11  ;;  %v7557_v26 = vld [vmem:[#allocation8 + $0x2c0] sm:$0xf]  ;;  %v7430_v29 = vor.u32 %v10554_v24, %v7429_v23  ;;  %v10518_v31 = vld [vmem:[#allocation8 + $0xac] sm:$0xf0] }
  0x38   :  { %7183 = vmatmul.msk.bf16.vlgmr.msrb.gmra.mxu1 %vm340_vm0, %v11608_v11  ;;  %7184 = vmatmul.msk.bf16.vlgmr.msrb.gmra.mxu2 %vm340_vm0, %v11608_v11  ;;  %v7285_v30 = vld [vmem:[#allocation8 + $0xa0] sm:$0xf]  ;;  %v10550_v33 = vld [vmem:[#allocation8 + $0x1ac] sm:$0xf0]  ;;  %v7558_v34 = vor.u32 %v10586_v27, %v7557_v26 }
  0x39   :  { %7185 = vmatmul.msk.bf16.vlgmr.msrb.gmra.mxu3 %vm340_vm0, %v11608_v11  ;;  %507 = vmatpush.bf16.msrb.mxu0 %v7129_v39  ;;  %v7413_v32 = vld [vmem:[#allocation8 + $0x1a0] sm:$0xf]  ;;  %v10582_v36 = vld [vmem:[#allocation8 + $0x2ac] sm:$0xf0]  ;;  %v7286_v37 = vor.u32 %v10518_v31, %v7285_v30 }
  0x3a   :  { %533 = vmatpush.bf16.msrb.mxu2 %v7137_v43  ;;  %546 = vmatpush.bf16.msrb.mxu3 %v7141_v47  ;;  %v7541_v35 = vld [vmem:[#allocation8 + $0x2a0] sm:$0xf]  ;;  %v7414_v38 = vor.u32 %v10550_v33, %v7413_v32  ;;  %v10514_v40 = vld [vmem:[#allocation8 + $0x8c] sm:$0xf0] }
  0x3b   :  { %520 = vmatpush.bf16.msrb.mxu1 %v7133_v48  ;;  %v7269_v39 = vld [vmem:[#allocation8 + $0x80] sm:$0xf]  ;;  %v10546_v42 = vld [vmem:[#allocation8 + $0x18c] sm:$0xf0]  ;;  %v7542_v43 = vor.u32 %v10582_v36, %v7541_v35 }
  0x3c   :  { %v7397_v41 = vld [vmem:[#allocation8 + $0x180] sm:$0xf]  ;;  %v10578_v45 = vld [vmem:[#allocation8 + $0x28c] sm:$0xf0]  ;;  %v7270_v48 = vor.u32 %v10514_v40, %v7269_v39 }
  0x3d   :  { %v7525_v44 = vld [vmem:[#allocation8 + $0x280] sm:$0xf]  ;;  %v10622_v47 = vld [vmem:[#allocation8 + $0x3ec] sm:$0xf0]  ;;  %v7398_v49 = vor.u32 %v10546_v42, %v7397_v41 }
  0x3e   :  { %v7701_v46 = vld [vmem:[#allocation8 + $0x3e0] sm:$0xf]  ;;  %v10542_v53 = vld [vmem:[#allocation8 + $0x16c] sm:$0xf0]  ;;  %v7526_v54 = vor.u32 %v10578_v45, %v7525_v44 }
  0x3f   :  { %v7253_v50 = vld [vmem:[#allocation8 + $0x60] sm:$0xf]  ;;  %v10574_v57 = vld [vmem:[#allocation8 + $0x26c] sm:$0xf0] }
  0x40   :  { %v7381_v52 = vld [vmem:[#allocation8 + $0x160] sm:$0xf]  ;;  %v10506_v63 = vld [vmem:[#allocation8 + $0x4c] sm:$0xf0] }
  0x41   :  { %v7509_v56 = vld [vmem:[#allocation8 + $0x260] sm:$0xf]  ;;  %v7382_v61 = vor.u32 %v10542_v53, %v7381_v52  ;;  %v10538_v1 = vld [vmem:[#allocation8 + $0x14c] sm:$0xf0] }
  0x42   :  { %v7685_v58 = vld [vmem:[#allocation8 + $0x3c0] sm:$0xf]  ;;  %v7510_v2 = vor.u32 %v10574_v57, %v7509_v56  ;;  %v10502_v12 = vld [vmem:[#allocation8 + $0x2c] sm:$0xf0] }
  0x43   :  { %v7237_v62 = vld [vmem:[#allocation8 + $0x40] sm:$0xf]  ;;  %v10534_v14 = vld [vmem:[#allocation8 + $0x12c] sm:$0xf0] }
  0x44   :  { %v7365_v0 = vld [vmem:[#allocation8 + $0x140] sm:$0xf]  ;;  %v10610_v20 = vld [vmem:[#allocation8 + $0x38c] sm:$0xf0] }
  0x45   :  { %v7493_v4 = vld [vmem:[#allocation8 + $0x240] sm:$0xf]  ;;  %v7366_v9 = vor.u32 %v10538_v1, %v7365_v0  ;;  %v10498_v24 = vld [vmem:[#allocation8 + $0xc] sm:$0xf0] }
  0x46   :  { %v7221_v10 = vld [vmem:[#allocation8 + $0x20] sm:$0xf]  ;;  %v10530_v26 = vld [vmem:[#allocation8 + $0x10c] sm:$0xf0] }
  0x47   :  { %7186 = vmatmul.msk.bf16.vlgmr.msra.gmra.mxu0 %vm340_vm0, %v11608_v11  ;;  %v7349_v13 = vld [vmem:[#allocation8 + $0x120] sm:$0xf]  ;;  %v7222_v21 = vor.u32 %v10502_v12, %v7221_v10  ;;  %v10686_v33 = vld [vmem:[#allocation8 + $0x5ec] sm:$0xf0] }
  0x48   :  { %7187 = vmatmul.msk.bf16.vlgmr.msra.gmra.mxu1 %vm340_vm0, %v11608_v11  ;;  %7188 = vmatmul.msk.bf16.vlgmr.msra.gmra.mxu2 %vm340_vm0, %v11608_v11  ;;  %v7477_v17 = vld [vmem:[#allocation8 + $0x220] sm:$0xf]  ;;  %v10718_v41 = vld [vmem:[#allocation8 + $0x6ec] sm:$0xf0] }
  0x49   :  { %7189 = vmatmul.msk.bf16.vlgmr.msra.gmra.mxu3 %vm340_vm0, %v11608_v11  ;;  %559 = vmatpush.bf16.msra.mxu0 %v7145_v51  ;;  %v10510_v51 = vld [vmem:[#allocation8 + $0x6c] sm:$0xf0]  ;;  %v7205_v23 = vld [vmem:[#allocation8] sm:$0xf] }
  0x4a   :  { %585 = vmatpush.bf16.msra.mxu2 %v7153_v55  ;;  %598 = vmatpush.bf16.msra.mxu3 %v7157_v59  ;;  %v7702_v55 = vor.u32 %v10622_v47, %v7701_v46  ;;  %v10618_v59 = vld [vmem:[#allocation8 + $0x3cc] sm:$0xf0]  ;;  %v7829_v27 = vld [vmem:[#allocation8 + $0x4e0] sm:$0xf]  ;;  %v7206_v35 = vor.u32 %v10498_v24, %v7205_v23 }
  0x4b   :  { %572 = vmatpush.bf16.msra.mxu1 %v7149_v60  ;;  %v7254_v60 = vor.u32 %v10510_v51, %v7253_v50  ;;  %v7686_v3 = vor.u32 %v10618_v59, %v7685_v58  ;;  %v7637_v31 = vld [vmem:[#allocation8 + $0x360] sm:$0xf]  ;;  %v10650_v44 = vld [vmem:[#allocation8 + $0x4cc] sm:$0xf0] }
  0x4c   :  { %v7957_v32 = vld [vmem:[#allocation8 + $0x5e0] sm:$0xf]  ;;  %v10682_v47 = vld [vmem:[#allocation8 + $0x5cc] sm:$0xf0] }
  0x4d   :  { %v7461_v36 = vld [vmem:[#allocation8 + $0x200] sm:$0xf]  ;;  %v7958_v42 = vor.u32 %v10686_v33, %v7957_v32  ;;  %v10602_v50 = vld [vmem:[#allocation8 + $0x34c] sm:$0xf0] }
  0x4e   :  { %v8085_v40 = vld [vmem:[#allocation8 + $0x6e0] sm:$0xf]  ;;  %v10646_v57 = vld [vmem:[#allocation8 + $0x4ac] sm:$0xf0] }
  0x4f   :  { %v7941_v46 = vld [vmem:[#allocation8 + $0x5c0] sm:$0xf]  ;;  %v8086_v51 = vor.u32 %v10718_v41, %v8085_v40  ;;  %v10634_v32 = vld [vmem:[#allocation8 + $0x44c] sm:$0xf0] }
  0x50   :  { %v8069_v53 = vld [vmem:[#allocation8 + $0x6c0] sm:$0xf]  ;;  %v10698_v41 = vld [vmem:[#allocation8 + $0x64c] sm:$0xf0] }
  0x51   :  { %v7797_v56 = vld [vmem:[#allocation8 + $0x4a0] sm:$0xf] }
  0x52   :  { %v7925_v59 = vld [vmem:[#allocation8 + $0x5a0] sm:$0xf]  ;;  %v7798_v0 = vor.u32 %v10646_v57, %v7797_v56  ;;  %v10626_v56 = vld [vmem:[#allocation8 + $0x40c] sm:$0xf0] }
  0x53   :  { %v8053_v1 = vld [vmem:[#allocation8 + $0x6a0] sm:$0xf] }
  0x54   :  { %v8213_v10 = vld [vmem:[#allocation8 + $0x7e0] sm:$0xf] }
  0x55   :  { %v8197_v24 = vld [vmem:[#allocation8 + $0x7c0] sm:$0xf] }
  0x56   :  { %v7877_v33 = vld [vmem:[#allocation8 + $0x540] sm:$0xf] }
  0x57   :  { %7190 = vmatmul.msk.bf16.vlgmr.msrb.gmra.mxu0 %vm340_vm0, %v11608_v11  ;;  %v8005_v40 = vld [vmem:[#allocation8 + $0x640] sm:$0xf] }
  0x58   :  { %7192 = vmatmul.msk.bf16.vlgmr.msrb.gmra.mxu2 %vm340_vm0, %v11608_v11  ;;  %7191 = vmatmul.msk.bf16.vlgmr.msrb.gmra.mxu1 %vm340_vm0, %v11608_v11  ;;  %v7845_v57 = vld [vmem:[#allocation8 + $0x500] sm:$0xf] }
  0x59   :  { %7193 = vmatmul.msk.bf16.vlgmr.msrb.gmra.mxu3 %vm340_vm0, %v11608_v11  ;;  %624 = vmatpush.bf16.msrb.mxu1 %v7165_v5  ;;  %v10570_v5 = vld [vmem:[#allocation8 + $0x24c] sm:$0xf0] }
  0x5a   :  { %637 = vmatpush.bf16.msrb.mxu2 %v7169_v6  ;;  %611 = vmatpush.bf16.msrb.mxu0 %v7161_v7  ;;  %v7669_v6 = vld [vmem:[#allocation8 + $0x3a0] sm:$0xf]  ;;  %v10614_v7 = vld [vmem:[#allocation8 + $0x3ac] sm:$0xf0]  ;;  %v7494_v15 = vor.u32 %v10570_v5, %v7493_v4 }
  0x5b   :  { %650 = vmatpush.bf16.msrb.mxu3 %v7173_v8  ;;  %v7238_v8 = vor.u32 %v10506_v63, %v7237_v62  ;;  %v7670_v16 = vor.u32 %v10614_v7, %v7669_v6  ;;  %v10598_v62 = vld [vmem:[#allocation8 + $0x32c] sm:$0xf0]  ;;  %v7781_v4 = vld [vmem:[#allocation8 + $0x480] sm:$0xf] }
  0x5c   :  { %v7909_v6 = vld [vmem:[#allocation8 + $0x580] sm:$0xf]  ;;  %v10674_v7 = vld [vmem:[#allocation8 + $0x58c] sm:$0xf0] }
  0x67   :  { %7194 = vmatmul.msk.bf16.vlgmr.msra.gmra.mxu0 %vm340_vm0, %v11608_v11 }
  0x68   :  { %7196 = vmatmul.msk.bf16.vlgmr.msra.gmra.mxu2 %vm340_vm0, %v11608_v11  ;;  %7195 = vmatmul.msk.bf16.vlgmr.msra.gmra.mxu1 %vm340_vm0, %v11608_v11 }
  0x69   :  { %7197 = vmatmul.msk.bf16.vlgmr.msra.gmra.mxu3 %vm340_vm0, %v11608_v11  ;;  %5437 = vmatpush.bf16.msra.mxu1 %v7318_v18  ;;  %v10566_v18 = vld [vmem:[#allocation8 + $0x22c] sm:$0xf0] }
  0x6a   :  { %5450 = vmatpush.bf16.msra.mxu2 %v7446_v19  ;;  %663 = vmatpush.bf16.msra.mxu0 %v7177_v22  ;;  %v7653_v19 = vld [vmem:[#allocation8 + $0x380] sm:$0xf]  ;;  %v7350_v22 = vor.u32 %v10534_v14, %v7349_v13  ;;  %v10750_v13 = vld [vmem:[#allocation8 + $0x7ec] sm:$0xf0] }
  0x6b   :  { %5463 = vmatpush.bf16.msra.mxu3 %v7574_v25  ;;  %v7333_v25 = vld [vmem:[#allocation8 + $0x100] sm:$0xf]  ;;  %v7654_v30 = vor.u32 %v10610_v20, %v7653_v19  ;;  %v10638_v19 = vld [vmem:[#allocation8 + $0x46c] sm:$0xf0]  ;;  %v8214_v23 = vor.u32 %v10750_v13, %v8213_v10 }
  0x6d   :  { %5438 = vmatpush.bf16.msra.mxu1 %v7302_v28  ;;  %v10654_v28 = vld [vmem:[#allocation8 + $0x4ec] sm:$0xf0] }
  0x6e   :  { %5451 = vmatpush.bf16.msra.mxu2 %v7430_v29  ;;  %v7478_v29 = vor.u32 %v10566_v18, %v7477_v17  ;;  %v7830_v39 = vor.u32 %v10654_v28, %v7829_v27  ;;  %v7910_v17 = vor.u32 %v10674_v7, %v7909_v6  ;;  %v7765_v18 = vld [vmem:[#allocation8 + $0x460] sm:$0xf] }
  0x6f   :  { %5464 = vmatpush.bf16.msra.mxu3 %v7558_v34  ;;  %v10606_v34 = vld [vmem:[#allocation8 + $0x36c] sm:$0xf0]  ;;  %v7766_v27 = vor.u32 %v10638_v19, %v7765_v18  ;;  %v8021_v28 = vld [vmem:[#allocation8 + $0x660] sm:$0xf] }
  0x70   :  { %v7638_v45 = vor.u32 %v10606_v34, %v7637_v31  ;;  %v7749_v31 = vld [vmem:[#allocation8 + $0x440] sm:$0xf]  ;;  %v10666_v34 = vld [vmem:[#allocation8 + $0x54c] sm:$0xf0] }
  0x71   :  { %5439 = vmatpush.bf16.msra.mxu1 %v7286_v37  ;;  %v10562_v37 = vld [vmem:[#allocation8 + $0x20c] sm:$0xf0]  ;;  %v8133_v7 = vld [vmem:[#allocation8 + $0x740] sm:$0xf] }
  0x72   :  { %5452 = vmatpush.bf16.msra.mxu2 %v7414_v38  ;;  %v7334_v38 = vor.u32 %v10530_v26, %v7333_v25  ;;  %v10746_v26 = vld [vmem:[#allocation8 + $0x7cc] sm:$0xf0]  ;;  %v8117_v19 = vld [vmem:[#allocation8 + $0x720] sm:$0xf] }
  0x73   :  { %5465 = vmatpush.bf16.msra.mxu3 %v7542_v43  ;;  %v7813_v43 = vld [vmem:[#allocation8 + $0x4c0] sm:$0xf]  ;;  %v10814_v18 = vld [vmem:[#allocation8 + $0x9ec] sm:$0xf0] }
  0x74   :  { %v7814_v52 = vor.u32 %v10650_v44, %v7813_v43  ;;  %v7733_v43 = vld [vmem:[#allocation8 + $0x420] sm:$0xf]  ;;  %v10630_v44 = vld [vmem:[#allocation8 + $0x42c] sm:$0xf0] }
  0x75   :  { %5440 = vmatpush.bf16.msra.mxu1 %v7270_v48  ;;  %v7462_v48 = vor.u32 %v10562_v37, %v7461_v36  ;;  %v8181_v36 = vld [vmem:[#allocation8 + $0x7a0] sm:$0xf] }
  0x76   :  { %5453 = vmatpush.bf16.msra.mxu2 %v7398_v49  ;;  %v7621_v49 = vld [vmem:[#allocation8 + $0x340] sm:$0xf] }
  0x77   :  { %7198 = vmatmul.msk.bf16.vlgmr.msrb.gmra.mxu0 %vm340_vm0, %v11608_v11  ;;  %5466 = vmatpush.bf16.msra.mxu3 %v7526_v54  ;;  %v10714_v54 = vld [vmem:[#allocation8 + $0x6cc] sm:$0xf0]  ;;  %v7622_v58 = vor.u32 %v10602_v50, %v7621_v49  ;;  %v8006_v49 = vor.u32 %v10698_v41, %v8005_v40  ;;  %v8597_v41 = vld [vmem:[#allocation8 + $0xae0] sm:$0xf] }
  0x78   :  { %5476 = vmatpush.bf16.msrb.mxu0 %v7702_v55  ;;  %7200 = vmatmul.msk.bf16.vlgmr.msrb.gmra.mxu2 %vm340_vm0, %v11608_v11  ;;  %v7942_v55 = vor.u32 %v10682_v47, %v7941_v46  ;;  %v8070_v63 = vor.u32 %v10714_v54, %v8069_v53  ;;  %v10662_v46 = vld [vmem:[#allocation8 + $0x52c] sm:$0xf0] }
  0x79   :  { %5441 = vmatpush.bf16.msra.mxu1 %v7254_v60  ;;  %7201 = vmatmul.msk.bf16.vlgmr.msrb.gmra.mxu3 %vm340_vm0, %v11608_v11  ;;  %v10678_v60 = vld [vmem:[#allocation8 + $0x5ac] sm:$0xf0] }
  0x7a   :  { %5454 = vmatpush.bf16.msra.mxu2 %v7382_v61  ;;  %7199 = vmatmul.msk.bf16.vlgmr.msrb.gmra.mxu1 %vm340_vm0, %v11608_v11  ;;  %v7605_v61 = vld [vmem:[#allocation8 + $0x320] sm:$0xf]  ;;  %v10738_v50 = vld [vmem:[#allocation8 + $0x78c] sm:$0xf0] }
  0x7b   :  { %5467 = vmatpush.bf16.msra.mxu3 %v7510_v2  ;;  %v10710_v2 = vld [vmem:[#allocation8 + $0x6ac] sm:$0xf0]  ;;  %v7606_v5 = vor.u32 %v10598_v62, %v7605_v61  ;;  %v8149_v61 = vld [vmem:[#allocation8 + $0x760] sm:$0xf] }
  0x7c   :  { %5477 = vmatpush.bf16.msrb.mxu0 %v7686_v3  ;;  %v7926_v3 = vor.u32 %v10678_v60, %v7925_v59  ;;  %v8054_v12 = vor.u32 %v10710_v2, %v8053_v1  ;;  %v10694_v53 = vld [vmem:[#allocation8 + $0x62c] sm:$0xf0]  ;;  %v11660_v60 = vld [vmem:[#allocation7] sm:$0xff]  ;;  %v7973_v1 = vld [vmem:[#allocation8 + $0x600] sm:$0xf] }
  0x7d   :  { %5442 = vmatpush.bf16.msra.mxu1 %v7238_v8  ;;  %v7589_v8 = vld [vmem:[#allocation8 + $0x300] sm:$0xf]  ;;  %v10690_v2 = vld [vmem:[#allocation8 + $0x60c] sm:$0xf0]  ;;  %v165_v6 = vperm.slane %v11660_v60, 1 }
  0x7e   :  { %5455 = vmatpush.bf16.msra.mxu2 %v7366_v9  ;;  %v10594_v9 = vld [vmem:[#allocation8 + $0x30c] sm:$0xf0] }
  0x7f   :  { %5468 = vmatpush.bf16.msra.mxu3 %v7494_v15  ;;  %v8037_v15 = vld [vmem:[#allocation8 + $0x680] sm:$0xf]  ;;  %v7590_v20 = vor.u32 %v10594_v9, %v7589_v8  ;;  %v10730_v8 = vld [vmem:[#allocation8 + $0x74c] sm:$0xf0] }
  0x80   :  { %5478 = vmatpush.bf16.msrb.mxu0 %v7670_v16  ;;  %v10706_v16 = vld [vmem:[#allocation8 + $0x68c] sm:$0xf0]  ;;  %v8134_v13 = vor.u32 %v10730_v8, %v8133_v7 }
  0x81   :  { %5443 = vmatpush.bf16.msra.mxu1 %v7222_v21  ;;  %v7893_v21 = vld [vmem:[#allocation8 + $0x560] sm:$0xf]  ;;  %v8038_v25 = vor.u32 %v10706_v16, %v8037_v15  ;;  %v10782_v15 = vld [vmem:[#allocation8 + $0x8ec] sm:$0xf0] }
  0x82   :  { %5456 = vmatpush.bf16.msra.mxu2 %v7350_v22  ;;  %v10670_v22 = vld [vmem:[#allocation8 + $0x56c] sm:$0xf0]  ;;  %v8469_v16 = vld [vmem:[#allocation8 + $0x9e0] sm:$0xf] }
  0x83   :  { %5469 = vmatpush.bf16.msra.mxu3 %v7478_v29  ;;  %v10702_v29 = vld [vmem:[#allocation8 + $0x66c] sm:$0xf0] }
  0x84   :  { %5479 = vmatpush.bf16.msrb.mxu0 %v7654_v30  ;;  %v7894_v30 = vor.u32 %v10670_v22, %v7893_v21  ;;  %v8022_v37 = vor.u32 %v10702_v29, %v8021_v28  ;;  %v8325_v29 = vld [vmem:[#allocation8 + $0x8c0] sm:$0xf] }
  0x85   :  { %5444 = vmatpush.bf16.msra.mxu1 %v7206_v35  ;;  %v8198_v35 = vor.u32 %v10746_v26, %v8197_v24  ;;  %v167_v24 = vperm.slane %v11660_v60, 3 }
  0x86   :  { %5457 = vmatpush.bf16.msra.mxu2 %v7334_v38  ;;  %v10742_v38 = vld [vmem:[#allocation8 + $0x7ac] sm:$0xf0] }
  0x87   :  { %7202 = vmatmul.msk.bf16.vlgmr.msra.gmra.mxu0 %vm340_vm0, %v11608_v11  ;;  %5470 = vmatpush.bf16.msra.mxu3 %v7462_v48  ;;  %v10642_v11 = vld [vmem:[#allocation8 + $0x48c] sm:$0xf0]  ;;  %v8182_v47 = vor.u32 %v10742_v38, %v8181_v36  ;;  %v8165_v48 = vld [vmem:[#allocation8 + $0x780] sm:$0xf] }
  0x88   :  { %5480 = vmatpush.bf16.msrb.mxu0 %v7638_v45  ;;  %v7782_v14 = vor.u32 %v10642_v11, %v7781_v4  ;;  %v7861_v45 = vld [vmem:[#allocation8 + $0x520] sm:$0xf]  ;;  %v8166_v59 = vor.u32 %v10738_v50, %v8165_v48  ;;  %v164_v4 = vperm.slane %v11660_v60, 0  ;;  %v10878_v48 = vld [vmem:[#allocation8 + $0xbec] sm:$0xf0] }
  0x89   :  { %5489 = vmatpush.bf16.msrb.mxu1 %v7830_v39  ;;  %v7750_v39 = vor.u32 %v10634_v32, %v7749_v31  ;;  %v7862_v54 = vor.u32 %v10662_v46, %v7861_v45  ;;  %v8453_v31 = vld [vmem:[#allocation8 + $0x9c0] sm:$0xf]  ;;  %v10774_v50 = vld [vmem:[#allocation8 + $0x8ac] sm:$0xf0] }
  0x8a   :  { %5502 = vmatpush.bf16.msrb.mxu2 %v7958_v42  ;;  %v7878_v42 = vor.u32 %v10666_v34, %v7877_v33  ;;  %v10810_v33 = vld [vmem:[#allocation8 + $0x9cc] sm:$0xf0]  ;;  %v8101_v34 = vld [vmem:[#allocation8 + $0x700] sm:$0xf] }
  0x8b   :  { %5515 = vmatpush.bf16.msrb.mxu3 %v8086_v51  ;;  %v7734_v51 = vor.u32 %v10630_v44, %v7733_v43  ;;  %v8725_v43 = vld [vmem:[#allocation8 + $0xbe0] sm:$0xf]  ;;  %v8454_v46 = vor.u32 %v10810_v33, %v8453_v31  ;;  %v170_v33 = vperm.slane %v11660_v60, 6 }
  0x8c   :  { %5481 = vmatpush.bf16.msrb.mxu0 %v7622_v58  ;;  %v10658_v58 = vld [vmem:[#allocation8 + $0x50c] sm:$0xf0] }
  0x8d   :  { %5490 = vmatpush.bf16.msrb.mxu1 %v7814_v52  ;;  %v7989_v52 = vld [vmem:[#allocation8 + $0x620] sm:$0xf] }
  0x8e   :  { %5503 = vmatpush.bf16.msrb.mxu2 %v7942_v55  ;;  %v7717_v55 = vld [vmem:[#allocation8 + $0x400] sm:$0xf]  ;;  %v7990_v62 = vor.u32 %v10694_v53, %v7989_v52  ;;  %v10806_v53 = vld [vmem:[#allocation8 + $0x9ac] sm:$0xf0] }
  0x8f   :  { %5516 = vmatpush.bf16.msrb.mxu3 %v8070_v63  ;;  %v10734_v63 = vld [vmem:[#allocation8 + $0x76c] sm:$0xf0]  ;;  %v8437_v52 = vld [vmem:[#allocation8 + $0x9a0] sm:$0xf] }
  0x90   :  { %5482 = vmatpush.bf16.msrb.mxu0 %v7606_v5  ;;  %v8150_v11 = vor.u32 %v10734_v63, %v8149_v61  ;;  %v7974_v5 = vor.u32 %v10690_v2, %v7973_v1  ;;  %v8581_v61 = vld [vmem:[#allocation8 + $0xac0] sm:$0xf]  ;;  %v8438_v1 = vor.u32 %v10806_v53, %v8437_v52  ;;  %v10874_v2 = vld [vmem:[#allocation8 + $0xbcc] sm:$0xf0] }
  0x91   :  { %5491 = vmatpush.bf16.msrb.mxu1 %v7798_v0  ;;  %v7718_v0 = vor.u32 %v10626_v56, %v7717_v55  ;;  %v168_v56 = vperm.slane %v11660_v60, 4  ;;  %v8709_v63 = vld [vmem:[#allocation8 + $0xbc0] sm:$0xf]  ;;  %v10830_v52 = vld [vmem:[#allocation8 + $0xa6c] sm:$0xf0] }
  0x92   :  { %5504 = vmatpush.bf16.msrb.mxu2 %v7926_v3  ;;  %v7846_v3 = vor.u32 %v10658_v58, %v7845_v57  ;;  %v8726_v58 = vor.u32 %v10878_v48, %v8725_v43  ;;  %v10762_v43 = vld [vmem:[#allocation8 + $0x84c] sm:$0xf0]  ;;  %v8533_v48 = vld [vmem:[#allocation8 + $0xa60] sm:$0xf] }
  0x93   :  { %5517 = vmatpush.bf16.msrb.mxu3 %v8054_v12  ;;  %v8661_v53 = vld [vmem:[#allocation8 + $0xb60] sm:$0xf] }
  0x94   :  { %5483 = vmatpush.bf16.msrb.mxu0 %v7590_v20  ;;  %v10726_v20 = vld [vmem:[#allocation8 + $0x72c] sm:$0xf0] }
  0x95   :  { %5492 = vmatpush.bf16.msrb.mxu1 %v7782_v14  ;;  %v8341_v14 = vld [vmem:[#allocation8 + $0x8e0] sm:$0xf]  ;;  %v8118_v28 = vor.u32 %v10726_v20, %v8117_v19  ;;  %v10870_v20 = vld [vmem:[#allocation8 + $0xbac] sm:$0xf0] }
  0x96   :  { %5505 = vmatpush.bf16.msrb.mxu2 %v7910_v17  ;;  %v8693_v19 = vld [vmem:[#allocation8 + $0xba0] sm:$0xf] }
  0x97   :  { %5518 = vmatpush.bf16.msrb.mxu3 %v8038_v25  ;;  %v8342_v25 = vor.u32 %v10782_v15, %v8341_v14  ;;  %v8565_v14 = vld [vmem:[#allocation8 + $0xaa0] sm:$0xf]  ;;  %v10838_v15 = vld [vmem:[#allocation8 + $0xaac] sm:$0xf0]  ;;  %v8694_v31 = vor.u32 %v10870_v20, %v8693_v19 }
  0x98   :  { %5528 = vmatpush.bf16.msra.mxu0 %v8214_v23  ;;  %v166_v23 = vperm.slane %v11660_v60, 2  ;;  %v8357_v19 = vld [vmem:[#allocation8 + $0x900] sm:$0xf]  ;;  %v10786_v20 = vld [vmem:[#allocation8 + $0x90c] sm:$0xf0] }
  0x99   :  { %5493 = vmatpush.bf16.msrb.mxu1 %v7766_v27  ;;  %v8470_v27 = vor.u32 %v10814_v18, %v8469_v16 }
  0x9a   :  { %5506 = vmatpush.bf16.msrb.mxu2 %v7894_v30  ;;  %v10778_v30 = vld [vmem:[#allocation8 + $0x8cc] sm:$0xf0] }
  0x9b   :  { %5519 = vmatpush.bf16.msrb.mxu3 %v8022_v37  ;;  %v8326_v40 = vor.u32 %v10778_v30, %v8325_v29  ;;  %v8549_v29 = vld [vmem:[#allocation8 + $0xa80] sm:$0xf] }
  0x9c   :  { %5529 = vmatpush.bf16.msra.mxu0 %v8198_v35  ;;  %v10722_v35 = vld [vmem:[#allocation8 + $0x70c] sm:$0xf0] }
  0x9d   :  { %5494 = vmatpush.bf16.msrb.mxu1 %v7750_v39 }
  0x9e   :  { %5507 = vmatpush.bf16.msrb.mxu2 %v7878_v42  ;;  %v10846_v42 = vld [vmem:[#allocation8 + $0xaec] sm:$0xf0] }
  0x9f   :  { %5520 = vmatpush.bf16.msrb.mxu3 %v8006_v49  ;;  %v8309_v49 = vld [vmem:[#allocation8 + $0x8a0] sm:$0xf]  ;;  %v8598_v55 = vor.u32 %v10846_v42, %v8597_v41  ;;  %v171_v41 = vperm.slane %v11660_v60, 7 }
  0xa0   :  { %5530 = vmatpush.bf16.msra.mxu0 %v8182_v47  ;;  %v8102_v47 = vor.u32 %v10722_v35, %v8101_v34  ;;  %v10834_v34 = vld [vmem:[#allocation8 + $0xa8c] sm:$0xf0]  ;;  %v8677_v35 = vld [vmem:[#allocation8 + $0xb80] sm:$0xf] }
  0xa1   :  { %5495 = vmatpush.bf16.msrb.mxu1 %v7734_v51 }
  0xa2   :  { %5508 = vmatpush.bf16.msrb.mxu2 %v7862_v54 }
  0xa3   :  { %5521 = vmatpush.bf16.msrb.mxu3 %v7990_v62  ;;  %v10842_v62 = vld [vmem:[#allocation8 + $0xacc] sm:$0xf0] }
  0xa4   :  { %5531 = vmatpush.bf16.msra.mxu0 %v8166_v59  ;;  %v353_v9 = vpop.f32.mrf.mxu0  ;;  %v8310_v59 = vor.u32 %v10774_v50, %v8309_v49  ;;  %v8582_v8 = vor.u32 %v10842_v62, %v8581_v61  ;;  %v8245_v61 = vld [vmem:[#allocation8 + $0x820] sm:$0xf]  ;;  %v10758_v62 = vld [vmem:[#allocation8 + $0x82c] sm:$0xf0] }
  0xa5   :  { %5496 = vmatpush.bf16.msrb.mxu1 %v7718_v0  ;;  %v354_v10 = vadd.f32 %v353_v9, %v164_v4  ;;  %v366_v12 = vpop.f32.mrf.mxu1  ;;  %v10770_v4 = vld [vmem:[#allocation8 + $0x88c] sm:$0xf0] }
  0xa6   :  { %5509 = vmatpush.bf16.msrb.mxu2 %v7846_v3  ;;  %v367_v17 = vadd.f32 %v366_v12, %v165_v6  ;;  %v8293_v3 = vld [vmem:[#allocation8 + $0x880] sm:$0xf]  ;;  %v10802_v6 = vld [vmem:[#allocation8 + $0x98c] sm:$0xf0]  ;;  %v8710_v12 = vor.u32 %v10874_v2, %v8709_v63 }
  0xa7   :  { %5522 = vmatpush.bf16.msrb.mxu3 %v7974_v5  ;;  %v669_v21 = vmax.f32 %v354_v10, 0.0  ;;  %v8421_v5 = vld [vmem:[#allocation8 + $0x980] sm:$0xf]  ;;  %v11688_v63 = vld [vmem:[#allocation7 + $0x8] sm:$0xff] }
  0xa8   :  { %5532 = vmatpush.bf16.msra.mxu0 %v8150_v11  ;;  %v670_v22 = vmax.f32 %v367_v17, 0.0  ;;  %v169_v11 = vperm.slane %v11660_v60, 5  ;;  %v8422_v18 = vor.u32 %v10802_v6, %v8421_v5  ;;  %v10862_v60 = vld [vmem:[#allocation8 + $0xb6c] sm:$0xf0]  ;;  %v8373_v2 = vld [vmem:[#allocation8 + $0x920] sm:$0xf] }
  0xa9   :  { %v11666_v26 = vpack.c.bf16 %v669_v21, %v669_v21  ;;  %v8277_v21 = vld [vmem:[#allocation8 + $0x860] sm:$0xf] }
  0xaa   :  { %v11668_v32 = vpack.c.bf16 %v670_v22, %v670_v22  ;;  %v8517_v5 = vld [vmem:[#allocation8 + $0xa40] sm:$0xf] }
  0xab   :  { %v379_v36 = vpop.f32.mrf.mxu2  ;;  %5445 = vmatmul.bf16.vlgmr.msra.gmra.mxu1 %v11666_v26 }
  0xac   :  { %5533 = vmatpush.bf16.msra.mxu0 %v8134_v13  ;;  %v380_v37 = vadd.f32 %v379_v36, %v166_v23  ;;  %v392_v38 = vpop.f32.mrf.mxu3  ;;  %5458 = vmatmul.bf16.vlgmr.msra.gmra.mxu2 %v11668_v32  ;;  %v355_v39 = vpop.f32.mrf.mxu0  ;;  %v8294_v13 = vor.u32 %v10770_v4, %v8293_v3  ;;  %v10766_v23 = vld [vmem:[#allocation8 + $0x86c] sm:$0xf0]  ;;  %v8534_v4 = vor.u32 %v10830_v52, %v8533_v48 }
  0xad   :  { %5541 = vmatpush.bf16.msra.mxu1 %v8342_v25  ;;  %v393_v44 = vadd.f32 %v392_v38, %v167_v24  ;;  %5554 = vmatpush.bf16.msra.mxu2 %v8470_v27  ;;  %v368_v45 = vpop.f32.mrf.mxu1  ;;  %v8405_v24 = vld [vmem:[#allocation8 + $0x960] sm:$0xf]  ;;  %v10798_v25 = vld [vmem:[#allocation8 + $0x96c] sm:$0xf0] }
  0xae   :  { %v671_v51 = vmax.f32 %v380_v37, 0.0  ;;  %v8278_v37 = vor.u32 %v10766_v23, %v8277_v21  ;;  %v8406_v38 = vor.u32 %v10798_v25, %v8405_v24  ;;  %v10866_v39 = vld [vmem:[#allocation8 + $0xb8c] sm:$0xf0]  ;;  %v8853_v21 = vld [vmem:[#allocation8 + $0xce0] sm:$0xf] }
  0xaf   :  { %v672_v54 = vmax.f32 %v393_v44, 0.0  ;;  %v8389_v44 = vld [vmem:[#allocation8 + $0x940] sm:$0xf]  ;;  %v10794_v45 = vld [vmem:[#allocation8 + $0x94c] sm:$0xf0] }
  0xb0   :  { %5534 = vmatpush.bf16.msra.mxu0 %v8118_v28  ;;  %v11673_v57 = vpack.c.bf16 %v671_v51, %v671_v51  ;;  %v8566_v28 = vor.u32 %v10838_v15, %v8565_v14  ;;  %v8678_v51 = vor.u32 %v10866_v39, %v8677_v35  ;;  %v10790_v3 = vld [vmem:[#allocation8 + $0x92c] sm:$0xf0]  ;;  %v8246_v14 = vor.u32 %v10758_v62, %v8245_v61  ;;  %v8981_v25 = vld [vmem:[#allocation8 + $0xde0] sm:$0xf] }
  0xb1   :  { %5542 = vmatpush.bf16.msra.mxu1 %v8326_v40  ;;  %v11675_v0 = vpack.c.bf16 %v672_v54, %v672_v54  ;;  %5555 = vmatpush.bf16.msra.mxu2 %v8454_v46  ;;  %v8261_v40 = vld [vmem:[#allocation8 + $0x840] sm:$0xf]  ;;  %v8374_v15 = vor.u32 %v10790_v3, %v8373_v2  ;;  %v10910_v24 = vld [vmem:[#allocation8 + $0xcec] sm:$0xf0]  ;;  %v175_v62 = vperm.slane %v11688_v63, 3 }
  0xb2   :  { %5471 = vmatmul.bf16.vlgmr.msra.gmra.mxu3 %v11673_v57  ;;  %v8629_v39 = vld [vmem:[#allocation8 + $0xb20] sm:$0xf]  ;;  %v10938_v48 = vld [vmem:[#allocation8 + $0xdcc] sm:$0xf0] }
  0xb3   :  { %5484 = vmatmul.bf16.vlgmr.msrb.gmra.mxu0 %v11675_v0  ;;  %5567 = vmatpush.bf16.msra.mxu3 %v8598_v55  ;;  %v381_v7 = vpop.f32.mrf.mxu2  ;;  %v10818_v52 = vld [vmem:[#allocation8 + $0xa0c] sm:$0xf0] }
  0xb4   :  { %5535 = vmatpush.bf16.msra.mxu0 %v8102_v47  ;;  %v394_v9 = vpop.f32.mrf.mxu3  ;;  %v405_v10 = vpop.f32.mrf.mxu0  ;;  %v8550_v47 = vor.u32 %v10834_v34, %v8549_v29  ;;  %v8662_v7 = vor.u32 %v10862_v60, %v8661_v53  ;;  %v10974_v61 = vld [vmem:[#allocation8 + $0xeec] sm:$0xf0] }
  0xb5   :  { %5543 = vmatpush.bf16.msra.mxu1 %v8310_v59  ;;  %5556 = vmatpush.bf16.msra.mxu2 %v8438_v1  ;;  %v406_v16 = vadd.f32 %v405_v10, %v168_v56  ;;  %v418_v17 = vpop.f32.mrf.mxu1  ;;  %v8262_v56 = vor.u32 %v10762_v43, %v8261_v40  ;;  %v173_v9 = vperm.slane %v11688_v63, 1  ;;  %v10826_v10 = vld [vmem:[#allocation8 + $0xa4c] sm:$0xf0] }
  0xb6   :  { %v419_v22 = vadd.f32 %v418_v17, %v169_v11  ;;  %v8229_v17 = vld [vmem:[#allocation8 + $0x800] sm:$0xf]  ;;  %v8518_v23 = vor.u32 %v10826_v10, %v8517_v5  ;;  %v10854_v40 = vld [vmem:[#allocation8 + $0xb2c] sm:$0xf0] }
  0xb7   :  { %v673_v27 = vmax.f32 %v406_v16, 0.0  ;;  %5568 = vmatpush.bf16.msra.mxu3 %v8582_v8  ;;  %v172_v8 = vperm.slane %v11688_v63, 0  ;;  %v10858_v16 = vld [vmem:[#allocation8 + $0xb4c] sm:$0xf0]  ;;  %v8630_v60 = vor.u32 %v10854_v40, %v8629_v39  ;;  %v8821_v5 = vld [vmem:[#allocation8 + $0xca0] sm:$0xf] }
  0xb8   :  { %5580 = vmatpush.bf16.msrb.mxu0 %v8726_v58  ;;  %v674_v30 = vmax.f32 %v419_v22, 0.0  ;;  %v8390_v58 = vor.u32 %v10794_v45, %v8389_v44  ;;  %v8854_v44 = vor.u32 %v10910_v24, %v8853_v21  ;;  %v8949_v10 = vld [vmem:[#allocation8 + $0xda0] sm:$0xf]  ;;  %v11002_v24 = vld [vmem:[#allocation8 + $0xfcc] sm:$0xf0] }
  0xb9   :  { %5544 = vmatpush.bf16.msra.mxu1 %v8294_v13  ;;  %v11681_v36 = vpack.c.bf16 %v673_v27, %v673_v27  ;;  %5557 = vmatpush.bf16.msra.mxu2 %v8422_v18  ;;  %v10754_v18 = vld [vmem:[#allocation8 + $0x80c] sm:$0xf0] }
  0xba   :  { %v11684_v42 = vpack.c.bf16 %v674_v30, %v674_v30  ;;  %v10942_v27 = vld [vmem:[#allocation8 + $0xdec] sm:$0xf0]  ;;  %v8501_v30 = vld [vmem:[#allocation8 + $0xa20] sm:$0xf] }
  0xbb   :  { %5569 = vmatpush.bf16.msra.mxu3 %v8566_v28  ;;  %v431_v46 = vpop.f32.mrf.mxu2  ;;  %5497 = vmatmul.bf16.vlgmr.msrb.gmra.mxu1 %v11681_v36  ;;  %v8982_v45 = vor.u32 %v10942_v27, %v8981_v25 }
  0xbc   :  { %5581 = vmatpush.bf16.msrb.mxu0 %v8710_v12  ;;  %v432_v49 = vadd.f32 %v431_v46, %v170_v33  ;;  %5510 = vmatmul.bf16.vlgmr.msrb.gmra.mxu2 %v11684_v42  ;;  %v407_v50 = vpop.f32.mrf.mxu0  ;;  %v444_v54 = vpop.f32.mrf.mxu3  ;;  %v8645_v12 = vld [vmem:[#allocation8 + $0xb40] sm:$0xf]  ;;  %v10906_v46 = vld [vmem:[#allocation8 + $0xccc] sm:$0xf0] }
  0xbd   :  { %5545 = vmatpush.bf16.msra.mxu1 %v8278_v37  ;;  %5558 = vmatpush.bf16.msra.mxu2 %v8406_v38  ;;  %v420_v55 = vpop.f32.mrf.mxu1  ;;  %v445_v59 = vadd.f32 %v444_v54, %v171_v41  ;;  %v8646_v29 = vor.u32 %v10858_v16, %v8645_v12  ;;  %v8230_v37 = vor.u32 %v10754_v18, %v8229_v17  ;;  %v8837_v41 = vld [vmem:[#allocation8 + $0xcc0] sm:$0xf]  ;;  %v174_v54 = vperm.slane %v11688_v63, 2  ;;  %v10934_v12 = vld [vmem:[#allocation8 + $0xdac] sm:$0xf0] }
  0xbe   :  { %v675_v1 = vmax.f32 %v432_v49, 0.0  ;;  %v8358_v38 = vor.u32 %v10786_v20, %v8357_v19  ;;  %v8613_v55 = vld [vmem:[#allocation8 + $0xb00] sm:$0xf]  ;;  %v8838_v2 = vor.u32 %v10906_v46, %v8837_v41 }
  0xbf   :  { %5570 = vmatpush.bf16.msra.mxu3 %v8550_v47  ;;  %v676_v11 = vmax.f32 %v445_v59, 0.0  ;;  %v8965_v47 = vld [vmem:[#allocation8 + $0xdc0] sm:$0xf] }
  0xc0   :  { %5582 = vmatpush.bf16.msrb.mxu0 %v8694_v31  ;;  %v11690_v6 = vpack.c.bf16 %v675_v1, %v675_v1  ;;  %v10822_v31 = vld [vmem:[#allocation8 + $0xa2c] sm:$0xf0]  ;;  %v9109_v59 = vld [vmem:[#allocation8 + $0xee0] sm:$0xf]  ;;  %v8966_v3 = vor.u32 %v10938_v48, %v8965_v47 }
  0xc1   :  { %5546 = vmatpush.bf16.msra.mxu1 %v8262_v56  ;;  %5559 = vmatpush.bf16.msra.mxu2 %v8390_v58  ;;  %v11694_v13 = vpack.c.bf16 %v676_v11, %v676_v11  ;;  %v8502_v50 = vor.u32 %v10822_v31, %v8501_v30  ;;  %v10850_v56 = vld [vmem:[#allocation8 + $0xb0c] sm:$0xf0]  ;;  %v9110_v17 = vor.u32 %v10974_v61, %v9109_v59  ;;  %v9093_v19 = vld [vmem:[#allocation8 + $0xec0] sm:$0xf] }
  0xc2   :  { %5523 = vmatmul.bf16.vlgmr.msrb.gmra.mxu3 %v11690_v6  ;;  %v11006_v11 = vld [vmem:[#allocation8 + $0xfec] sm:$0xf0]  ;;  %v8614_v16 = vor.u32 %v10850_v56, %v8613_v55  ;;  %v8805_v30 = vld [vmem:[#allocation8 + $0xc80] sm:$0xf] }
  0xc3   :  { %5571 = vmatpush.bf16.msra.mxu3 %v8534_v4  ;;  %v433_v22 = vpop.f32.mrf.mxu2  ;;  %5536 = vmatmul.bf16.vlgmr.msra.gmra.mxu0 %v11694_v13  ;;  %v9237_v4 = vld [vmem:[#allocation8 + $0xfe0] sm:$0xf]  ;;  %v10898_v31 = vld [vmem:[#allocation8 + $0xc8c] sm:$0xf0] }
  0xc4   :  { %5583 = vmatpush.bf16.msrb.mxu0 %v8678_v51  ;;  %v457_v28 = vpop.f32.mrf.mxu0  ;;  %v446_v33 = vpop.f32.mrf.mxu3  ;;  %v8485_v51 = vld [vmem:[#allocation8 + $0xa00] sm:$0xf]  ;;  %v9238_v20 = vor.u32 %v11006_v11, %v9237_v4  ;;  %v10970_v22 = vld [vmem:[#allocation8 + $0xecc] sm:$0xf0] }
  0xc5   :  { %5547 = vmatpush.bf16.msra.mxu1 %v8246_v14  ;;  %5560 = vmatpush.bf16.msra.mxu2 %v8374_v15  ;;  %v458_v34 = vadd.f32 %v457_v28, %v172_v8  ;;  %v470_v35 = vpop.f32.mrf.mxu1  ;;  %v8486_v8 = vor.u32 %v10818_v52, %v8485_v51  ;;  %v9077_v41 = vld [vmem:[#allocation8 + $0xea0] sm:$0xf]  ;;  %v10998_v47 = vld [vmem:[#allocation8 + $0xfac] sm:$0xf0] }
  0xc6   :  { %v471_v43 = vadd.f32 %v470_v35, %v173_v9  ;;  %v10902_v9 = vld [vmem:[#allocation8 + $0xcac] sm:$0xf0]  ;;  %v9205_v46 = vld [vmem:[#allocation8 + $0xfa0] sm:$0xf] }
  0xc7   :  { %v677_v49 = vmax.f32 %v458_v34, 0.0  ;;  %5572 = vmatpush.bf16.msra.mxu3 %v8518_v23  ;;  %v9221_v23 = vld [vmem:[#allocation8 + $0xfc0] sm:$0xf]  ;;  %v8822_v28 = vor.u32 %v10902_v9, %v8821_v5  ;;  %v10930_v35 = vld [vmem:[#allocation8 + $0xd8c] sm:$0xf0]  ;;  %v9206_v55 = vor.u32 %v10998_v47, %v9205_v46 }
  0xc8   :  { %5584 = vmatpush.bf16.msrb.mxu0 %v8662_v7  ;;  %v678_v53 = vmax.f32 %v471_v43, 0.0  ;;  %v8933_v34 = vld [vmem:[#allocation8 + $0xd80] sm:$0xf]  ;;  %v9222_v40 = vor.u32 %v11002_v24, %v9221_v23  ;;  %v10966_v43 = vld [vmem:[#allocation8 + $0xeac] sm:$0xf0] }
  0xc9   :  { %v11699_v58 = vpack.c.bf16 %v677_v49, %v677_v49  ;;  %5548 = vmatpush.bf16.msra.mxu1 %v8230_v37  ;;  %5561 = vmatpush.bf16.msra.mxu2 %v8358_v38  ;;  %v9094_v38 = vor.u32 %v10970_v22, %v9093_v19  ;;  %v8789_v48 = vld [vmem:[#allocation8 + $0xc60] sm:$0xf]  ;;  %v10926_v52 = vld [vmem:[#allocation8 + $0xd6c] sm:$0xf0] }
  0xca   :  { %v11702_v1 = vpack.c.bf16 %v678_v53, %v678_v53  ;;  %v8917_v51 = vld [vmem:[#allocation8 + $0xd60] sm:$0xf]  ;;  %v10962_v59 = vld [vmem:[#allocation8 + $0xe8c] sm:$0xf0] }
  0xcb   :  { %5573 = vmatpush.bf16.msra.mxu3 %v8502_v50  ;;  %v483_v7 = vpop.f32.mrf.mxu2  ;;  %v10894_v50 = vld [vmem:[#allocation8 + $0xc6c] sm:$0xf0]  ;;  %v9061_v56 = vld [vmem:[#allocation8 + $0xe80] sm:$0xf] }
  0xcc   :  { %5585 = vmatpush.bf16.msrb.mxu0 %v8646_v29  ;;  %v484_v14 = vadd.f32 %v483_v7, %v174_v54  ;;  %5549 = vmatmul.bf16.vlgmr.msra.gmra.mxu1 %v11699_v58  ;;  %v459_v15 = vpop.f32.mrf.mxu0  ;;  %v496_v18 = vpop.f32.mrf.mxu3  ;;  %v8950_v29 = vor.u32 %v10934_v12, %v8949_v10  ;;  %v10994_v4 = vld [vmem:[#allocation8 + $0xf8c] sm:$0xf0]  ;;  %v8773_v11 = vld [vmem:[#allocation8 + $0xc40] sm:$0xf]  ;;  %v9062_v9 = vor.u32 %v10962_v59, %v9061_v56  ;;  %v176_v10 = vperm.slane %v11688_v63, 4 }
  0xcd   :  { %5593 = vmatpush.bf16.msrb.mxu1 %v8854_v44  ;;  %5606 = vmatpush.bf16.msrb.mxu2 %v8982_v45  ;;  %v497_v21 = vadd.f32 %v496_v18, %v175_v62  ;;  %v472_v25 = vpop.f32.mrf.mxu1  ;;  %v8806_v44 = vor.u32 %v10898_v31, %v8805_v30  ;;  %v8934_v45 = vor.u32 %v10930_v35, %v8933_v34  ;;  %v10890_v5 = vld [vmem:[#allocation8 + $0xc4c] sm:$0xf0]  ;;  %v8901_v7 = vld [vmem:[#allocation8 + $0xd40] sm:$0xf]  ;;  %v179_v30 = vperm.slane %v11688_v63, 7 }
  0xce   :  { %5562 = vmatmul.bf16.vlgmr.msra.gmra.mxu2 %v11702_v1  ;;  %v679_v27 = vmax.f32 %v484_v14, 0.0  ;;  %v8790_v62 = vor.u32 %v10894_v50, %v8789_v48  ;;  %v177_v14 = vperm.slane %v11688_v63, 5  ;;  %v9045_v15 = vld [vmem:[#allocation8 + $0xe60] sm:$0xf]  ;;  %v10886_v23 = vld [vmem:[#allocation8 + $0xc2c] sm:$0xf0] }
  0xcf   :  { %5574 = vmatpush.bf16.msra.mxu3 %v8486_v8  ;;  %v680_v33 = vmax.f32 %v497_v21, 0.0  ;;  %v10922_v8 = vld [vmem:[#allocation8 + $0xd4c] sm:$0xf0]  ;;  %v9173_v19 = vld [vmem:[#allocation8 + $0xf60] sm:$0xf] }
  0xd0   :  { %5586 = vmatpush.bf16.msrb.mxu0 %v8630_v60  ;;  %v11706_v37 = vpack.c.bf16 %v679_v27, %v679_v27  ;;  %v9078_v60 = vor.u32 %v10966_v43, %v9077_v41  ;;  %v8902_v18 = vor.u32 %v10922_v8, %v8901_v7  ;;  %v8757_v21 = vld [vmem:[#allocation8 + $0xc20] sm:$0xf]  ;;  %v10918_v25 = vld [vmem:[#allocation8 + $0xd2c] sm:$0xf0] }
  0xd1   :  { %5594 = vmatpush.bf16.msrb.mxu1 %v8838_v2  ;;  %5607 = vmatpush.bf16.msrb.mxu2 %v8966_v3  ;;  %v11708_v39 = vpack.c.bf16 %v680_v33, %v680_v33  ;;  %v8918_v2 = vor.u32 %v10926_v52, %v8917_v51  ;;  %v9189_v3 = vld [vmem:[#allocation8 + $0xf80] sm:$0xf]  ;;  %v10954_v35 = vld [vmem:[#allocation8 + $0xe4c] sm:$0xf0]  ;;  %v8758_v43 = vor.u32 %v10886_v23, %v8757_v21 }
  0xd2   :  { %5575 = vmatmul.bf16.vlgmr.msra.gmra.mxu3 %v11706_v37  ;;  %v9190_v12 = vor.u32 %v10994_v4, %v9189_v3  ;;  %v8885_v24 = vld [vmem:[#allocation8 + $0xd20] sm:$0xf]  ;;  %v10882_v47 = vld [vmem:[#allocation8 + $0xc0c] sm:$0xf0] }
  0xd3   :  { %5619 = vmatpush.bf16.msrb.mxu3 %v9110_v17  ;;  %v485_v49 = vpop.f32.mrf.mxu2  ;;  %v8774_v17 = vor.u32 %v10890_v5, %v8773_v11  ;;  %v9029_v34 = vld [vmem:[#allocation8 + $0xe40] sm:$0xf]  ;;  %v10914_v50 = vld [vmem:[#allocation8 + $0xd0c] sm:$0xf0] }
  0xd4   :  { %5587 = vmatpush.bf16.msrb.mxu0 %v8614_v16  ;;  %v509_v53 = vpop.f32.mrf.mxu0  ;;  %v498_v54 = vpop.f32.mrf.mxu3  ;;  %v10958_v16 = vld [vmem:[#allocation8 + $0xe6c] sm:$0xf0]  ;;  %v8741_v46 = vld [vmem:[#allocation8 + $0xc00] sm:$0xf] }
  0xd5   :  { %5595 = vmatpush.bf16.msrb.mxu1 %v8822_v28  ;;  %5608 = vmatpush.bf16.msrb.mxu2 %v8950_v29  ;;  %v522_v61 = vpop.f32.mrf.mxu1  ;;  %v9046_v28 = vor.u32 %v10958_v16, %v9045_v15  ;;  %v178_v29 = vperm.slane %v11688_v63, 6  ;;  %v510_v48 = vadd.f32 %v509_v53, %v176_v10  ;;  %v8869_v49 = vld [vmem:[#allocation8 + $0xd00] sm:$0xf]  ;;  %v9030_v63 = vor.u32 %v10954_v35, %v9029_v34  ;;  %v11038_v52 = vld [vmem:[#allocation8 + $0x10ec] sm:$0xf0] }
  0xd6   :  { %v523_v41 = vadd.f32 %v522_v61, %v177_v14  ;;  %v9365_v51 = vld [vmem:[#allocation8 + $0x10e0] sm:$0xf]  ;;  %v11070_v54 = vld [vmem:[#allocation8 + $0x11ec] sm:$0xf0]  ;;  %v8742_v61 = vor.u32 %v10882_v47, %v8741_v46 }
  0xd7   :  { %5588 = vmatmul.bf16.vlgmr.msrb.gmra.mxu0 %v11708_v39  ;;  %5620 = vmatpush.bf16.msrb.mxu3 %v9094_v38  ;;  %v9157_v38 = vld [vmem:[#allocation8 + $0xf40] sm:$0xf]  ;;  %v10950_v59 = vld [vmem:[#allocation8 + $0xe2c] sm:$0xf0]  ;;  %v681_v53 = vmax.f32 %v510_v48, 0.0  ;;  %v9366_v5 = vor.u32 %v11038_v52, %v9365_v51 }
  0xd8   :  { %5632 = vmatpush.bf16.msra.mxu0 %v9238_v20  ;;  %v10990_v20 = vld [vmem:[#allocation8 + $0xf6c] sm:$0xf0]  ;;  %v9013_v56 = vld [vmem:[#allocation8 + $0xe20] sm:$0xf] }
  0xd9   :  { %5596 = vmatpush.bf16.msrb.mxu1 %v8806_v44  ;;  %5609 = vmatpush.bf16.msrb.mxu2 %v8934_v45  ;;  %v9174_v33 = vor.u32 %v10990_v20, %v9173_v19  ;;  %v8886_v44 = vor.u32 %v10918_v25, %v8885_v24  ;;  %v10986_v45 = vld [vmem:[#allocation8 + $0xf4c] sm:$0xf0]  ;;  %v9141_v3 = vld [vmem:[#allocation8 + $0xf20] sm:$0xf]  ;;  %v9014_v14 = vor.u32 %v10950_v59, %v9013_v56 }
  0xda   :  { %v10982_v4 = vld [vmem:[#allocation8 + $0xf2c] sm:$0xf0]  ;;  %v9477_v16 = vld [vmem:[#allocation8 + $0x11c0] sm:$0xf] }
  0xdb   :  { %5621 = vmatpush.bf16.msrb.mxu3 %v9078_v60  ;;  %v535_v22 = vpop.f32.mrf.mxu2  ;;  %v9493_v60 = vld [vmem:[#allocation8 + $0x11e0] sm:$0xf]  ;;  %v11034_v15 = vld [vmem:[#allocation8 + $0x10cc] sm:$0xf0]  ;;  %v9142_v19 = vor.u32 %v10982_v4, %v9141_v3 }
  0xdc   :  { %5633 = vmatpush.bf16.msra.mxu0 %v9222_v40  ;;  %v511_v27 = vpop.f32.mrf.mxu0  ;;  %v548_v31 = vpop.f32.mrf.mxu3  ;;  %v536_v11 = vadd.f32 %v535_v22, %v178_v29  ;;  %v9494_v7 = vor.u32 %v11070_v54, %v9493_v60  ;;  %v8997_v20 = vld [vmem:[#allocation8 + $0xe00] sm:$0xf]  ;;  %v10946_v21 = vld [vmem:[#allocation8 + $0xe0c] sm:$0xf0]  ;;  %v11722_v29 = vpack.c.bf16 %v681_v53, %v681_v53 }
  0xdd   :  { %5597 = vmatpush.bf16.msrb.mxu1 %v8790_v62  ;;  %5610 = vmatpush.bf16.msrb.mxu2 %v8918_v2  ;;  %v524_v40 = vpop.f32.mrf.mxu1  ;;  %v682_v62 = vmax.f32 %v523_v41, 0.0  ;;  %v8870_v2 = vor.u32 %v10914_v50, %v8869_v49  ;;  %v549_v10 = vadd.f32 %v548_v31, %v179_v30  ;;  %v9125_v23 = vld [vmem:[#allocation8 + $0xf00] sm:$0xf]  ;;  %v10978_v25 = vld [vmem:[#allocation8 + $0xf0c] sm:$0xf0] }
  0xde   :  { %v9621_v27 = vld [vmem:[#allocation8 + $0x12e0] sm:$0xf]  ;;  %v683_v30 = vmax.f32 %v536_v11, 0.0  ;;  %v11134_v35 = vld [vmem:[#allocation8 + $0x13ec] sm:$0xf0]  ;;  %v8998_v40 = vor.u32 %v10946_v21, %v8997_v20 }
  0xdf   :  { %5622 = vmatpush.bf16.msrb.mxu3 %v9062_v9  ;;  %v9349_v9 = vld [vmem:[#allocation8 + $0x10c0] sm:$0xf]  ;;  %v11720_v22 = vpack.c.bf16 %v682_v62, %v682_v62  ;;  %v11062_v47 = vld [vmem:[#allocation8 + $0x11ac] sm:$0xf0] }
  0xe0   :  { %5634 = vmatpush.bf16.msra.mxu0 %v9206_v55  ;;  %v9158_v55 = vor.u32 %v10986_v45, %v9157_v38  ;;  %v9350_v31 = vor.u32 %v11034_v15, %v9349_v9  ;;  %v9749_v34 = vld [vmem:[#allocation8 + $0x13e0] sm:$0xf]  ;;  %v684_v38 = vmax.f32 %v549_v10, 0.0  ;;  %v11098_v50 = vld [vmem:[#allocation8 + $0x12cc] sm:$0xf0]  ;;  %v11726_v51 = vpack.c.bf16 %v683_v30, %v683_v30 }
  0xe1   :  { %5598 = vmatpush.bf16.msrb.mxu1 %v8774_v17  ;;  %5611 = vmatpush.bf16.msrb.mxu2 %v8902_v18  ;;  %v11066_v17 = vld [vmem:[#allocation8 + $0x11cc] sm:$0xf0]  ;;  %v9333_v41 = vld [vmem:[#allocation8 + $0x10a0] sm:$0xf]  ;;  %v9750_v48 = vor.u32 %v11134_v35, %v9749_v34 }
  0xe2   :  { %v9461_v46 = vld [vmem:[#allocation8 + $0x11a0] sm:$0xf]  ;;  %v11130_v60 = vld [vmem:[#allocation8 + $0x13cc] sm:$0xf0] }
  0xe3   :  { %5623 = vmatpush.bf16.msrb.mxu3 %v9046_v28  ;;  %v537_v8 = vpop.f32.mrf.mxu2  ;;  %v11102_v28 = vld [vmem:[#allocation8 + $0x12ec] sm:$0xf0]  ;;  %v9605_v49 = vld [vmem:[#allocation8 + $0x12c0] sm:$0xf]  ;;  %v9462_v59 = vor.u32 %v11062_v47, %v9461_v46 }
  0xe4   :  { %5635 = vmatpush.bf16.msra.mxu0 %v9190_v12  ;;  %v11716_v12 = vpop.f32.mrf.mxu0  ;;  %v550_v18 = vpop.f32.mrf.mxu3  ;;  %v9622_v45 = vor.u32 %v11102_v28, %v9621_v27  ;;  %v9733_v52 = vld [vmem:[#allocation8 + $0x13c0] sm:$0xf]  ;;  %v9606_v3 = vor.u32 %v11098_v50, %v9605_v49  ;;  %v11058_v53 = vld [vmem:[#allocation8 + $0x118c] sm:$0xf0] }
  0xe5   :  { %5599 = vmatpush.bf16.msrb.mxu1 %v8758_v43  ;;  %5612 = vmatpush.bf16.msrb.mxu2 %v8886_v44  ;;  %v11718_v24 = vpop.f32.mrf.mxu1  ;;  %v11030_v43 = vld [vmem:[#allocation8 + $0x10ac] sm:$0xf0]  ;;  %v9126_v44 = vor.u32 %v10978_v25, %v9125_v23  ;;  %v9317_v62 = vld [vmem:[#allocation8 + $0x1080] sm:$0xf] }
  0xe6   :  { %v9445_v4 = vld [vmem:[#allocation8 + $0x1180] sm:$0xf]  ;;  %v11094_v8 = vld [vmem:[#allocation8 + $0x12ac] sm:$0xf0] }
  0xe7   :  { %5624 = vmatpush.bf16.msrb.mxu3 %v9030_v63  ;;  %v9334_v63 = vor.u32 %v11030_v43, %v9333_v41  ;;  %v9717_v10 = vld [vmem:[#allocation8 + $0x13a0] sm:$0xf]  ;;  %v9446_v15 = vor.u32 %v11058_v53, %v9445_v4  ;;  %v11054_v20 = vld [vmem:[#allocation8 + $0x116c] sm:$0xf0]  ;;  %v11738_v41 = vld [vmem:[#allocation7 + $0x10] sm:$0xff] }
  0xe8   :  { %5636 = vmatpush.bf16.msra.mxu0 %v9174_v33  ;;  %v9478_v33 = vor.u32 %v11066_v17, %v9477_v16  ;;  %v9301_v16 = vld [vmem:[#allocation8 + $0x1060] sm:$0xf]  ;;  %v11022_v17 = vld [vmem:[#allocation8 + $0x106c] sm:$0xf0] }
  0xe9   :  { %5600 = vmatpush.bf16.msrb.mxu1 %v8742_v61  ;;  %5613 = vmatpush.bf16.msrb.mxu2 %v8870_v2  ;;  %v11026_v61 = vld [vmem:[#allocation8 + $0x108c] sm:$0xf0]  ;;  %v9573_v23 = vld [vmem:[#allocation8 + $0x1280] sm:$0xf]  ;;  %v9302_v27 = vor.u32 %v11022_v17, %v9301_v16 }
  0xea   :  { %v9318_v9 = vor.u32 %v11026_v61, %v9317_v62  ;;  %v11090_v25 = vld [vmem:[#allocation8 + $0x128c] sm:$0xf0]  ;;  %v9701_v28 = vld [vmem:[#allocation8 + $0x1380] sm:$0xf]  ;;  %v181_v61 = vperm.slane %v11738_v41, 1 }
  0xeb   :  { %5625 = vmatpush.bf16.msrb.mxu3 %v9014_v14  ;;  %v11728_v54 = vpop.f32.mrf.mxu2  ;;  %v11126_v14 = vld [vmem:[#allocation8 + $0x13ac] sm:$0xf0]  ;;  %v9285_v35 = vld [vmem:[#allocation8 + $0x1040] sm:$0xf]  ;;  %v9574_v43 = vor.u32 %v11090_v25, %v9573_v23 }
  0xec   :  { %5637 = vmatpush.bf16.msra.mxu0 %v9158_v55  ;;  %5601 = vmatmul.bf16.vlgmr.msrb.gmra.mxu1 %v11722_v29  ;;  %v11730_v55 = vpack.c.bf16 %v684_v38, %v684_v38  ;;  %v563_v56 = vpop.f32.mrf.mxu0  ;;  %v11732_v2 = vpop.f32.mrf.mxu3  ;;  %v9718_v21 = vor.u32 %v11126_v14, %v9717_v10  ;;  %v11122_v30 = vld [vmem:[#allocation8 + $0x138c] sm:$0xf0]  ;;  %v9557_v47 = vld [vmem:[#allocation8 + $0x1260] sm:$0xf] }
  0xed   :  { %5645 = vmatpush.bf16.msra.mxu1 %v9366_v5  ;;  %5658 = vmatpush.bf16.msra.mxu2 %v9494_v7  ;;  %v576_v11 = vpop.f32.mrf.mxu1  ;;  %v9734_v5 = vor.u32 %v11130_v60, %v9733_v52  ;;  %v9589_v7 = vld [vmem:[#allocation8 + $0x12a0] sm:$0xf]  ;;  %v11018_v38 = vld [vmem:[#allocation8 + $0x104c] sm:$0xf0]  ;;  %v9702_v46 = vor.u32 %v11122_v30, %v9701_v28  ;;  %v180_v60 = vperm.slane %v11738_v41, 0 }
  0xee   :  { %5614 = vmatmul.bf16.vlgmr.msrb.gmra.mxu2 %v11720_v22  ;;  %v9590_v18 = vor.u32 %v11094_v8, %v9589_v7  ;;  %v9286_v49 = vor.u32 %v11018_v38, %v9285_v35  ;;  %v9685_v50 = vld [vmem:[#allocation8 + $0x1360] sm:$0xf]  ;;  %v11014_v62 = vld [vmem:[#allocation8 + $0x102c] sm:$0xf0]  ;;  %v182_v11 = vperm.slane %v11738_v41, 2 }
  0xef   :  { %5626 = vmatpush.bf16.msrb.mxu3 %v8998_v40  ;;  %v9397_v4 = vld [vmem:[#allocation8 + $0x1120] sm:$0xf]  ;;  %v11046_v53 = vld [vmem:[#allocation8 + $0x112c] sm:$0xf0]  ;;  %v562_v17 = vadd.f32 %v11716_v12, %v180_v60 }
  0xf0   :  { %5638 = vmatpush.bf16.msra.mxu0 %v9142_v19  ;;  %v9429_v19 = vld [vmem:[#allocation8 + $0x1160] sm:$0xf]  ;;  %v11082_v8 = vld [vmem:[#allocation8 + $0x124c] sm:$0xf0] }
  0xf1   :  { %5646 = vmatpush.bf16.msra.mxu1 %v9350_v31  ;;  %5659 = vmatpush.bf16.msra.mxu2 %v9478_v33  ;;  %v9430_v34 = vor.u32 %v11054_v20, %v9429_v19  ;;  %v9541_v7 = vld [vmem:[#allocation8 + $0x1240] sm:$0xf]  ;;  %v11114_v14 = vld [vmem:[#allocation8 + $0x134c] sm:$0xf0]  ;;  %v9398_v19 = vor.u32 %v11046_v53, %v9397_v4 }
  0xf2   :  { %5627 = vmatmul.bf16.vlgmr.msrb.gmra.mxu3 %v11726_v51  ;;  %v9669_v10 = vld [vmem:[#allocation8 + $0x1340] sm:$0xf]  ;;  %v11010_v20 = vld [vmem:[#allocation8 + $0x100c] sm:$0xf0]  ;;  %v9542_v28 = vor.u32 %v11082_v8, %v9541_v7 }
  0xf3   :  { %5671 = vmatpush.bf16.msra.mxu3 %v9622_v45  ;;  %v589_v31 = vpop.f32.mrf.mxu2  ;;  %v11050_v45 = vld [vmem:[#allocation8 + $0x114c] sm:$0xf0]  ;;  %v9877_v30 = vld [vmem:[#allocation8 + $0x14e0] sm:$0xf]  ;;  %v9670_v35 = vor.u32 %v11114_v14, %v9669_v10 }
  0xf4   :  { %5639 = vmatpush.bf16.msra.mxu0 %v9126_v44  ;;  %v11736_v33 = vpop.f32.mrf.mxu0  ;;  %v602_v40 = vpop.f32.mrf.mxu3  ;;  %v9413_v44 = vld [vmem:[#allocation8 + $0x1140] sm:$0xf]  ;;  %v11042_v23 = vld [vmem:[#allocation8 + $0x110c] sm:$0xf0] }
  0xf5   :  { %5647 = vmatpush.bf16.msra.mxu1 %v9334_v63  ;;  %5660 = vmatpush.bf16.msra.mxu2 %v9462_v59  ;;  %v11118_v63 = vld [vmem:[#allocation8 + $0x136c] sm:$0xf0]  ;;  %v9414_v56 = vor.u32 %v11050_v45, %v9413_v44  ;;  %v9269_v59 = vld [vmem:[#allocation8 + $0x1020] sm:$0xf] }
  0xf6   :  { %v11166_v31 = vld [vmem:[#allocation8 + $0x14ec] sm:$0xf0]  ;;  %v9525_v40 = vld [vmem:[#allocation8 + $0x1220] sm:$0xf] }
  0xf7   :  { %5640 = vmatmul.bf16.vlgmr.msra.gmra.mxu0 %v11730_v55  ;;  %5672 = vmatpush.bf16.msra.mxu3 %v9606_v3  ;;  %v11740_v52 = vpop.f32.mrf.mxu1  ;;  %v11198_v38 = vld [vmem:[#allocation8 + $0x15ec] sm:$0xf0]  ;;  %v9653_v45 = vld [vmem:[#allocation8 + $0x1320] sm:$0xf] }
  0xf8   :  { %5684 = vmatpush.bf16.msrb.mxu0 %v9750_v48  ;;  %v11086_v48 = vld [vmem:[#allocation8 + $0x126c] sm:$0xf0]  ;;  %v9509_v53 = vld [vmem:[#allocation8 + $0x1200] sm:$0xf] }
  0xf9   :  { %5648 = vmatpush.bf16.msra.mxu1 %v9318_v9  ;;  %5661 = vmatpush.bf16.msra.mxu2 %v9446_v15  ;;  %v9558_v3 = vor.u32 %v11086_v48, %v9557_v47  ;;  %v9270_v9 = vor.u32 %v11014_v62, %v9269_v59  ;;  %v9253_v15 = vld [vmem:[#allocation8 + $0x1000] sm:$0xf]  ;;  %v11078_v12 = vld [vmem:[#allocation8 + $0x122c] sm:$0xf0]  ;;  %v685_v48 = vmax.f32 %v562_v17, 0.0 }
  0xfa   :  { %v9254_v44 = vor.u32 %v11010_v20, %v9253_v15  ;;  %v9526_v59 = vor.u32 %v11078_v12, %v9525_v40  ;;  %v9989_v62 = vld [vmem:[#allocation8 + $0x15c0] sm:$0xf]  ;;  %v11230_v14 = vld [vmem:[#allocation8 + $0x16ec] sm:$0xf0] }
  0xfb   :  { %5673 = vmatpush.bf16.msra.mxu3 %v9590_v18  ;;  %v11745_v16 = vpop.f32.mrf.mxu2  ;;  %v9637_v7 = vld [vmem:[#allocation8 + $0x1300] sm:$0xf]  ;;  %v11754_v17 = vpack.c.bf16 %v685_v48, %v685_v48  ;;  %v11262_v20 = vld [vmem:[#allocation8 + $0x17ec] sm:$0xf0] }
  0xfc   :  { %5685 = vmatpush.bf16.msrb.mxu0 %v9734_v5  ;;  %v9686_v5 = vor.u32 %v11118_v63, %v9685_v50  ;;  %v615_v18 = vpop.f32.mrf.mxu0  ;;  %v11748_v25 = vpop.f32.mrf.mxu3  ;;  %v9861_v50 = vld [vmem:[#allocation8 + $0x14c0] sm:$0xf]  ;;  %v11162_v63 = vld [vmem:[#allocation8 + $0x14cc] sm:$0xf0] }
  0xfd   :  { %5649 = vmatpush.bf16.msra.mxu1 %v9302_v27  ;;  %5662 = vmatpush.bf16.msra.mxu2 %v9430_v34  ;;  %v575_v27 = vadd.f32 %v11718_v24, %v181_v61  ;;  %v10005_v34 = vld [vmem:[#allocation8 + $0x15e0] sm:$0xf]  ;;  %v11194_v61 = vld [vmem:[#allocation8 + $0x15cc] sm:$0xf0]  ;;  %v9862_v18 = vor.u32 %v11162_v63, %v9861_v50 }
  0xfe   :  { %v10133_v10 = vld [vmem:[#allocation8 + $0x16e0] sm:$0xf] }
  0xff   :  { %5674 = vmatpush.bf16.msra.mxu3 %v9574_v43  ;;  %v183_v43 = vperm.slane %v11738_v41, 3  ;;  %v628_v47 = vpop.f32.mrf.mxu1  ;;  %v686_v60 = vmax.f32 %v575_v27, 0.0  ;;  %v9845_v27 = vld [vmem:[#allocation8 + $0x14a0] sm:$0xf] }
 0x100   :  { %5686 = vmatpush.bf16.msrb.mxu0 %v9718_v21  ;;  %v9381_v21 = vld [vmem:[#allocation8 + $0x1100] sm:$0xf]  ;;  %v11258_v47 = vld [vmem:[#allocation8 + $0x17cc] sm:$0xf0] }
 0x101   :  { %5650 = vmatpush.bf16.msra.mxu1 %v9286_v49  ;;  %5663 = vmatpush.bf16.msra.mxu2 %v9414_v56  ;;  %v9382_v24 = vor.u32 %v11042_v23, %v9381_v21  ;;  %v9878_v49 = vor.u32 %v11166_v31, %v9877_v30  ;;  %v10006_v56 = vor.u32 %v11198_v38, %v10005_v34  ;;  %v11190_v38 = vld [vmem:[#allocation8 + $0x15ac] sm:$0xf0] }
 0x102   :  { %v601_v8 = vadd.f32 %v11732_v2, %v183_v43  ;;  %v11758_v21 = vpack.c.bf16 %v686_v60, %v686_v60  ;;  %v9990_v2 = vor.u32 %v11194_v61, %v9989_v62  ;;  %v10134_v34 = vor.u32 %v11230_v14, %v10133_v10  ;;  %v10117_v43 = vld [vmem:[#allocation8 + $0x16c0] sm:$0xf]  ;;  %v11150_v10 = vld [vmem:[#allocation8 + $0x146c] sm:$0xf0] }
 0x103   :  { %5675 = vmatpush.bf16.msra.mxu3 %v9558_v3  ;;  %v588_v3 = vadd.f32 %v11728_v54, %v182_v11  ;;  %v641_v15 = vpop.f32.mrf.mxu2  ;;  %v9957_v60 = vld [vmem:[#allocation8 + $0x1580] sm:$0xf] }
 0x104   :  { %5687 = vmatpush.bf16.msrb.mxu0 %v9702_v46  ;;  %v11110_v46 = vld [vmem:[#allocation8 + $0x132c] sm:$0xf0]  ;;  %v11756_v54 = vpop.f32.mrf.mxu0  ;;  %v654_v11 = vpop.f32.mrf.mxu3  ;;  %v688_v40 = vmax.f32 %v601_v8, 0.0  ;;  %v10101_v61 = vld [vmem:[#allocation8 + $0x16a0] sm:$0xf] }
 0x105   :  { %5651 = vmatpush.bf16.msra.mxu1 %v9270_v9  ;;  %5664 = vmatpush.bf16.msra.mxu2 %v9398_v19  ;;  %v9654_v4 = vor.u32 %v11110_v46, %v9653_v45  ;;  %v11106_v9 = vld [vmem:[#allocation8 + $0x130c] sm:$0xf0]  ;;  %v10261_v19 = vld [vmem:[#allocation8 + $0x17e0] sm:$0xf]  ;;  %v687_v30 = vmax.f32 %v588_v3, 0.0 }
 0x106   :  { %v9638_v31 = vor.u32 %v11106_v9, %v9637_v7  ;;  %v10262_v12 = vor.u32 %v11262_v20, %v10261_v19  ;;  %v10245_v46 = vld [vmem:[#allocation8 + $0x17c0] sm:$0xf]  ;;  %v11222_v3 = vld [vmem:[#allocation8 + $0x16ac] sm:$0xf0] }
 0x107   :  { %5676 = vmatpush.bf16.msra.mxu3 %v9542_v28  ;;  %v11158_v28 = vld [vmem:[#allocation8 + $0x14ac] sm:$0xf0]  ;;  %v11762_v50 = vpack.c.bf16 %v687_v30, %v687_v30  ;;  %v10246_v62 = vor.u32 %v11258_v47, %v10245_v46  ;;  %v9813_v9 = vld [vmem:[#allocation8 + $0x1460] sm:$0xf]  ;;  %v10102_v14 = vor.u32 %v11222_v3, %v10101_v61  ;;  %v184_v47 = vperm.slane %v11738_v41, 4 }
 0x108   :  { %5688 = vmatpush.bf16.msrb.mxu0 %v9686_v5  ;;  %v11074_v5 = vld [vmem:[#allocation8 + $0x120c] sm:$0xf0]  ;;  %v9846_v45 = vor.u32 %v11158_v28, %v9845_v27  ;;  %v9941_v15 = vld [vmem:[#allocation8 + $0x1560] sm:$0xf]  ;;  %v186_v61 = vperm.slane %v11738_v41, 6 }
 0x109   :  { %5652 = vmatpush.bf16.msra.mxu1 %v9254_v44  ;;  %5665 = vmatpush.bf16.msra.mxu2 %v9382_v24  ;;  %v9510_v23 = vor.u32 %v11074_v5, %v9509_v53  ;;  %v11226_v44 = vld [vmem:[#allocation8 + $0x16cc] sm:$0xf0]  ;;  %v9829_v24 = vld [vmem:[#allocation8 + $0x1480] sm:$0xf] }
 0x10a   :  { %v10118_v63 = vor.u32 %v11226_v44, %v10117_v43  ;;  %v10229_v53 = vld [vmem:[#allocation8 + $0x17a0] sm:$0xf]  ;;  %v11254_v5 = vld [vmem:[#allocation8 + $0x17ac] sm:$0xf0] }
 0x10b   :  { %5677 = vmatpush.bf16.msra.mxu3 %v9526_v59  ;;  %v11764_v59 = vpack.c.bf16 %v688_v40, %v688_v40  ;;  %v10230_v19 = vor.u32 %v11254_v5, %v10229_v53  ;;  %v10085_v20 = vld [vmem:[#allocation8 + $0x1680] sm:$0xf]  ;;  %v11218_v11 = vld [vmem:[#allocation8 + $0x168c] sm:$0xf0] }
 0x10c   :  { %5689 = vmatpush.bf16.msrb.mxu0 %v9670_v35  ;;  %5653 = vmatmul.bf16.vlgmr.msra.gmra.mxu1 %v11754_v17  ;;  %v9973_v35 = vld [vmem:[#allocation8 + $0x15a0] sm:$0xf]  ;;  %v667_v7 = vpop.f32.mrf.mxu0  ;;  %v11250_v27 = vld [vmem:[#allocation8 + $0x178c] sm:$0xf0] }
 0x10d   :  { %5697 = vmatpush.bf16.msrb.mxu1 %v9878_v49  ;;  %5710 = vmatpush.bf16.msrb.mxu2 %v10006_v56  ;;  %v9974_v48 = vor.u32 %v11190_v38, %v9973_v35  ;;  %v11154_v49 = vld [vmem:[#allocation8 + $0x148c] sm:$0xf0]  ;;  %v9797_v30 = vld [vmem:[#allocation8 + $0x1440] sm:$0xf] }
 0x10e   :  { %5666 = vmatmul.bf16.vlgmr.msra.gmra.mxu2 %v11758_v21  ;;  %v11186_v56 = vld [vmem:[#allocation8 + $0x158c] sm:$0xf0]  ;;  %v9925_v35 = vld [vmem:[#allocation8 + $0x1540] sm:$0xf] }
 0x10f   :  { %5678 = vmatpush.bf16.msra.mxu3 %v9510_v23  ;;  %v9958_v8 = vor.u32 %v11186_v56, %v9957_v60  ;;  %v10213_v23 = vld [vmem:[#allocation8 + $0x1780] sm:$0xf]  ;;  %v11178_v38 = vld [vmem:[#allocation8 + $0x154c] sm:$0xf0] }
 0x110   :  { %5690 = vmatpush.bf16.msrb.mxu0 %v9654_v4  ;;  %v9830_v4 = vor.u32 %v11154_v49, %v9829_v24  ;;  %v10214_v40 = vor.u32 %v11250_v27, %v10213_v23  ;;  %v11214_v43 = vld [vmem:[#allocation8 + $0x166c] sm:$0xf0]  ;;  %v9926_v24 = vor.u32 %v11178_v38, %v9925_v35  ;;  %v9781_v49 = vld [vmem:[#allocation8 + $0x1420] sm:$0xf]  ;;  %v10524_v27 = vld [vmem:[#allocation8 + $0xe4] sm:$0xf] }
 0x111   :  { %5698 = vmatpush.bf16.msrb.mxu1 %v9862_v18  ;;  %5711 = vmatpush.bf16.msrb.mxu2 %v9990_v2  ;;  %v11182_v18 = vld [vmem:[#allocation8 + $0x156c] sm:$0xf0]  ;;  %v9814_v2 = vor.u32 %v11150_v10, %v9813_v9  ;;  %v9909_v56 = vld [vmem:[#allocation8 + $0x1520] sm:$0xf]  ;;  %v614_v10 = vadd.f32 %v11736_v33, %v184_v47  ;;  %v187_v35 = vperm.slane %v11738_v41, 7 }
 0x112   :  { %5679 = vmatmul.bf16.vlgmr.msra.gmra.mxu3 %v11762_v50  ;;  %v9942_v28 = vor.u32 %v11182_v18, %v9941_v15  ;;  %v11246_v46 = vld [vmem:[#allocation8 + $0x176c] sm:$0xf0]  ;;  %v10181_v7 = vld [vmem:[#allocation8 + $0x1740] sm:$0xf] }
 0x113   :  { %5723 = vmatpush.bf16.msrb.mxu3 %v10134_v34  ;;  %v10086_v34 = vor.u32 %v11218_v11, %v10085_v20  ;;  %v11210_v53 = vld [vmem:[#allocation8 + $0x164c] sm:$0xf0]  ;;  %v9765_v9 = vld [vmem:[#allocation8 + $0x1400] sm:$0xf] }
 0x114   :  { %5691 = vmatpush.bf16.msrb.mxu0 %v9638_v31  ;;  %v11146_v31 = vld [vmem:[#allocation8 + $0x144c] sm:$0xf0] }
 0x115   :  { %5699 = vmatpush.bf16.msrb.mxu1 %v9846_v45  ;;  %5712 = vmatpush.bf16.msrb.mxu2 %v9974_v48  ;;  %v9798_v44 = vor.u32 %v11146_v31, %v9797_v30  ;;  %v10197_v45 = vld [vmem:[#allocation8 + $0x1760] sm:$0xf]  ;;  %v185_v48 = vperm.slane %v11738_v41, 5  ;;  %v11138_v18 = vld [vmem:[#allocation8 + $0x140c] sm:$0xf0] }
 0x116   :  { %v10198_v3 = vor.u32 %v11246_v46, %v10197_v45  ;;  %v11170_v20 = vld [vmem:[#allocation8 + $0x150c] sm:$0xf0]  ;;  %v7319_v30 = vld [vmem:[#allocation8 + $0xf0] sm:$0xf0]  ;;  %v10037_v31 = vld [vmem:[#allocation8 + $0x1620] sm:$0xf]  ;;  %v9766_v33 = vor.u32 %v11138_v18, %v9765_v9 }
 0x117   :  { %5692 = vmatmul.bf16.vlgmr.msrb.gmra.mxu0 %v11764_v59  ;;  %5724 = vmatpush.bf16.msrb.mxu3 %v10118_v63  ;;  %v11142_v63 = vld [vmem:[#allocation8 + $0x142c] sm:$0xf0]  ;;  %v10309_v45 = vld [vmem:[#allocation8 + $0x1840] sm:$0xf]  ;;  %v7322_v46 = vor.u32 %v10524_v27, %v7319_v30  ;;  %v10588_v9 = vld [vmem:[#allocation8 + $0x2e4] sm:$0xf] }
 0x118   :  { %5736 = vmatpush.bf16.msra.mxu0 %v10262_v12  ;;  %v10069_v12 = vld [vmem:[#allocation8 + $0x1660] sm:$0xf]  ;;  %v9782_v5 = vor.u32 %v11142_v63, %v9781_v49  ;;  %v11278_v23 = vld [vmem:[#allocation8 + $0x186c] sm:$0xf0]  ;;  %v7303_v49 = vld [vmem:[#allocation8 + $0xd0] sm:$0xf0]  ;;  %v640_v63 = vadd.f32 %v11745_v16, %v186_v61 }
 0x119   :  { %5700 = vmatpush.bf16.msrb.mxu1 %v9830_v4  ;;  %5713 = vmatpush.bf16.msrb.mxu2 %v9958_v8  ;;  %v10070_v60 = vor.u32 %v11214_v43, %v10069_v12  ;;  %v10053_v4 = vld [vmem:[#allocation8 + $0x1640] sm:$0xf]  ;;  %v11242_v8 = vld [vmem:[#allocation8 + $0x174c] sm:$0xf0]  ;;  %v10552_v30 = vld [vmem:[#allocation8 + $0x1c4] sm:$0xf] }
 0x11a   :  { %v10054_v11 = vor.u32 %v11210_v53, %v10053_v4  ;;  %v11238_v38 = vld [vmem:[#allocation8 + $0x172c] sm:$0xf0]  ;;  %v10556_v53 = vld [vmem:[#allocation8 + $0x1e4] sm:$0xf] }
 0x11b   :  { %5725 = vmatpush.bf16.msrb.mxu3 %v10102_v14  ;;  %v627_v14 = vadd.f32 %v11740_v52, %v185_v48  ;;  %v10165_v52 = vld [vmem:[#allocation8 + $0x1720] sm:$0xf]  ;;  %v11274_v48 = vld [vmem:[#allocation8 + $0x184c] sm:$0xf0] }
 0x11c   :  { %5737 = vmatpush.bf16.msra.mxu0 %v10246_v62  ;;  %v11174_v62 = vld [vmem:[#allocation8 + $0x152c] sm:$0xf0]  ;;  %v10166_v41 = vor.u32 %v11238_v38, %v10165_v52  ;;  %v7559_v52 = vld [vmem:[#allocation8 + $0x2d0] sm:$0xf0] }
 0x11d   :  { %5701 = vmatpush.bf16.msrb.mxu1 %v9814_v2  ;;  %5714 = vmatpush.bf16.msrb.mxu2 %v9942_v28  ;;  %v9910_v15 = vor.u32 %v11174_v62, %v9909_v56  ;;  %v10325_v2 = vld [vmem:[#allocation8 + $0x1860] sm:$0xf]  ;;  %v10182_v28 = vor.u32 %v11242_v8, %v10181_v7  ;;  %v690_v12 = vmax.f32 %v627_v14, 0.0  ;;  %v11202_v56 = vld [vmem:[#allocation8 + $0x160c] sm:$0xf0]  ;;  %v10310_v8 = vor.u32 %v11274_v48, %v10309_v45 }
 0x11e   :  { %v10149_v62 = vld [vmem:[#allocation8 + $0x1700] sm:$0xf]  ;;  %v11234_v4 = vld [vmem:[#allocation8 + $0x170c] sm:$0xf0]  ;;  %v7703_v48 = vld [vmem:[#allocation8 + $0x3f0] sm:$0xf0] }
 0x11f   :  { %5726 = vmatpush.bf16.msrb.mxu3 %v10086_v34  ;;  %v11206_v34 = vld [vmem:[#allocation8 + $0x162c] sm:$0xf0]  ;;  %v11778_v14 = vpack.c.bf16 %v690_v12, %v690_v12 }
 0x120   :  { %5738 = vmatpush.bf16.msra.mxu0 %v10230_v19  ;;  %v9893_v19 = vld [vmem:[#allocation8 + $0x1500] sm:$0xf]  ;;  %v10038_v47 = vor.u32 %v11206_v34, %v10037_v31  ;;  %v11270_v18 = vld [vmem:[#allocation8 + $0x182c] sm:$0xf0]  ;;  %v7431_v31 = vld [vmem:[#allocation8 + $0x1d0] sm:$0xf0] }
 0x121   :  { %5702 = vmatpush.bf16.msrb.mxu1 %v9798_v44  ;;  %5715 = vmatpush.bf16.msrb.mxu2 %v9926_v24  ;;  %v9894_v43 = vor.u32 %v11170_v20, %v9893_v19  ;;  %v10326_v44 = vor.u32 %v11278_v23, %v10325_v2  ;;  %v10520_v24 = vld [vmem:[#allocation8 + $0xc4] sm:$0xf]  ;;  %v11326_v19 = vld [vmem:[#allocation7 + $0x18] ss:$0 sm:$0xff]  ;;  %v10150_v20 = vor.u32 %v11234_v4, %v10149_v62  ;;  %v7287_v23 = vld [vmem:[#allocation8 + $0xb0] sm:$0xf0] }
 0x122   :  { %v7306_v16 = vor.u32 %v10520_v24, %v7303_v49  ;;  %v10516_v2 = vld [vmem:[#allocation8 + $0xa4] sm:$0xf]  ;;  %v11266_v12 = vld [vmem:[#allocation8 + $0x180c] sm:$0xf0]  ;;  %v7434_v45 = vor.u32 %v10552_v30, %v7431_v31  ;;  %v666_v62 = vadd.f32 %v11326_v19, %v11756_v54  ;;  %v7399_v19 = vld [vmem:[#allocation8 + $0x190] sm:$0xf0] }
 0x123   :  { %5727 = vmatpush.bf16.msrb.mxu3 %v10070_v60  ;;  %v10021_v60 = vld [vmem:[#allocation8 + $0x1600] sm:$0xf]  ;;  %v7290_v38 = vor.u32 %v10516_v2, %v7287_v23  ;;  %v10580_v4 = vld [vmem:[#allocation8 + $0x2a4] sm:$0xf]  ;;  %v7527_v2 = vld [vmem:[#allocation8 + $0x290] sm:$0xf0] }
 0x124   :  { %5739 = vmatpush.bf16.msra.mxu0 %v10214_v40  ;;  %v689_v40 = vmax.f32 %v614_v10, 0.0  ;;  %v7575_v10 = vld [vmem:[#allocation8 + $0x2f0] sm:$0xf0]  ;;  %v10022_v61 = vor.u32 %v11202_v56, %v10021_v60  ;;  %v10548_v60 = vld [vmem:[#allocation8 + $0x1a4] sm:$0xf] }
 0x125   :  { %5703 = vmatpush.bf16.msrb.mxu1 %v9782_v5  ;;  %5716 = vmatpush.bf16.msrb.mxu2 %v9910_v15  ;;  %v7447_v5 = vld [vmem:[#allocation8 + $0x1f0] sm:$0xf0]  ;;  %v10293_v15 = vld [vmem:[#allocation8 + $0x1820] sm:$0xf] }
 0x126   :  { %v11776_v7 = vpack.c.bf16 %v689_v40, %v689_v40  ;;  %v10294_v34 = vor.u32 %v11270_v18, %v10293_v15  ;;  %v10277_v40 = vld [vmem:[#allocation8 + $0x1800] sm:$0xf]  ;;  %v7415_v56 = vld [vmem:[#allocation8 + $0x1b0] sm:$0xf0] }
 0x127   :  { %5728 = vmatpush.bf16.msrb.mxu3 %v10054_v11  ;;  %v7450_v11 = vor.u32 %v10556_v53, %v7447_v5  ;;  %v7543_v53 = vld [vmem:[#allocation8 + $0x2b0] sm:$0xf0] }
 0x128   :  { %5740 = vmatpush.bf16.msra.mxu0 %v10198_v3  ;;  %v653_v3 = vadd.f32 %v11748_v25, %v187_v35  ;;  %v691_v25 = vmax.f32 %v640_v63, 0.0  ;;  %v1503_v35 = vld [vmem:[#allocation10] sm:$0xf]  ;;  %v5446_v63 = vpop.f32.mrf.mxu1  ;;  %v7687_v15 = vld [vmem:[#allocation8 + $0x3d0] sm:$0xf0]  ;;  %v7546_v54 = vor.u32 %v10580_v4, %v7543_v53 }
 0x129   :  { %5704 = vmatpush.bf16.msrb.mxu1 %v9766_v33  ;;  %5717 = vmatpush.bf16.msrb.mxu2 %v9894_v43  ;;  %v10584_v33 = vld [vmem:[#allocation8 + $0x2c4] sm:$0xf]  ;;  %v1505_v49 = vperm.slane %v1503_v35, 0 }
 0x12a   :  { %v692_v27 = vmax.f32 %v653_v3, 0.0  ;;  %v10512_v43 = vld [vmem:[#allocation8 + $0x84] sm:$0xf]  ;;  %v10278_v3 = vor.u32 %v11266_v12, %v10277_v40 }
 0x12b   :  { %5729 = vmatpush.bf16.msrb.mxu3 %v10038_v47  ;;  %v10620_v47 = vld [vmem:[#allocation8 + $0x3e4] sm:$0xf]  ;;  %v5447_v18 = vadd.f32 %v5446_v63, %v1505_v49 }
 0x12c   :  { %5741 = vmatpush.bf16.msra.mxu0 %v10182_v28  ;;  %5705 = vmatmul.bf16.vlgmr.msrb.gmra.mxu1 %v11776_v7  ;;  %v7578_v28 = vor.u32 %v10588_v9, %v7575_v10  ;;  %v11784_v24 = vpack.c.bf16 %v692_v27, %v692_v27  ;;  %v10508_v9 = vld [vmem:[#allocation8 + $0x64] sm:$0xf]  ;;  %v7418_v10 = vor.u32 %v10548_v60, %v7415_v56  ;;  %v7223_v56 = vld [vmem:[#allocation8 + $0x30] sm:$0xf0] }
 0x12d   :  { %5753 = vmatpush.bf16.msra.mxu1 %v10326_v44  ;;  %5762 = vmatpush.bf16.msra.mxu2 %v7322_v46  ;;  %v11782_v44 = vpack.c.bf16 %v691_v25, %v691_v25  ;;  %v7271_v46 = vld [vmem:[#allocation8 + $0x90] sm:$0xf0]  ;;  %v10544_v25 = vld [vmem:[#allocation8 + $0x184] sm:$0xf] }
 0x12e   :  { %5718 = vmatmul.bf16.vlgmr.msrb.gmra.mxu2 %v11778_v14  ;;  %v7274_v5 = vor.u32 %v10512_v43, %v7271_v46  ;;  %v7402_v31 = vor.u32 %v10544_v25, %v7399_v19  ;;  %v10612_v35 = vld [vmem:[#allocation8 + $0x3a4] sm:$0xf] }
 0x12f   :  { %5730 = vmatpush.bf16.msrb.mxu3 %v10022_v61  ;;  %v10616_v61 = vld [vmem:[#allocation8 + $0x3c4] sm:$0xf]  ;;  %v5459_v30 = vpop.f32.mrf.mxu2 }
 0x130   :  { %5742 = vmatpush.bf16.msra.mxu0 %v10166_v41  ;;  %v7562_v41 = vor.u32 %v10584_v33, %v7559_v52  ;;  %v7690_v27 = vor.u32 %v10616_v61, %v7687_v15  ;;  %v7671_v33 = vld [vmem:[#allocation8 + $0x3b0] sm:$0xf0]  ;;  %v5460_v52 = vadd.f32 %v5459_v30, %v5447_v18  ;;  %v5448_v40 = vpop.f32.mrf.mxu1  ;;  %v10540_v43 = vld [vmem:[#allocation8 + $0x164] sm:$0xf] }
 0x131   :  { %5754 = vmatpush.bf16.msra.mxu1 %v10310_v8  ;;  %5763 = vmatpush.bf16.msra.mxu2 %v7306_v16  ;;  %v7706_v8 = vor.u32 %v10620_v47, %v7703_v48  ;;  %v7255_v16 = vld [vmem:[#allocation8 + $0x70] sm:$0xf0]  ;;  %v10572_v47 = vld [vmem:[#allocation8 + $0x264] sm:$0xf]  ;;  %v7674_v63 = vor.u32 %v10612_v35, %v7671_v33 }
 0x132   :  { %5731 = vmatmul.bf16.vlgmr.msrb.gmra.mxu3 %v11782_v44  ;;  %v7258_v23 = vor.u32 %v10508_v9, %v7255_v16  ;;  %v7511_v48 = vld [vmem:[#allocation8 + $0x270] sm:$0xf0]  ;;  %v10536_v53 = vld [vmem:[#allocation8 + $0x144] sm:$0xf] }
 0x133   :  { %5775 = vmatpush.bf16.msra.mxu3 %v7450_v11  ;;  %v10576_v11 = vld [vmem:[#allocation8 + $0x284] sm:$0xf]  ;;  %v7514_v4 = vor.u32 %v10572_v47, %v7511_v48  ;;  %v7351_v35 = vld [vmem:[#allocation8 + $0x130] sm:$0xf0] }
 0x134   :  { %5743 = vmatpush.bf16.msra.mxu0 %v10150_v20  ;;  %v693_v20 = vmax.f32 %v666_v62, 0.0  ;;  %v7530_v12 = vor.u32 %v10576_v11, %v7527_v2  ;;  %v10608_v62 = vld [vmem:[#allocation8 + $0x384] sm:$0xf]  ;;  %v7639_v11 = vld [vmem:[#allocation8 + $0x370] sm:$0xf0] }
 0x135   :  { %5755 = vmatpush.bf16.msra.mxu1 %v10294_v34  ;;  %5764 = vmatpush.bf16.msra.mxu2 %v7290_v38  ;;  %v7239_v34 = vld [vmem:[#allocation8 + $0x50] sm:$0xf0]  ;;  %v5485_v38 = vpop.f32.mrf.mxu0  ;;  %v10568_v9 = vld [vmem:[#allocation8 + $0x244] sm:$0xf] }
 0x136   :  { %v11789_v46 = vpack.c.bf16 %v693_v20, %v693_v20  ;;  %v10496_v18 = vld [vmem:[#allocation8 + $0x4] sm:$0xf] }
 0x137   :  { %5744 = vmatmul.bf16.vlgmr.msra.gmra.mxu0 %v11784_v24  ;;  %5776 = vmatpush.bf16.msra.mxu3 %v7434_v45  ;;  %v7383_v45 = vld [vmem:[#allocation8 + $0x170] sm:$0xf0]  ;;  %v5461_v25 = vpop.f32.mrf.mxu2  ;;  %v10604_v20 = vld [vmem:[#allocation8 + $0x364] sm:$0xf] }
 0x138   :  { %5788 = vmatpush.bf16.msrb.mxu0 %v7578_v28  ;;  %v10504_v28 = vld [vmem:[#allocation8 + $0x44] sm:$0xf]  ;;  %v7386_v60 = vor.u32 %v10540_v43, %v7383_v45  ;;  %v7642_v43 = vor.u32 %v10604_v20, %v7639_v11 }
 0x139   :  { %5756 = vmatpush.bf16.msra.mxu1 %v10278_v3  ;;  %5765 = vmatpush.bf16.msra.mxu2 %v7274_v5  ;;  %v7242_v49 = vor.u32 %v10504_v28, %v7239_v34  ;;  %v7655_v3 = vld [vmem:[#allocation8 + $0x390] sm:$0xf0]  ;;  %v10652_v2 = vld [vmem:[#allocation8 + $0x4e4] sm:$0xf]  ;;  %v5498_v28 = vpop.f32.mrf.mxu1 }
 0x13a   :  { %v7367_v5 = vld [vmem:[#allocation8 + $0x150] sm:$0xf0]  ;;  %v7658_v15 = vor.u32 %v10608_v62, %v7655_v3  ;;  %v10532_v34 = vld [vmem:[#allocation8 + $0x124] sm:$0xf] }
 0x13b   :  { %5777 = vmatpush.bf16.msra.mxu3 %v7418_v10  ;;  %v7495_v10 = vld [vmem:[#allocation8 + $0x250] sm:$0xf0]  ;;  %v7370_v19 = vor.u32 %v10536_v53, %v7367_v5  ;;  %v10564_v33 = vld [vmem:[#allocation8 + $0x224] sm:$0xf]  ;;  %v7354_v48 = vor.u32 %v10532_v34, %v7351_v35 }
 0x13c   :  { %5789 = vmatpush.bf16.msrb.mxu0 %v7562_v41  ;;  %v10500_v41 = vld [vmem:[#allocation8 + $0x24] sm:$0xf]  ;;  %10339 = vmatmul.msk.bf16.vlgmr.msra.gmra.mxu1 %vm5433_vm1, %v11789_v46  ;;  %v7498_v30 = vor.u32 %v10568_v9, %v7495_v10  ;;  %v7959_v5 = vld [vmem:[#allocation8 + $0x5f0] sm:$0xf0] }
 0x13d   :  { %5801 = vmatpush.bf16.msrb.mxu1 %v7706_v8  ;;  %5766 = vmatpush.bf16.msra.mxu2 %v7258_v23  ;;  %v5472_v8 = vpop.f32.mrf.mxu3  ;;  %v7226_v61 = vor.u32 %v10500_v41, %v7223_v56  ;;  %v5487_v23 = vpop.f32.mrf.mxu0  ;;  %v10600_v45 = vld [vmem:[#allocation8 + $0x344] sm:$0xf]  ;;  %v7815_v41 = vld [vmem:[#allocation8 + $0x4d0] sm:$0xf0] }
 0x13e   :  { %v5473_v16 = vadd.f32 %v5472_v8, %v5460_v52  ;;  %v7479_v52 = vld [vmem:[#allocation8 + $0x230] sm:$0xf0]  ;;  %v10560_v62 = vld [vmem:[#allocation8 + $0x204] sm:$0xf] }
 0x13f   :  { %5778 = vmatpush.bf16.msra.mxu3 %v7402_v31  ;;  %v7831_v31 = vld [vmem:[#allocation8 + $0x4f0] sm:$0xf0]  ;;  %v10684_v53 = vld [vmem:[#allocation8 + $0x5e4] sm:$0xf] }
 0x140   :  { %5790 = vmatpush.bf16.msrb.mxu0 %v7546_v54  ;;  %v7207_v54 = vld [vmem:[#allocation8 + $0x10] sm:$0xf0]  ;;  %v7834_v47 = vor.u32 %v10652_v2, %v7831_v31  ;;  %v10716_v9 = vld [vmem:[#allocation8 + $0x6e4] sm:$0xf]  ;;  %v7962_v11 = vor.u32 %v10684_v53, %v7959_v5 }
 0x141   :  { %5802 = vmatpush.bf16.msrb.mxu1 %v7690_v27  ;;  %5767 = vmatpush.bf16.msra.mxu2 %v7242_v49  ;;  %v5486_v27 = vadd.f32 %v5485_v38, %v5473_v16  ;;  %v7623_v49 = vld [vmem:[#allocation8 + $0x350] sm:$0xf0]  ;;  %v7482_v38 = vor.u32 %v10564_v33, %v7479_v52  ;;  %v5511_v16 = vpop.f32.mrf.mxu2  ;;  %v10644_v2 = vld [vmem:[#allocation8 + $0x4a4] sm:$0xf] }
 0x142   :  { %v7335_v56 = vld [vmem:[#allocation8 + $0x110] sm:$0xf0]  ;;  %v7626_v8 = vor.u32 %v10600_v45, %v7623_v49  ;;  %v10712_v35 = vld [vmem:[#allocation8 + $0x6c4] sm:$0xf] }
 0x143   :  { %5779 = vmatpush.bf16.msra.mxu3 %v7386_v60  ;;  %v5499_v40 = vadd.f32 %v5498_v28, %v5486_v27  ;;  %v10528_v60 = vld [vmem:[#allocation8 + $0x104] sm:$0xf]  ;;  %v8087_v10 = vld [vmem:[#allocation8 + $0x6f0] sm:$0xf0] }
 0x144   :  { %5791 = vmatpush.bf16.msrb.mxu0 %v7530_v12  ;;  %v7210_v12 = vor.u32 %v10496_v18, %v7207_v54  ;;  %v10596_v18 = vld [vmem:[#allocation8 + $0x324] sm:$0xf]  ;;  %v7607_v54 = vld [vmem:[#allocation8 + $0x330] sm:$0xf0]  ;;  %v8090_v28 = vor.u32 %v10716_v9, %v8087_v10 }
 0x145   :  { %5803 = vmatpush.bf16.msrb.mxu1 %v7674_v63  ;;  %5768 = vmatpush.bf16.msra.mxu2 %v7226_v61  ;;  %v10648_v63 = vld [vmem:[#allocation8 + $0x4c4] sm:$0xf]  ;;  %v5474_v3 = vpop.f32.mrf.mxu3  ;;  %v5512_v25 = vadd.f32 %v5511_v16, %v5499_v40  ;;  %v7799_v23 = vld [vmem:[#allocation8 + $0x4b0] sm:$0xf0]  ;;  %v5537_v27 = vpop.f32.mrf.mxu0  ;;  %v7610_v34 = vor.u32 %v10596_v18, %v7607_v54 }
 0x146   :  { %v7818_v61 = vor.u32 %v10648_v63, %v7815_v41  ;;  %v7943_v31 = vld [vmem:[#allocation8 + $0x5d0] sm:$0xf0]  ;;  %v7802_v52 = vor.u32 %v10644_v2, %v7799_v23  ;;  %v10708_v3 = vld [vmem:[#allocation8 + $0x6a4] sm:$0xf] }
 0x147   :  { %5780 = vmatpush.bf16.msra.mxu3 %v7370_v19  ;;  %v5500_v19 = vpop.f32.mrf.mxu1  ;;  %v8071_v33 = vld [vmem:[#allocation8 + $0x6d0] sm:$0xf0]  ;;  %v10636_v9 = vld [vmem:[#allocation8 + $0x464] sm:$0xf] }
 0x148   :  { %5792 = vmatpush.bf16.msrb.mxu0 %v7514_v4  ;;  %v7463_v4 = vld [vmem:[#allocation8 + $0x210] sm:$0xf0]  ;;  %v8074_v41 = vor.u32 %v10712_v35, %v8071_v33  ;;  %v10704_v23 = vld [vmem:[#allocation8 + $0x684] sm:$0xf] }
 0x149   :  { %5804 = vmatpush.bf16.msrb.mxu1 %v7658_v15  ;;  %5769 = vmatpush.bf16.msra.mxu2 %v7210_v12  ;;  %v7338_v15 = vor.u32 %v10528_v60, %v7335_v56  ;;  %v7466_v20 = vor.u32 %v10560_v62, %v7463_v4  ;;  %v10592_v12 = vld [vmem:[#allocation8 + $0x304] sm:$0xf]  ;;  %v7591_v40 = vld [vmem:[#allocation8 + $0x310] sm:$0xf0]  ;;  %v5513_v53 = vpop.f32.mrf.mxu2 }
 0x14a   :  { %v8215_v49 = vld [vmem:[#allocation8 + $0x7f0] sm:$0xf0]  ;;  %v7594_v62 = vor.u32 %v10592_v12, %v7591_v40  ;;  %v10740_v33 = vld [vmem:[#allocation8 + $0x7a4] sm:$0xf] }
 0x14b   :  { %5781 = vmatpush.bf16.msra.mxu3 %v7354_v48  ;;  %v10748_v48 = vld [vmem:[#allocation8 + $0x7e4] sm:$0xf]  ;;  %v7927_v60 = vld [vmem:[#allocation8 + $0x5b0] sm:$0xf0] }
 0x14c   :  { %5793 = vmatpush.bf16.msrb.mxu0 %v7498_v30  ;;  %5770 = vmatmul.bf16.vlgmr.msra.gmra.mxu2 %v11666_v26  ;;  %v10680_v30 = vld [vmem:[#allocation8 + $0x5c4] sm:$0xf]  ;;  %v8055_v4 = vld [vmem:[#allocation8 + $0x6b0] sm:$0xf0] }
 0x14d   :  { %5805 = vmatpush.bf16.msrb.mxu1 %v7642_v43  ;;  %5814 = vmatpush.bf16.msrb.mxu2 %v7834_v47  ;;  %v10640_v43 = vld [vmem:[#allocation8 + $0x484] sm:$0xf]  ;;  %v7946_v45 = vor.u32 %v10680_v30, %v7943_v31  ;;  %v7783_v47 = vld [vmem:[#allocation8 + $0x490] sm:$0xf0]  ;;  %v5524_v63 = vpop.f32.mrf.mxu3  ;;  %v5539_v54 = vpop.f32.mrf.mxu0  ;;  %v8058_v19 = vor.u32 %v10708_v3, %v8055_v4 }
 0x14e   :  { %v5525_v56 = vadd.f32 %v5524_v63, %v5512_v25  ;;  %v7786_v5 = vor.u32 %v10640_v43, %v7783_v47  ;;  %v8199_v18 = vld [vmem:[#allocation8 + $0x7d0] sm:$0xf0]  ;;  %v10668_v43 = vld [vmem:[#allocation8 + $0x564] sm:$0xf] }
 0x14f   :  { %5782 = vmatpush.bf16.msra.mxu3 %v7338_v15  ;;  %v10744_v15 = vld [vmem:[#allocation8 + $0x7c4] sm:$0xf]  ;;  %v5550_v25 = vpop.f32.mrf.mxu1  ;;  %v7751_v35 = vld [vmem:[#allocation8 + $0x450] sm:$0xf0] }
 0x150   :  { %5794 = vmatpush.bf16.msrb.mxu0 %v7482_v38  ;;  %v10676_v38 = vld [vmem:[#allocation8 + $0x5a4] sm:$0xf]  ;;  %v5538_v10 = vadd.f32 %v5537_v27, %v5525_v56  ;;  %v8202_v31 = vor.u32 %v10744_v15, %v8199_v18  ;;  %v7735_v56 = vld [vmem:[#allocation8 + $0x430] sm:$0xf0] }
 0x151   :  { %5806 = vmatpush.bf16.msrb.mxu1 %v7626_v8  ;;  %5815 = vmatpush.bf16.msrb.mxu2 %v7818_v61  ;;  %v8218_v8 = vor.u32 %v10748_v48, %v8215_v49  ;;  %v7930_v16 = vor.u32 %v10676_v38, %v7927_v60  ;;  %v7767_v61 = vld [vmem:[#allocation8 + $0x470] sm:$0xf0]  ;;  %v10632_v27 = vld [vmem:[#allocation8 + $0x444] sm:$0xf]  ;;  %v5563_v38 = vpop.f32.mrf.mxu2 }
 0x152   :  { %5783 = vmatmul.bf16.vlgmr.msra.gmra.mxu3 %v11668_v32  ;;  %v5551_v2 = vadd.f32 %v5550_v25, %v5538_v10  ;;  %v7770_v30 = vor.u32 %v10636_v9, %v7767_v61  ;;  %v10700_v47 = vld [vmem:[#allocation8 + $0x664] sm:$0xf]  ;;  %v8023_v48 = vld [vmem:[#allocation8 + $0x670] sm:$0xf0]  ;;  %v7754_v49 = vor.u32 %v10632_v27, %v7751_v35 }
 0x153   :  { %5827 = vmatpush.bf16.msrb.mxu3 %v7962_v11  ;;  %v7911_v11 = vld [vmem:[#allocation8 + $0x590] sm:$0xf0]  ;;  %v10664_v9 = vld [vmem:[#allocation8 + $0x544] sm:$0xf] }
 0x154   :  { %5795 = vmatpush.bf16.msrb.mxu0 %v7466_v20  ;;  %v10672_v20 = vld [vmem:[#allocation8 + $0x584] sm:$0xf]  ;;  %v8167_v3 = vld [vmem:[#allocation8 + $0x790] sm:$0xf0]  ;;  %v5564_v53 = vadd.f32 %v5563_v38, %v5551_v2 }
 0x155   :  { %5807 = vmatpush.bf16.msrb.mxu1 %v7610_v34  ;;  %5816 = vmatpush.bf16.msrb.mxu2 %v7802_v52  ;;  %v7914_v34 = vor.u32 %v10672_v20, %v7911_v11  ;;  %v8183_v52 = vld [vmem:[#allocation8 + $0x7b0] sm:$0xf0]  ;;  %v5526_v12 = vpop.f32.mrf.mxu3  ;;  %v5589_v4 = vpop.f32.mrf.mxu0  ;;  %v10624_v54 = vld [vmem:[#allocation8 + $0x404] sm:$0xf] }
 0x156   :  { %v8186_v63 = vor.u32 %v10740_v33, %v8183_v52  ;;  %v7879_v10 = vld [vmem:[#allocation8 + $0x550] sm:$0xf0]  ;;  %v10732_v20 = vld [vmem:[#allocation8 + $0x764] sm:$0xf] }
 0x157   :  { %5796 = vmatmul.bf16.vlgmr.msrb.gmra.mxu0 %v11673_v57  ;;  %5828 = vmatpush.bf16.msrb.mxu3 %v7946_v45  ;;  %v7895_v45 = vld [vmem:[#allocation8 + $0x570] sm:$0xf0] }
 0x158   :  { %5840 = vmatpush.bf16.msra.mxu0 %v8090_v28  ;;  %v8039_v28 = vld [vmem:[#allocation8 + $0x690] sm:$0xf0]  ;;  %v7898_v60 = vor.u32 %v10668_v43, %v7895_v45 }
 0x159   :  { %5808 = vmatpush.bf16.msrb.mxu1 %v7594_v62  ;;  %5817 = vmatpush.bf16.msrb.mxu2 %v7786_v5  ;;  %v8042_v40 = vor.u32 %v10704_v23, %v8039_v28  ;;  %v10736_v62 = vld [vmem:[#allocation8 + $0x784] sm:$0xf]  ;;  %v5552_v5 = vpop.f32.mrf.mxu1  ;;  %v8007_v61 = vld [vmem:[#allocation8 + $0x650] sm:$0xf0] }
 0x15a   :  { %v8170_v18 = vor.u32 %v10736_v62, %v8167_v3  ;;  %v7719_v25 = vld [vmem:[#allocation8 + $0x410] sm:$0xf0]  ;;  %v10780_v23 = vld [vmem:[#allocation8 + $0x8e4] sm:$0xf] }
 0x15b   :  { %5829 = vmatpush.bf16.msrb.mxu3 %v7930_v16  ;;  %v10696_v16 = vld [vmem:[#allocation8 + $0x644] sm:$0xf]  ;;  %v8151_v11 = vld [vmem:[#allocation8 + $0x770] sm:$0xf0]  ;;  %v7722_v52 = vor.u32 %v10624_v54, %v7719_v25 }
 0x15c   :  { %5841 = vmatpush.bf16.msra.mxu0 %v8074_v41  ;;  %5809 = vmatmul.bf16.vlgmr.msrb.gmra.mxu1 %v11675_v0  ;;  %v10628_v41 = vld [vmem:[#allocation8 + $0x424] sm:$0xf]  ;;  %v8010_v2 = vor.u32 %v10696_v16, %v8007_v61  ;;  %v8343_v28 = vld [vmem:[#allocation8 + $0x8f0] sm:$0xf0]  ;;  %v8154_v12 = vor.u32 %v10732_v20, %v8151_v11 }
 0x15d   :  { %5853 = vmatpush.bf16.msra.mxu1 %v8218_v8  ;;  %5818 = vmatpush.bf16.msrb.mxu2 %v7770_v30  ;;  %v8026_v8 = vor.u32 %v10700_v47, %v8023_v48  ;;  %v7738_v15 = vor.u32 %v10628_v41, %v7735_v56  ;;  %v10660_v30 = vld [vmem:[#allocation8 + $0x524] sm:$0xf]  ;;  %v5576_v27 = vpop.f32.mrf.mxu3  ;;  %v7991_v35 = vld [vmem:[#allocation8 + $0x630] sm:$0xf0]  ;;  %v8346_v43 = vor.u32 %v10780_v23, %v8343_v28  ;;  %v5565_v41 = vpop.f32.mrf.mxu2 }
 0x15e   :  { %v5577_v33 = vadd.f32 %v5576_v27, %v5564_v53  ;;  %v8135_v47 = vld [vmem:[#allocation8 + $0x750] sm:$0xf0]  ;;  %v10776_v48 = vld [vmem:[#allocation8 + $0x8c4] sm:$0xf] }
 0x15f   :  { %5830 = vmatpush.bf16.msrb.mxu3 %v7914_v34  ;;  %v10692_v34 = vld [vmem:[#allocation8 + $0x624] sm:$0xf]  ;;  %v7847_v62 = vld [vmem:[#allocation8 + $0x510] sm:$0xf0] }
 0x160   :  { %5842 = vmatpush.bf16.msra.mxu0 %v8058_v19  ;;  %v7882_v19 = vor.u32 %v10664_v9, %v7879_v10  ;;  %v11797_v38 = vadd.f32 %v5589_v4, %v5577_v33  ;;  %v10656_v56 = vld [vmem:[#allocation8 + $0x504] sm:$0xf]  ;;  %v7975_v53 = vld [vmem:[#allocation8 + $0x610] sm:$0xf0] }
 0x161   :  { %5854 = vmatpush.bf16.msra.mxu1 %v8202_v31  ;;  %5819 = vmatpush.bf16.msrb.mxu2 %v7754_v49  ;;  %v7863_v31 = vld [vmem:[#allocation8 + $0x530] sm:$0xf0]  ;;  %v10688_v3 = vld [vmem:[#allocation8 + $0x604] sm:$0xf] }
 0x162   :  { %v7866_v45 = vor.u32 %v10660_v30, %v7863_v31  ;;  %v8327_v49 = vld [vmem:[#allocation8 + $0x8d0] sm:$0xf0]  ;;  %v10812_v5 = vld [vmem:[#allocation8 + $0x9e4] sm:$0xf]  ;;  %v7978_v54 = vor.u32 %v10688_v3, %v7975_v53 }
 0x163   :  { %5831 = vmatpush.bf16.msrb.mxu3 %v7898_v60  ;;  %v7994_v60 = vor.u32 %v10692_v34, %v7991_v35  ;;  %v10844_v10 = vld [vmem:[#allocation8 + $0xae4] sm:$0xf]  ;;  %v8599_v16 = vld [vmem:[#allocation8 + $0xaf0] sm:$0xf0]  ;;  %v8330_v61 = vor.u32 %v10776_v48, %v8327_v49 }
 0x164   :  { %5843 = vmatpush.bf16.msra.mxu0 %v8042_v40  ;;  %v10728_v40 = vld [vmem:[#allocation8 + $0x744] sm:$0xf]  ;;  %v8119_v4 = vld [vmem:[#allocation8 + $0x730] sm:$0xf0]  ;;  %v8602_v11 = vor.u32 %v10844_v10, %v8599_v16 }
 0x165   :  { %5855 = vmatpush.bf16.msra.mxu1 %v8186_v63  ;;  %5820 = vmatpush.bf16.msrb.mxu2 %v7738_v15  ;;  %v5591_v63 = vpop.f32.mrf.mxu0  ;;  %v8138_v9 = vor.u32 %v10728_v40, %v8135_v47  ;;  %v7850_v15 = vor.u32 %v10656_v56, %v7847_v62  ;;  %v8311_v20 = vld [vmem:[#allocation8 + $0x8b0] sm:$0xf0]  ;;  %v5578_v23 = vpop.f32.mrf.mxu3  ;;  %v10840_v31 = vld [vmem:[#allocation8 + $0xac4] sm:$0xf] }
 0x166   :  { %v8455_v28 = vld [vmem:[#allocation8 + $0x9d0] sm:$0xf0]  ;;  %v10720_v35 = vld [vmem:[#allocation8 + $0x704] sm:$0xf] }
 0x167   :  { %5832 = vmatpush.bf16.msrb.mxu3 %v7882_v19  ;;  %v10772_v19 = vld [vmem:[#allocation8 + $0x8a4] sm:$0xf]  ;;  %v8583_v27 = vld [vmem:[#allocation8 + $0xad0] sm:$0xf0] }
 0x168   :  { %5844 = vmatpush.bf16.msra.mxu0 %v8026_v8  ;;  %v8471_v8 = vld [vmem:[#allocation8 + $0x9f0] sm:$0xf0]  ;;  %v8314_v34 = vor.u32 %v10772_v19, %v8311_v20  ;;  %v8586_v47 = vor.u32 %v10840_v31, %v8583_v27  ;;  %v10804_v48 = vld [vmem:[#allocation8 + $0x9a4] sm:$0xf] }
 0x169   :  { %5856 = vmatpush.bf16.msra.mxu1 %v8170_v18  ;;  %5821 = vmatpush.bf16.msrb.mxu2 %v7722_v52  ;;  %v10724_v18 = vld [vmem:[#allocation8 + $0x724] sm:$0xf]  ;;  %v8474_v25 = vor.u32 %v10812_v5, %v8471_v8  ;;  %v8103_v33 = vld [vmem:[#allocation8 + $0x710] sm:$0xf0]  ;;  %v5602_v10 = vpop.f32.mrf.mxu1 }
 0x16a   :  { %v8122_v30 = vor.u32 %v10724_v18, %v8119_v4  ;;  %v10768_v52 = vld [vmem:[#allocation8 + $0x884] sm:$0xf]  ;;  %v8295_v40 = vld [vmem:[#allocation8 + $0x890] sm:$0xf0]  ;;  %v8106_v63 = vor.u32 %v10720_v35, %v8103_v33  ;;  %v5603_v18 = vadd.f32 %v5602_v10, %v11797_v38 }
 0x16b   :  { %5833 = vmatpush.bf16.msrb.mxu3 %v7866_v45  ;;  %v8727_v45 = vld [vmem:[#allocation8 + $0xbf0] sm:$0xf0]  ;;  %v10836_v41 = vld [vmem:[#allocation8 + $0xaa4] sm:$0xf]  ;;  %v8298_v56 = vor.u32 %v10768_v52, %v8295_v40 }
 0x16c   :  { %5845 = vmatpush.bf16.msra.mxu0 %v8010_v2  ;;  %5822 = vmatmul.bf16.vlgmr.msrb.gmra.mxu2 %v11681_v36  ;;  %v10808_v2 = vld [vmem:[#allocation8 + $0x9c4] sm:$0xf]  ;;  %v8439_v49 = vld [vmem:[#allocation8 + $0x9b0] sm:$0xf0] }
 0x16d   :  { %5857 = vmatpush.bf16.msra.mxu1 %v8154_v12  ;;  %5866 = vmatpush.bf16.msra.mxu2 %v8346_v43  ;;  %v8458_v12 = vor.u32 %v10808_v2, %v8455_v28  ;;  %v10876_v43 = vld [vmem:[#allocation8 + $0xbe4] sm:$0xf]  ;;  %v8442_v53 = vor.u32 %v10804_v48, %v8439_v49  ;;  %v8279_v5 = vld [vmem:[#allocation8 + $0x870] sm:$0xf0] }
 0x16e   :  { %v8730_v62 = vor.u32 %v10876_v43, %v8727_v45  ;;  %v10764_v3 = vld [vmem:[#allocation8 + $0x864] sm:$0xf]  ;;  %v8263_v23 = vld [vmem:[#allocation8 + $0x850] sm:$0xf0] }
 0x16f   :  { %5834 = vmatpush.bf16.msrb.mxu3 %v7850_v15  ;;  %v10872_v8 = vld [vmem:[#allocation8 + $0xbc4] sm:$0xf]  ;;  %v8423_v15 = vld [vmem:[#allocation8 + $0x990] sm:$0xf0] }
 0x170   :  { %5846 = vmatpush.bf16.msra.mxu0 %v7994_v60  ;;  %v8567_v60 = vld [vmem:[#allocation8 + $0xab0] sm:$0xf0]  ;;  %v10832_v4 = vld [vmem:[#allocation8 + $0xa84] sm:$0xf] }
 0x171   :  { %5858 = vmatpush.bf16.msra.mxu1 %v8138_v9  ;;  %5867 = vmatpush.bf16.msra.mxu2 %v8330_v61  ;;  %v8711_v9 = vld [vmem:[#allocation8 + $0xbd0] sm:$0xf0]  ;;  %v8570_v16 = vor.u32 %v10836_v41, %v8567_v60  ;;  %v10800_v61 = vld [vmem:[#allocation8 + $0x984] sm:$0xf] }
 0x172   :  { %5835 = vmatmul.bf16.vlgmr.msrb.gmra.mxu3 %v11684_v42  ;;  %v8714_v19 = vor.u32 %v10872_v8, %v8711_v9  ;;  %v10760_v20 = vld [vmem:[#allocation8 + $0x844] sm:$0xf]  ;;  %v8695_v28 = vld [vmem:[#allocation8 + $0xbb0] sm:$0xf0] }
 0x173   :  { %5879 = vmatpush.bf16.msra.mxu3 %v8474_v25  ;;  %v8282_v25 = vor.u32 %v10764_v3, %v8279_v5  ;;  %v10868_v2 = vld [vmem:[#allocation8 + $0xba4] sm:$0xf]  ;;  %v8407_v27 = vld [vmem:[#allocation8 + $0x970] sm:$0xf0]  ;;  %v8266_v35 = vor.u32 %v10760_v20, %v8263_v23 }
 0x174   :  { %5847 = vmatpush.bf16.msra.mxu0 %v7978_v54  ;;  %v8551_v54 = vld [vmem:[#allocation8 + $0xa90] sm:$0xf0]  ;;  %v10796_v31 = vld [vmem:[#allocation8 + $0x964] sm:$0xf]  ;;  %v8698_v33 = vor.u32 %v10868_v2, %v8695_v28  ;;  %v5641_v40 = vpop.f32.mrf.mxu0 }
 0x175   :  { %5859 = vmatpush.bf16.msra.mxu1 %v8122_v30  ;;  %5868 = vmatpush.bf16.msra.mxu2 %v8314_v34  ;;  %v8554_v30 = vor.u32 %v10832_v4, %v8551_v54  ;;  %v10828_v38 = vld [vmem:[#allocation8 + $0xa64] sm:$0xf]  ;;  %v8535_v34 = vld [vmem:[#allocation8 + $0xa70] sm:$0xf0]  ;;  %v8410_v43 = vor.u32 %v10796_v31, %v8407_v27 }
 0x176   :  { %v10756_v52 = vld [vmem:[#allocation8 + $0x824] sm:$0xf]  ;;  %v8247_v45 = vld [vmem:[#allocation8 + $0x830] sm:$0xf0]  ;;  %v8538_v41 = vor.u32 %v10828_v38, %v8535_v34 }
 0x177   :  { %5848 = vmatmul.bf16.vlgmr.msra.gmra.mxu0 %v11690_v6  ;;  %5880 = vmatpush.bf16.msra.mxu3 %v8458_v12  ;;  %v5615_v12 = vpop.f32.mrf.mxu2  ;;  %v8679_v48 = vld [vmem:[#allocation8 + $0xb90] sm:$0xf0]  ;;  %v10792_v60 = vld [vmem:[#allocation8 + $0x944] sm:$0xf] }
 0x178   :  { %5892 = vmatpush.bf16.msrb.mxu0 %v8602_v11  ;;  %v8426_v11 = vor.u32 %v10800_v61, %v8423_v15  ;;  %v5616_v49 = vadd.f32 %v5615_v12, %v5603_v18  ;;  %v8519_v3 = vld [vmem:[#allocation8 + $0xa50] sm:$0xf0]  ;;  %v10752_v8 = vld [vmem:[#allocation8 + $0x804] sm:$0xf]  ;;  %v5628_v18 = vpop.f32.mrf.mxu3 }
 0x179   :  { %5860 = vmatpush.bf16.msra.mxu1 %v8106_v63  ;;  %5869 = vmatpush.bf16.msra.mxu2 %v8298_v56  ;;  %v5604_v63 = vpop.f32.mrf.mxu1  ;;  %v8391_v56 = vld [vmem:[#allocation8 + $0x950] sm:$0xf0]  ;;  %v10908_v15 = vld [vmem:[#allocation8 + $0xce4] sm:$0xf] }
 0x17a   :  { %v8231_v9 = vld [vmem:[#allocation8 + $0x810] sm:$0xf0]  ;;  %v8394_v10 = vor.u32 %v10792_v60, %v8391_v56  ;;  %v5629_v20 = vadd.f32 %v5628_v18, %v5616_v49  ;;  %v10940_v63 = vld [vmem:[#allocation8 + $0xde4] sm:$0xf] }
 0x17b   :  { %5881 = vmatpush.bf16.msra.mxu3 %v8442_v53  ;;  %v8250_v53 = vor.u32 %v10756_v52, %v8247_v45  ;;  %v8663_v61 = vld [vmem:[#allocation8 + $0xb70] sm:$0xf0]  ;;  %v8234_v2 = vor.u32 %v10752_v8, %v8231_v9  ;;  %v10784_v45 = vld [vmem:[#allocation8 + $0x904] sm:$0xf] }
 0x17c   :  { %5893 = vmatpush.bf16.msrb.mxu0 %v8586_v47  ;;  %5861 = vmatmul.bf16.vlgmr.msra.gmra.mxu1 %v11694_v13  ;;  %v10864_v47 = vld [vmem:[#allocation8 + $0xb84] sm:$0xf]  ;;  %v8855_v54 = vld [vmem:[#allocation8 + $0xcf0] sm:$0xf0]  ;;  %v5643_v27 = vpop.f32.mrf.mxu0  ;;  %v11804_v12 = vadd.f32 %v5641_v40, %v5629_v20 }
 0x17d   :  { %5905 = vmatpush.bf16.msrb.mxu1 %v8730_v62  ;;  %5870 = vmatpush.bf16.msra.mxu2 %v8282_v25  ;;  %v10824_v62 = vld [vmem:[#allocation8 + $0xa44] sm:$0xf]  ;;  %v8682_v5 = vor.u32 %v10864_v47, %v8679_v48  ;;  %v8503_v23 = vld [vmem:[#allocation8 + $0xa30] sm:$0xf0]  ;;  %v8858_v38 = vor.u32 %v10908_v15, %v8855_v54 }
 0x17e   :  { %v8522_v4 = vor.u32 %v10824_v62, %v8519_v3  ;;  %v10788_v25 = vld [vmem:[#allocation8 + $0x924] sm:$0xf]  ;;  %v8839_v52 = vld [vmem:[#allocation8 + $0xcd0] sm:$0xf0] }
 0x17f   :  { %5882 = vmatpush.bf16.msra.mxu3 %v8426_v11  ;;  %v10820_v11 = vld [vmem:[#allocation8 + $0xa24] sm:$0xf]  ;;  %v5617_v31 = vpop.f32.mrf.mxu2  ;;  %v8359_v47 = vld [vmem:[#allocation8 + $0x910] sm:$0xf0] }
 0x180   :  { %5894 = vmatpush.bf16.msrb.mxu0 %v8570_v16  ;;  %v10860_v16 = vld [vmem:[#allocation8 + $0xb64] sm:$0xf]  ;;  %v8487_v49 = vld [vmem:[#allocation8 + $0xa10] sm:$0xf0]  ;;  %v5630_v8 = vpop.f32.mrf.mxu3 }
 0x181   :  { %5906 = vmatpush.bf16.msrb.mxu1 %v8714_v19  ;;  %5871 = vmatpush.bf16.msra.mxu2 %v8266_v35  ;;  %v8375_v19 = vld [vmem:[#allocation8 + $0x930] sm:$0xf0]  ;;  %v8666_v28 = vor.u32 %v10860_v16, %v8663_v61  ;;  %v10816_v48 = vld [vmem:[#allocation8 + $0xa04] sm:$0xf] }
 0x182   :  { %v8378_v34 = vor.u32 %v10788_v25, %v8375_v19  ;;  %v8647_v35 = vld [vmem:[#allocation8 + $0xb50] sm:$0xf0]  ;;  %v10972_v56 = vld [vmem:[#allocation8 + $0xee4] sm:$0xf]  ;;  %v8490_v9 = vor.u32 %v10816_v48, %v8487_v49 }
 0x183   :  { %5883 = vmatpush.bf16.msra.mxu3 %v8410_v43  ;;  %v8506_v43 = vor.u32 %v10820_v11, %v8503_v23  ;;  %v9111_v62 = vld [vmem:[#allocation8 + $0xef0] sm:$0xf0]  ;;  %v10900_v16 = vld [vmem:[#allocation8 + $0xca4] sm:$0xf] }
 0x184   :  { %5895 = vmatpush.bf16.msrb.mxu0 %v8554_v30  ;;  %v10856_v30 = vld [vmem:[#allocation8 + $0xb44] sm:$0xf]  ;;  %v8631_v40 = vld [vmem:[#allocation8 + $0xb30] sm:$0xf0]  ;;  %v9114_v15 = vor.u32 %v10972_v56, %v9111_v62 }
 0x185   :  { %5907 = vmatpush.bf16.msrb.mxu1 %v8698_v33  ;;  %5872 = vmatpush.bf16.msra.mxu2 %v8250_v53  ;;  %v10904_v33 = vld [vmem:[#allocation8 + $0xcc4] sm:$0xf]  ;;  %v8650_v60 = vor.u32 %v10856_v30, %v8647_v35  ;;  %v8362_v53 = vor.u32 %v10784_v45, %v8359_v47  ;;  %v8823_v61 = vld [vmem:[#allocation8 + $0xcb0] sm:$0xf0] }
 0x186   :  { %v8842_v3 = vor.u32 %v10904_v33, %v8839_v52  ;;  %v10936_v18 = vld [vmem:[#allocation8 + $0xdc4] sm:$0xf]  ;;  %v9095_v19 = vld [vmem:[#allocation8 + $0xed0] sm:$0xf0]  ;;  %v8826_v20 = vor.u32 %v10900_v16, %v8823_v61 }
 0x187   :  { %5884 = vmatpush.bf16.msra.mxu3 %v8394_v10  ;;  %v10968_v25 = vld [vmem:[#allocation8 + $0xec4] sm:$0xf]  ;;  %v8615_v23 = vld [vmem:[#allocation8 + $0xb10] sm:$0xf0] }
 0x188   :  { %5896 = vmatpush.bf16.msrb.mxu0 %v8538_v41  ;;  %v8983_v41 = vld [vmem:[#allocation8 + $0xdf0] sm:$0xf0]  ;;  %v10848_v11 = vld [vmem:[#allocation8 + $0xb04] sm:$0xf] }
 0x189   :  { %5908 = vmatpush.bf16.msrb.mxu1 %v8682_v5  ;;  %5873 = vmatpush.bf16.msra.mxu2 %v8234_v2  ;;  %v10852_v5 = vld [vmem:[#allocation8 + $0xb24] sm:$0xf]  ;;  %v8986_v10 = vor.u32 %v10940_v63, %v8983_v41  ;;  %v8807_v30 = vld [vmem:[#allocation8 + $0xc90] sm:$0xf0]  ;;  %v8618_v33 = vor.u32 %v10848_v11, %v8615_v23  ;;  %v5654_v56 = vpop.f32.mrf.mxu1 }
 0x18a   :  { %v8634_v54 = vor.u32 %v10852_v5, %v8631_v40  ;;  %v10896_v2 = vld [vmem:[#allocation8 + $0xc84] sm:$0xf]  ;;  %v9239_v27 = vld [vmem:[#allocation8 + $0xff0] sm:$0xf0]  ;;  %v5655_v5 = vadd.f32 %v5654_v56, %v11804_v12 }
 0x18b   :  { %5885 = vmatpush.bf16.msra.mxu3 %v8378_v34  ;;  %v11004_v31 = vld [vmem:[#allocation8 + $0xfe4] sm:$0xf]  ;;  %v8951_v35 = vld [vmem:[#allocation8 + $0xdb0] sm:$0xf0]  ;;  %v8810_v45 = vor.u32 %v10896_v2, %v8807_v30 }
 0x18c   :  { %5897 = vmatpush.bf16.msrb.mxu0 %v8522_v4  ;;  %5874 = vmatmul.bf16.vlgmr.msra.gmra.mxu2 %v11699_v58  ;;  %v8967_v4 = vld [vmem:[#allocation8 + $0xdd0] sm:$0xf0]  ;;  %v10932_v34 = vld [vmem:[#allocation8 + $0xda4] sm:$0xf]  ;;  %v9242_v47 = vor.u32 %v11004_v31, %v9239_v27 }
 0x18d   :  { %5909 = vmatpush.bf16.msrb.mxu1 %v8666_v28  ;;  %5918 = vmatpush.bf16.msrb.mxu2 %v8858_v38  ;;  %v8970_v28 = vor.u32 %v10936_v18, %v8967_v4  ;;  %v9098_v38 = vor.u32 %v10968_v25, %v9095_v19  ;;  %v10964_v52 = vld [vmem:[#allocation8 + $0xea4] sm:$0xf]  ;;  %v8954_v49 = vor.u32 %v10932_v34, %v8951_v35  ;;  %v8791_v63 = vld [vmem:[#allocation8 + $0xc70] sm:$0xf0] }
 0x18e   :  { %v10892_v48 = vld [vmem:[#allocation8 + $0xc64] sm:$0xf]  ;;  %v9063_v8 = vld [vmem:[#allocation8 + $0xe90] sm:$0xf0] }
 0x18f   :  { %5886 = vmatpush.bf16.msra.mxu3 %v8362_v53  ;;  %v11000_v41 = vld [vmem:[#allocation8 + $0xfc4] sm:$0xf]  ;;  %v8935_v53 = vld [vmem:[#allocation8 + $0xd90] sm:$0xf0] }
 0x190   :  { %5898 = vmatpush.bf16.msrb.mxu0 %v8506_v43  ;;  %v9079_v43 = vld [vmem:[#allocation8 + $0xeb0] sm:$0xf0]  ;;  %v10960_v40 = vld [vmem:[#allocation8 + $0xe84] sm:$0xf] }
 0x191   :  { %5910 = vmatpush.bf16.msrb.mxu1 %v8650_v60  ;;  %5919 = vmatpush.bf16.msrb.mxu2 %v8842_v3  ;;  %v9223_v60 = vld [vmem:[#allocation8 + $0xfd0] sm:$0xf0]  ;;  %v9082_v62 = vor.u32 %v10964_v52, %v9079_v43  ;;  %v10928_v3 = vld [vmem:[#allocation8 + $0xd84] sm:$0xf] }
 0x192   :  { %5887 = vmatmul.bf16.vlgmr.msra.gmra.mxu3 %v11702_v1  ;;  %v10888_v16 = vld [vmem:[#allocation8 + $0xc44] sm:$0xf]  ;;  %v8938_v61 = vor.u32 %v10928_v3, %v8935_v53  ;;  %v9207_v4 = vld [vmem:[#allocation8 + $0xfb0] sm:$0xf0] }
 0x193   :  { %5931 = vmatpush.bf16.msrb.mxu3 %v8986_v10  ;;  %v9226_v10 = vor.u32 %v11000_v41, %v9223_v60  ;;  %v10996_v18 = vld [vmem:[#allocation8 + $0xfa4] sm:$0xf]  ;;  %v8919_v19 = vld [vmem:[#allocation8 + $0xd70] sm:$0xf0] }
 0x194   :  { %5899 = vmatpush.bf16.msrb.mxu0 %v8490_v9  ;;  %v8794_v9 = vor.u32 %v10892_v48, %v8791_v63  ;;  %v10924_v25 = vld [vmem:[#allocation8 + $0xd64] sm:$0xf]  ;;  %v9210_v23 = vor.u32 %v10996_v18, %v9207_v4  ;;  %v5693_v30 = vpop.f32.mrf.mxu0  ;;  %v8759_v27 = vld [vmem:[#allocation8 + $0xc30] sm:$0xf0] }
 0x195   :  { %5911 = vmatpush.bf16.msrb.mxu1 %v8634_v54  ;;  %5920 = vmatpush.bf16.msrb.mxu2 %v8826_v20  ;;  %v9066_v54 = vor.u32 %v10960_v40, %v9063_v8  ;;  %v10956_v12 = vld [vmem:[#allocation8 + $0xe64] sm:$0xf]  ;;  %v9047_v20 = vld [vmem:[#allocation8 + $0xe70] sm:$0xf0]  ;;  %v8922_v31 = vor.u32 %v10924_v25, %v8919_v19 }
 0x196   :  { %v10884_v2 = vld [vmem:[#allocation8 + $0xc24] sm:$0xf]  ;;  %v9191_v34 = vld [vmem:[#allocation8 + $0xf90] sm:$0xf0]  ;;  %v9050_v52 = vor.u32 %v10956_v12, %v9047_v20 }
 0x197   :  { %5900 = vmatmul.bf16.vlgmr.msrb.gmra.mxu0 %v11706_v37  ;;  %5932 = vmatpush.bf16.msrb.mxu3 %v8970_v28  ;;  %v5667_v28 = vpop.f32.mrf.mxu2  ;;  %v10920_v43 = vld [vmem:[#allocation8 + $0xd44] sm:$0xf]  ;;  %v9031_v48 = vld [vmem:[#allocation8 + $0xe50] sm:$0xf0] }
 0x198   :  { %5944 = vmatpush.bf16.msra.mxu0 %v9114_v15  ;;  %v8775_v15 = vld [vmem:[#allocation8 + $0xc50] sm:$0xf0]  ;;  %v5668_v35 = vadd.f32 %v5667_v28, %v5655_v5  ;;  %v10880_v41 = vld [vmem:[#allocation8 + $0xc04] sm:$0xf]  ;;  %v5680_v5 = vpop.f32.mrf.mxu3 }
 0x199   :  { %5912 = vmatpush.bf16.msrb.mxu1 %v8618_v33  ;;  %5921 = vmatpush.bf16.msrb.mxu2 %v8810_v45  ;;  %v8778_v11 = vor.u32 %v10888_v16, %v8775_v15  ;;  %v5656_v33 = vpop.f32.mrf.mxu1  ;;  %v8903_v45 = vld [vmem:[#allocation8 + $0xd50] sm:$0xf0]  ;;  %v11036_v53 = vld [vmem:[#allocation8 + $0x10e4] sm:$0xf] }
 0x19a   :  { %v8743_v60 = vld [vmem:[#allocation8 + $0xc10] sm:$0xf0]  ;;  %v8906_v56 = vor.u32 %v10920_v43, %v8903_v45  ;;  %v5681_v16 = vadd.f32 %v5680_v5, %v5668_v35  ;;  %v11068_v33 = vld [vmem:[#allocation8 + $0x11e4] sm:$0xf] }
 0x19b   :  { %5933 = vmatpush.bf16.msrb.mxu3 %v8954_v49  ;;  %v8762_v49 = vor.u32 %v10884_v2, %v8759_v27  ;;  %v9175_v3 = vld [vmem:[#allocation8 + $0xf70] sm:$0xf0]  ;;  %v8746_v18 = vor.u32 %v10880_v41, %v8743_v60  ;;  %v10912_v27 = vld [vmem:[#allocation8 + $0xd04] sm:$0xf] }
 0x19c   :  { %5945 = vmatpush.bf16.msra.mxu0 %v9098_v38  ;;  %5913 = vmatmul.bf16.vlgmr.msrb.gmra.mxu1 %v11708_v39  ;;  %v10992_v38 = vld [vmem:[#allocation8 + $0xf84] sm:$0xf]  ;;  %v9367_v8 = vld [vmem:[#allocation8 + $0x10f0] sm:$0xf0]  ;;  %v5695_v19 = vpop.f32.mrf.mxu0  ;;  %v11811_v28 = vadd.f32 %v5693_v30, %v5681_v16 }
 0x19d   :  { %5957 = vmatpush.bf16.msra.mxu1 %v9242_v47  ;;  %5922 = vmatpush.bf16.msrb.mxu2 %v8794_v9  ;;  %v10952_v47 = vld [vmem:[#allocation8 + $0xe44] sm:$0xf]  ;;  %v9194_v63 = vor.u32 %v10992_v38, %v9191_v34  ;;  %v9015_v15 = vld [vmem:[#allocation8 + $0xe30] sm:$0xf0]  ;;  %v9370_v12 = vor.u32 %v11036_v53, %v9367_v8 }
 0x19e   :  { %v9034_v40 = vor.u32 %v10952_v47, %v9031_v48  ;;  %v10916_v9 = vld [vmem:[#allocation8 + $0xd24] sm:$0xf]  ;;  %v9351_v2 = vld [vmem:[#allocation8 + $0x10d0] sm:$0xf0] }
 0x19f   :  { %5934 = vmatpush.bf16.msrb.mxu3 %v8938_v61  ;;  %v10948_v61 = vld [vmem:[#allocation8 + $0xe24] sm:$0xf]  ;;  %v5669_v25 = vpop.f32.mrf.mxu2  ;;  %v8871_v38 = vld [vmem:[#allocation8 + $0xd10] sm:$0xf0] }
 0x1a0   :  { %5946 = vmatpush.bf16.msra.mxu0 %v9082_v62  ;;  %v10988_v62 = vld [vmem:[#allocation8 + $0xf64] sm:$0xf]  ;;  %v8999_v35 = vld [vmem:[#allocation8 + $0xe10] sm:$0xf0]  ;;  %v5682_v41 = vpop.f32.mrf.mxu3 }
 0x1a1   :  { %5958 = vmatpush.bf16.msra.mxu1 %v9226_v10  ;;  %5923 = vmatpush.bf16.msrb.mxu2 %v8778_v11  ;;  %v8887_v10 = vld [vmem:[#allocation8 + $0xd30] sm:$0xf0]  ;;  %v9178_v4 = vor.u32 %v10988_v62, %v9175_v3  ;;  %v10944_v34 = vld [vmem:[#allocation8 + $0xe04] sm:$0xf] }
 0x1a2   :  { %v8890_v20 = vor.u32 %v10916_v9, %v8887_v10  ;;  %v9159_v11 = vld [vmem:[#allocation8 + $0xf50] sm:$0xf0]  ;;  %v11100_v45 = vld [vmem:[#allocation8 + $0x12e4] sm:$0xf]  ;;  %v9002_v60 = vor.u32 %v10944_v34, %v8999_v35 }
 0x1a3   :  { %5935 = vmatpush.bf16.msrb.mxu3 %v8922_v31  ;;  %v9018_v31 = vor.u32 %v10948_v61, %v9015_v15  ;;  %v9623_v47 = vld [vmem:[#allocation8 + $0x12f0] sm:$0xf0]  ;;  %v11028_v62 = vld [vmem:[#allocation8 + $0x10a4] sm:$0xf] }
 0x1a4   :  { %5947 = vmatpush.bf16.msra.mxu0 %v9066_v54  ;;  %v10984_v54 = vld [vmem:[#allocation8 + $0xf44] sm:$0xf]  ;;  %v9143_v30 = vld [vmem:[#allocation8 + $0xf30] sm:$0xf0]  ;;  %v9626_v53 = vor.u32 %v11100_v45, %v9623_v47 }
 0x1a5   :  { %5959 = vmatpush.bf16.msra.mxu1 %v9210_v23  ;;  %5924 = vmatpush.bf16.msrb.mxu2 %v8762_v49  ;;  %v11032_v23 = vld [vmem:[#allocation8 + $0x10c4] sm:$0xf]  ;;  %v9162_v43 = vor.u32 %v10984_v54, %v9159_v11  ;;  %v8874_v49 = vor.u32 %v10912_v27, %v8871_v38  ;;  %v9335_v3 = vld [vmem:[#allocation8 + $0x10b0] sm:$0xf0] }
 0x1a6   :  { %v9354_v48 = vor.u32 %v11032_v23, %v9351_v2  ;;  %v11064_v5 = vld [vmem:[#allocation8 + $0x11c4] sm:$0xf]  ;;  %v9607_v10 = vld [vmem:[#allocation8 + $0x12d0] sm:$0xf0]  ;;  %v9338_v16 = vor.u32 %v11028_v62, %v9335_v3 }
 0x1a7   :  { %5936 = vmatpush.bf16.msrb.mxu3 %v8906_v56  ;;  %v11096_v9 = vld [vmem:[#allocation8 + $0x12c4] sm:$0xf]  ;;  %v9127_v15 = vld [vmem:[#allocation8 + $0xf10] sm:$0xf0] }
 0x1a8   :  { %5948 = vmatpush.bf16.msra.mxu0 %v9050_v52  ;;  %v9495_v52 = vld [vmem:[#allocation8 + $0x11f0] sm:$0xf0]  ;;  %v10976_v61 = vld [vmem:[#allocation8 + $0xf04] sm:$0xf] }
 0x1a9   :  { %5960 = vmatpush.bf16.msra.mxu1 %v9194_v63  ;;  %5925 = vmatpush.bf16.msrb.mxu2 %v8746_v18  ;;  %v10980_v63 = vld [vmem:[#allocation8 + $0xf24] sm:$0xf]  ;;  %v9498_v56 = vor.u32 %v11068_v33, %v9495_v52  ;;  %v9319_v54 = vld [vmem:[#allocation8 + $0x1090] sm:$0xf0]  ;;  %v9130_v23 = vor.u32 %v10976_v61, %v9127_v15  ;;  %v5706_v45 = vpop.f32.mrf.mxu1 }
 0x1aa   :  { %v9146_v8 = vor.u32 %v10980_v63, %v9143_v30  ;;  %v11024_v18 = vld [vmem:[#allocation8 + $0x1084] sm:$0xf]  ;;  %v9751_v19 = vld [vmem:[#allocation8 + $0x13f0] sm:$0xf0]  ;;  %v5707_v63 = vadd.f32 %v5706_v45, %v11811_v28 }
 0x1ab   :  { %5937 = vmatpush.bf16.msrb.mxu3 %v8890_v20  ;;  %v11132_v25 = vld [vmem:[#allocation8 + $0x13e4] sm:$0xf]  ;;  %v9463_v11 = vld [vmem:[#allocation8 + $0x11b0] sm:$0xf0]  ;;  %v9322_v27 = vor.u32 %v11024_v18, %v9319_v54 }
 0x1ac   :  { %5949 = vmatpush.bf16.msra.mxu0 %v9034_v40  ;;  %5926 = vmatmul.bf16.vlgmr.msrb.gmra.mxu2 %v11722_v29  ;;  %v9479_v40 = vld [vmem:[#allocation8 + $0x11d0] sm:$0xf0]  ;;  %v11060_v20 = vld [vmem:[#allocation8 + $0x11a4] sm:$0xf]  ;;  %v9754_v38 = vor.u32 %v11132_v25, %v9751_v19 }
 0x1ad   :  { %5961 = vmatpush.bf16.msra.mxu1 %v9178_v4  ;;  %5970 = vmatpush.bf16.msra.mxu2 %v9370_v12  ;;  %v9482_v4 = vor.u32 %v11064_v5, %v9479_v40  ;;  %v9610_v12 = vor.u32 %v11096_v9, %v9607_v10  ;;  %v11092_v2 = vld [vmem:[#allocation8 + $0x12a4] sm:$0xf]  ;;  %v9466_v35 = vor.u32 %v11060_v20, %v9463_v11  ;;  %v9303_v33 = vld [vmem:[#allocation8 + $0x1070] sm:$0xf0] }
 0x1ae   :  { %v11020_v34 = vld [vmem:[#allocation8 + $0x1064] sm:$0xf]  ;;  %v9575_v41 = vld [vmem:[#allocation8 + $0x1290] sm:$0xf0] }
 0x1af   :  { %5938 = vmatpush.bf16.msrb.mxu3 %v8874_v49  ;;  %v11128_v52 = vld [vmem:[#allocation8 + $0x13c4] sm:$0xf]  ;;  %v9447_v49 = vld [vmem:[#allocation8 + $0x1190] sm:$0xf0] }
 0x1b0   :  { %5950 = vmatpush.bf16.msra.mxu0 %v9018_v31  ;;  %v9591_v31 = vld [vmem:[#allocation8 + $0x12b0] sm:$0xf0]  ;;  %v11088_v30 = vld [vmem:[#allocation8 + $0x1284] sm:$0xf] }
 0x1b1   :  { %5962 = vmatpush.bf16.msra.mxu1 %v9162_v43  ;;  %5971 = vmatpush.bf16.msra.mxu2 %v9354_v48  ;;  %v9735_v43 = vld [vmem:[#allocation8 + $0x13d0] sm:$0xf0]  ;;  %v9594_v47 = vor.u32 %v11092_v2, %v9591_v31  ;;  %v11056_v48 = vld [vmem:[#allocation8 + $0x1184] sm:$0xf] }
 0x1b2   :  { %5939 = vmatmul.bf16.vlgmr.msrb.gmra.mxu3 %v11720_v22  ;;  %v11016_v62 = vld [vmem:[#allocation8 + $0x1044] sm:$0xf]  ;;  %v9450_v3 = vor.u32 %v11056_v48, %v9447_v49  ;;  %v9719_v40 = vld [vmem:[#allocation8 + $0x13b0] sm:$0xf0] }
 0x1b3   :  { %5983 = vmatpush.bf16.msra.mxu3 %v9498_v56  ;;  %v9738_v56 = vor.u32 %v11128_v52, %v9735_v43  ;;  %v11124_v5 = vld [vmem:[#allocation8 + $0x13a4] sm:$0xf]  ;;  %v9431_v10 = vld [vmem:[#allocation8 + $0x1170] sm:$0xf0] }
 0x1b4   :  { %5951 = vmatpush.bf16.msra.mxu0 %v9002_v60  ;;  %v9306_v60 = vor.u32 %v11020_v34, %v9303_v33  ;;  %v11052_v9 = vld [vmem:[#allocation8 + $0x1164] sm:$0xf]  ;;  %v9722_v15 = vor.u32 %v11124_v5, %v9719_v40  ;;  %v5745_v54 = vpop.f32.mrf.mxu0  ;;  %v9271_v19 = vld [vmem:[#allocation8 + $0x1030] sm:$0xf0] }
 0x1b5   :  { %5963 = vmatpush.bf16.msra.mxu1 %v9146_v8  ;;  %5972 = vmatpush.bf16.msra.mxu2 %v9338_v16  ;;  %v9578_v8 = vor.u32 %v11088_v30, %v9575_v41  ;;  %v11084_v28 = vld [vmem:[#allocation8 + $0x1264] sm:$0xf]  ;;  %v9559_v16 = vld [vmem:[#allocation8 + $0x1270] sm:$0xf0]  ;;  %v9434_v25 = vor.u32 %v11052_v9, %v9431_v10 }
 0x1b6   :  { %v11012_v18 = vld [vmem:[#allocation8 + $0x1024] sm:$0xf]  ;;  %v9703_v20 = vld [vmem:[#allocation8 + $0x1390] sm:$0xf0]  ;;  %v9562_v2 = vor.u32 %v11084_v28, %v9559_v16 }
 0x1b7   :  { %5952 = vmatmul.bf16.vlgmr.msra.gmra.mxu0 %v11726_v51  ;;  %5984 = vmatpush.bf16.msra.mxu3 %v9482_v4  ;;  %v5719_v4 = vpop.f32.mrf.mxu2  ;;  %v11048_v31 = vld [vmem:[#allocation8 + $0x1144] sm:$0xf]  ;;  %v9543_v34 = vld [vmem:[#allocation8 + $0x1250] sm:$0xf0] }
 0x1b8   :  { %5996 = vmatpush.bf16.msrb.mxu0 %v9626_v53  ;;  %v9287_v53 = vld [vmem:[#allocation8 + $0x1050] sm:$0xf0]  ;;  %v5720_v11 = vadd.f32 %v5719_v4, %v5707_v63  ;;  %v11008_v52 = vld [vmem:[#allocation8 + $0x1004] sm:$0xf]  ;;  %v5732_v63 = vpop.f32.mrf.mxu3 }
 0x1b9   :  { %5964 = vmatpush.bf16.msra.mxu1 %v9130_v23  ;;  %5973 = vmatpush.bf16.msra.mxu2 %v9322_v27  ;;  %v9290_v61 = vor.u32 %v11016_v62, %v9287_v53  ;;  %v5708_v23 = vpop.f32.mrf.mxu1  ;;  %v9415_v27 = vld [vmem:[#allocation8 + $0x1150] sm:$0xf0]  ;;  %v11164_v49 = vld [vmem:[#allocation8 + $0x14e4] sm:$0xf] }
 0x1ba   :  { %v9255_v43 = vld [vmem:[#allocation8 + $0x1010] sm:$0xf0]  ;;  %v9418_v45 = vor.u32 %v11048_v31, %v9415_v27  ;;  %v5733_v62 = vadd.f32 %v5732_v63, %v5720_v11  ;;  %v11072_v11 = vld [vmem:[#allocation8 + $0x1204] sm:$0xf] }
 0x1bb   :  { %5985 = vmatpush.bf16.msra.mxu3 %v9466_v35  ;;  %v9274_v35 = vor.u32 %v11012_v18, %v9271_v19  ;;  %v9687_v48 = vld [vmem:[#allocation8 + $0x1370] sm:$0xf0]  ;;  %v9258_v5 = vor.u32 %v11008_v52, %v9255_v43  ;;  %v11160_v18 = vld [vmem:[#allocation8 + $0x14c4] sm:$0xf] }
 0x1bc   :  { %5997 = vmatpush.bf16.msrb.mxu0 %v9610_v12  ;;  %5965 = vmatmul.bf16.vlgmr.msra.gmra.mxu1 %v11730_v55  ;;  %v11120_v12 = vld [vmem:[#allocation8 + $0x1384] sm:$0xf]  ;;  %v9879_v41 = vld [vmem:[#allocation8 + $0x14f0] sm:$0xf0]  ;;  %v5747_v10 = vpop.f32.mrf.mxu0  ;;  %v5746_v28 = vadd.f32 %v5745_v54, %v5733_v62 }
 0x1bd   :  { %6009 = vmatpush.bf16.msrb.mxu1 %v9754_v38  ;;  %5974 = vmatpush.bf16.msra.mxu2 %v9306_v60  ;;  %v11080_v38 = vld [vmem:[#allocation8 + $0x1244] sm:$0xf]  ;;  %v9706_v33 = vor.u32 %v11120_v12, %v9703_v20  ;;  %v9527_v53 = vld [vmem:[#allocation8 + $0x1230] sm:$0xf0]  ;;  %v9882_v16 = vor.u32 %v11164_v49, %v9879_v41 }
 0x1be   :  { %v9546_v30 = vor.u32 %v11080_v38, %v9543_v34  ;;  %v11044_v60 = vld [vmem:[#allocation8 + $0x1124] sm:$0xf]  ;;  %v9863_v4 = vld [vmem:[#allocation8 + $0x14d0] sm:$0xf0] }
 0x1bf   :  { %5986 = vmatpush.bf16.msra.mxu3 %v9450_v3  ;;  %v11076_v3 = vld [vmem:[#allocation8 + $0x1224] sm:$0xf]  ;;  %v5721_v9 = vpop.f32.mrf.mxu2  ;;  %v9383_v20 = vld [vmem:[#allocation8 + $0x1110] sm:$0xf0] }
 0x1c0   :  { %5998 = vmatpush.bf16.msrb.mxu0 %v9594_v47  ;;  %v11116_v47 = vld [vmem:[#allocation8 + $0x1364] sm:$0xf]  ;;  %v9530_v19 = vor.u32 %v11076_v3, %v9527_v53  ;;  %v10007_v27 = vld [vmem:[#allocation8 + $0x15f0] sm:$0xf0] }
 0x1c1   :  { %6010 = vmatpush.bf16.msrb.mxu1 %v9738_v56  ;;  %5975 = vmatpush.bf16.msra.mxu2 %v9290_v61  ;;  %v9399_v56 = vld [vmem:[#allocation8 + $0x1130] sm:$0xf0]  ;;  %v9690_v40 = vor.u32 %v11116_v47, %v9687_v48  ;;  %v11040_v12 = vld [vmem:[#allocation8 + $0x1104] sm:$0xf] }
 0x1c2   :  { %v9402_v61 = vor.u32 %v11044_v60, %v9399_v56  ;;  %v11196_v31 = vld [vmem:[#allocation8 + $0x15e4] sm:$0xf]  ;;  %v10135_v34 = vld [vmem:[#allocation8 + $0x16f0] sm:$0xf0] }
 0x1c3   :  { %5987 = vmatpush.bf16.msra.mxu3 %v9434_v25  ;;  %v5758_v25 = vpop.f32.mrf.mxu1  ;;  %v11228_v54 = vld [vmem:[#allocation8 + $0x16e4] sm:$0xf]  ;;  %v9655_v43 = vld [vmem:[#allocation8 + $0x1330] sm:$0xf0]  ;;  %v10010_v48 = vor.u32 %v11196_v31, %v10007_v27 }
 0x1c4   :  { %5999 = vmatpush.bf16.msrb.mxu0 %v9578_v8  ;;  %v11112_v8 = vld [vmem:[#allocation8 + $0x1344] sm:$0xf]  ;;  %v11818_v23 = vadd.f32 %v5758_v25, %v5746_v28  ;;  %v9847_v63 = vld [vmem:[#allocation8 + $0x14b0] sm:$0xf0] }
 0x1c5   :  { %6011 = vmatpush.bf16.msrb.mxu1 %v9722_v15  ;;  %5976 = vmatpush.bf16.msra.mxu2 %v9274_v35  ;;  %v9671_v15 = vld [vmem:[#allocation8 + $0x1350] sm:$0xf0]  ;;  %v9866_v35 = vor.u32 %v11160_v18, %v9863_v4  ;;  %v11108_v52 = vld [vmem:[#allocation8 + $0x1324] sm:$0xf] }
 0x1c6   :  { %v9674_v38 = vor.u32 %v11112_v8, %v9671_v15  ;;  %v11156_v49 = vld [vmem:[#allocation8 + $0x14a4] sm:$0xf]  ;;  %v9991_v60 = vld [vmem:[#allocation8 + $0x15d0] sm:$0xf0]  ;;  %v9658_v56 = vor.u32 %v11108_v52, %v9655_v43 }
 0x1c7   :  { %5988 = vmatpush.bf16.msra.mxu3 %v9418_v45  ;;  %v5734_v45 = vpop.f32.mrf.mxu3  ;;  %v11192_v41 = vld [vmem:[#allocation8 + $0x15c4] sm:$0xf]  ;;  %v10119_v3 = vld [vmem:[#allocation8 + $0x16d0] sm:$0xf0]  ;;  %v9850_v53 = vor.u32 %v11156_v49, %v9847_v63 }
 0x1c8   :  { %6000 = vmatpush.bf16.msrb.mxu0 %v9562_v2  ;;  %v9511_v2 = vld [vmem:[#allocation8 + $0x1210] sm:$0xf0]  ;;  %v11224_v62 = vld [vmem:[#allocation8 + $0x16c4] sm:$0xf]  ;;  %v9994_v10 = vor.u32 %v11192_v41, %v9991_v60 }
 0x1c9   :  { %6012 = vmatpush.bf16.msrb.mxu1 %v9706_v33  ;;  %5977 = vmatpush.bf16.msra.mxu2 %v9258_v5  ;;  %v9386_v33 = vor.u32 %v11040_v12, %v9383_v20  ;;  %v9514_v47 = vor.u32 %v11072_v11, %v9511_v2  ;;  %v11104_v5 = vld [vmem:[#allocation8 + $0x1304] sm:$0xf]  ;;  %v9831_v28 = vld [vmem:[#allocation8 + $0x1490] sm:$0xf0]  ;;  %v10122_v15 = vor.u32 %v11224_v62, %v10119_v3 }
 0x1ca   :  { %v11152_v8 = vld [vmem:[#allocation8 + $0x1484] sm:$0xf]  ;;  %v9975_v4 = vld [vmem:[#allocation8 + $0x15b0] sm:$0xf0] }
 0x1cb   :  { %5989 = vmatpush.bf16.msra.mxu3 %v9402_v61  ;;  %v5760_v9 = vpop.f32.mrf.mxu1  ;;  %v10263_v61 = vld [vmem:[#allocation8 + $0x17f0] sm:$0xf0]  ;;  %v11188_v18 = vld [vmem:[#allocation8 + $0x15a4] sm:$0xf]  ;;  %v9834_v20 = vor.u32 %v11152_v8, %v9831_v28 }
 0x1cc   :  { %6001 = vmatpush.bf16.msrb.mxu0 %v9546_v30  ;;  %5978 = vmatmul.bf16.vlgmr.msra.gmra.mxu2 %v11754_v17  ;;  %v10138_v30 = vor.u32 %v11228_v54, %v10135_v34  ;;  %v10103_v12 = vld [vmem:[#allocation8 + $0x16b0] sm:$0xf0]  ;;  %v11148_v2 = vld [vmem:[#allocation8 + $0x1464] sm:$0xf]  ;;  %v9978_v31 = vor.u32 %v11188_v18, %v9975_v4 }
 0x1cd   :  { %6013 = vmatpush.bf16.msrb.mxu1 %v9690_v40  ;;  %6022 = vmatpush.bf16.msrb.mxu2 %v9882_v16  ;;  %v9639_v40 = vld [vmem:[#allocation8 + $0x1310] sm:$0xf0]  ;;  %v11260_v16 = vld [vmem:[#allocation8 + $0x17e4] sm:$0xf] }
 0x1ce   :  { %v9642_v25 = vor.u32 %v11104_v5, %v9639_v40  ;;  %v10266_v11 = vor.u32 %v11260_v16, %v10263_v61  ;;  %v9815_v27 = vld [vmem:[#allocation8 + $0x1470] sm:$0xf0]  ;;  %v11216_v52 = vld [vmem:[#allocation8 + $0x1684] sm:$0xf]  ;;  %v11328_v5 = vld [vmem:[#allocation10] sm:$0xf] }
 0x1cf   :  { %5990 = vmatpush.bf16.msra.mxu3 %v9386_v33  ;;  %v10247_v54 = vld [vmem:[#allocation8 + $0x17d0] sm:$0xf0]  ;;  %v9818_v45 = vor.u32 %v11148_v2, %v9815_v27  ;;  %v11212_v3 = vld [vmem:[#allocation8 + $0x1664] sm:$0xf]  ;;  %v1506_v40 = vperm.slane %v11328_v5, 1  ;;  %v5771_v28 = vpop.f32.mrf.mxu2 }
 0x1d0   :  { %6002 = vmatpush.bf16.msrb.mxu0 %v9530_v19  ;;  %v11220_v19 = vld [vmem:[#allocation8 + $0x16a4] sm:$0xf]  ;;  %v9959_v33 = vld [vmem:[#allocation8 + $0x1590] sm:$0xf0] }
 0x1d1   :  { %6014 = vmatpush.bf16.msrb.mxu1 %v9674_v38  ;;  %6023 = vmatpush.bf16.msrb.mxu2 %v9866_v35  ;;  %v11256_v38 = vld [vmem:[#allocation8 + $0x17c4] sm:$0xf]  ;;  %v10106_v34 = vor.u32 %v11220_v19, %v10103_v12  ;;  %v10087_v43 = vld [vmem:[#allocation8 + $0x1690] sm:$0xf0] }
 0x1d2   :  { %5991 = vmatmul.bf16.vlgmr.msra.gmra.mxu3 %v11758_v21  ;;  %v11184_v35 = vld [vmem:[#allocation8 + $0x1584] sm:$0xf]  ;;  %v9799_v63 = vld [vmem:[#allocation8 + $0x1450] sm:$0xf0]  ;;  %v10090_v60 = vor.u32 %v11216_v52, %v10087_v43 }
 0x1d3   :  { %6035 = vmatpush.bf16.msrb.mxu3 %v10010_v48  ;;  %v11144_v48 = vld [vmem:[#allocation8 + $0x1444] sm:$0xf]  ;;  %v9962_v49 = vor.u32 %v11184_v35, %v9959_v33  ;;  %v10231_v41 = vld [vmem:[#allocation8 + $0x17b0] sm:$0xf0] }
 0x1d4   :  { %6003 = vmatpush.bf16.msrb.mxu0 %v9514_v47  ;;  %v10250_v47 = vor.u32 %v11256_v38, %v10247_v54  ;;  %v9943_v62 = vld [vmem:[#allocation8 + $0x1570] sm:$0xf0]  ;;  %v9802_v8 = vor.u32 %v11144_v48, %v9799_v63  ;;  %v5797_v16 = vpop.f32.mrf.mxu0  ;;  %v11248_v18 = vld [vmem:[#allocation8 + $0x1784] sm:$0xf]  ;;  %v5772_v54 = vadd.f32 %v5771_v28, %v1506_v40 }
 0x1d5   :  { %6015 = vmatpush.bf16.msrb.mxu1 %v9658_v56  ;;  %6024 = vmatpush.bf16.msrb.mxu2 %v9850_v53  ;;  %v11180_v56 = vld [vmem:[#allocation8 + $0x1564] sm:$0xf]  ;;  %v10071_v53 = vld [vmem:[#allocation8 + $0x1670] sm:$0xf0]  ;;  %v5784_v43 = vpop.f32.mrf.mxu3 }
 0x1d6   :  { %v9946_v61 = vor.u32 %v11180_v56, %v9943_v62  ;;  %v10215_v4 = vld [vmem:[#allocation8 + $0x1790] sm:$0xf0]  ;;  %v11176_v19 = vld [vmem:[#allocation8 + $0x1544] sm:$0xf]  ;;  %v5785_v63 = vadd.f32 %v5784_v43, %v5772_v54 }
 0x1d7   :  { %6004 = vmatmul.bf16.vlgmr.msrb.gmra.mxu0 %v11762_v50  ;;  %6036 = vmatpush.bf16.msrb.mxu3 %v9994_v10  ;;  %v11140_v10 = vld [vmem:[#allocation8 + $0x1424] sm:$0xf]  ;;  %v9927_v12 = vld [vmem:[#allocation8 + $0x1550] sm:$0xf0]  ;;  %v5773_v5 = vpop.f32.mrf.mxu2 }
 0x1d8   :  { %6048 = vmatpush.bf16.msra.mxu0 %v10138_v30  ;;  %v11252_v30 = vld [vmem:[#allocation8 + $0x17a4] sm:$0xf]  ;;  %v9767_v38 = vld [vmem:[#allocation8 + $0x1410] sm:$0xf0] }
 0x1d9   :  { %6016 = vmatpush.bf16.msrb.mxu1 %v9642_v25  ;;  %6025 = vmatpush.bf16.msrb.mxu2 %v9834_v20  ;;  %v10234_v9 = vor.u32 %v11252_v30, %v10231_v41  ;;  %v10074_v25 = vor.u32 %v11212_v3, %v10071_v53  ;;  %v11208_v20 = vld [vmem:[#allocation8 + $0x1644] sm:$0xf]  ;;  %v10199_v33 = vld [vmem:[#allocation8 + $0x1770] sm:$0xf0]  ;;  %v5810_v30 = vpop.f32.mrf.mxu1  ;;  %v5798_v53 = vadd.f32 %v5797_v16, %v5785_v63  ;;  %v10523_v63 = vld [vmem:[#allocation8 + $0xd4] sm:$0xf0] }
 0x1da   :  { %v11136_v27 = vld [vmem:[#allocation8 + $0x1404] sm:$0xf]  ;;  %v10279_v5 = vld [vmem:[#allocation8 + $0x1810] sm:$0xf0] }
 0x1db   :  { %6037 = vmatpush.bf16.msrb.mxu3 %v9978_v31  ;;  %v10218_v31 = vor.u32 %v11248_v18, %v10215_v4  ;;  %v11244_v35 = vld [vmem:[#allocation8 + $0x1764] sm:$0xf]  ;;  %v9770_v56 = vor.u32 %v11136_v27, %v9767_v38  ;;  %v9895_v4 = vld [vmem:[#allocation8 + $0x1510] sm:$0xf0] }
 0x1dc   :  { %6049 = vmatpush.bf16.msra.mxu0 %v10122_v15  ;;  %6017 = vmatmul.bf16.vlgmr.msrb.gmra.mxu1 %v11764_v59  ;;  %v9783_v15 = vld [vmem:[#allocation8 + $0x1430] sm:$0xf0]  ;;  %v11276_v52 = vld [vmem:[#allocation8 + $0x1864] sm:$0xf]  ;;  %v10202_v62 = vor.u32 %v11244_v35, %v10199_v33  ;;  %v5799_v40 = vpop.f32.mrf.mxu0 }
 0x1dd   :  { %6061 = vmatpush.bf16.msra.mxu1 %v10266_v11  ;;  %6026 = vmatpush.bf16.msrb.mxu2 %v9818_v45  ;;  %v10055_v11 = vld [vmem:[#allocation8 + $0x1650] sm:$0xf0]  ;;  %v9786_v2 = vor.u32 %v11140_v10, %v9783_v15  ;;  %v11172_v48 = vld [vmem:[#allocation8 + $0x1524] sm:$0xf]  ;;  %v5786_v35 = vpop.f32.mrf.mxu3 }
 0x1de   :  { %v10058_v45 = vor.u32 %v11208_v20, %v10055_v11  ;;  %v11204_v41 = vld [vmem:[#allocation8 + $0x1624] sm:$0xf]  ;;  %v10183_v10 = vld [vmem:[#allocation8 + $0x1750] sm:$0xf0]  ;;  %v7325_v20 = vld [vmem:[#allocation8 + $0xe8] sm:$0xf] }
 0x1df   :  { %6038 = vmatpush.bf16.msrb.mxu3 %v9962_v49  ;;  %v9911_v49 = vld [vmem:[#allocation8 + $0x1530] sm:$0xf0]  ;;  %v11240_v3 = vld [vmem:[#allocation8 + $0x1744] sm:$0xf]  ;;  %v10527_v11 = vld [vmem:[#allocation8 + $0xf4] sm:$0xf0] }
 0x1e0   :  { %6050 = vmatpush.bf16.msra.mxu0 %v10106_v34  ;;  %v9930_v34 = vor.u32 %v11176_v19, %v9927_v12  ;;  %v11272_v28 = vld [vmem:[#allocation8 + $0x1844] sm:$0xf]  ;;  %v11824_v19 = vadd.f32 %v5810_v30, %v5798_v53  ;;  %v10023_v12 = vld [vmem:[#allocation8 + $0x1610] sm:$0xf0]  ;;  %v10186_v16 = vor.u32 %v11240_v3, %v10183_v10  ;;  %v7709_v10 = vld [vmem:[#allocation8 + $0x3e8] sm:$0xf] }
 0x1e1   :  { %6062 = vmatpush.bf16.msra.mxu1 %v10250_v47  ;;  %6027 = vmatpush.bf16.msrb.mxu2 %v9802_v8  ;;  %v10327_v47 = vld [vmem:[#allocation8 + $0x1870] sm:$0xf0]  ;;  %v11168_v18 = vld [vmem:[#allocation8 + $0x1504] sm:$0xf]  ;;  %v7277_v35 = vld [vmem:[#allocation8 + $0x88] sm:$0xf] }
 0x1e2   :  { %v10330_v8 = vor.u32 %v11276_v52, %v10327_v47  ;;  %v9898_v38 = vor.u32 %v11168_v18, %v9895_v4  ;;  %v11236_v54 = vld [vmem:[#allocation8 + $0x1724] sm:$0xf]  ;;  %v7326_v52 = vor.u32 %v10527_v11, %v7325_v20  ;;  %v5812_v47 = vpop.f32.mrf.mxu1  ;;  %v10151_v3 = vld [vmem:[#allocation8 + $0x1710] sm:$0xf0]  ;;  %v10519_v18 = vld [vmem:[#allocation8 + $0xb4] sm:$0xf0] }
 0x1e3   :  { %6039 = vmatpush.bf16.msrb.mxu3 %v9946_v61  ;;  %v10311_v61 = vld [vmem:[#allocation8 + $0x1850] sm:$0xf0]  ;;  %v11268_v43 = vld [vmem:[#allocation8 + $0x1824] sm:$0xf] }
 0x1e4   :  { %6051 = vmatpush.bf16.msra.mxu0 %v10090_v60  ;;  %v10039_v60 = vld [vmem:[#allocation8 + $0x1630] sm:$0xf0]  ;;  %v10314_v27 = vor.u32 %v11272_v28, %v10311_v61  ;;  %v11264_v53 = vld [vmem:[#allocation8 + $0x1804] sm:$0xf]  ;;  %v10623_v61 = vld [vmem:[#allocation8 + $0x3f4] sm:$0xf0] }
 0x1e5   :  { %6063 = vmatpush.bf16.msra.mxu1 %v10234_v9  ;;  %6028 = vmatpush.bf16.msrb.mxu2 %v9786_v2  ;;  %v9914_v9 = vor.u32 %v11172_v48, %v9911_v49  ;;  %v10042_v15 = vor.u32 %v11204_v41, %v10039_v60  ;;  %v7453_v2 = vld [vmem:[#allocation8 + $0x1e8] sm:$0xf]  ;;  %v10555_v60 = vld [vmem:[#allocation8 + $0x1d4] sm:$0xf0]  ;;  %v10282_v20 = vor.u32 %v11264_v53, %v10279_v5 }
 0x1e6   :  { %v7309_v49 = vld [vmem:[#allocation8 + $0xc8] sm:$0xf]  ;;  %v10543_v53 = vld [vmem:[#allocation8 + $0x174] sm:$0xf0] }
 0x1e7   :  { %6040 = vmatpush.bf16.msrb.mxu3 %v9930_v34  ;;  %v10167_v34 = vld [vmem:[#allocation8 + $0x1730] sm:$0xf0]  ;;  %v7437_v41 = vld [vmem:[#allocation8 + $0x1c8] sm:$0xf]  ;;  %v7310_v40 = vor.u32 %v10523_v63, %v7309_v49  ;;  %v10583_v63 = vld [vmem:[#allocation8 + $0x2b4] sm:$0xf0] }
 0x1e8   :  { %6052 = vmatpush.bf16.msra.mxu0 %v10074_v25  ;;  %v11200_v25 = vld [vmem:[#allocation8 + $0x1604] sm:$0xf]  ;;  %v10170_v30 = vor.u32 %v11236_v54, %v10167_v34  ;;  %v7438_v28 = vor.u32 %v10555_v60, %v7437_v41  ;;  %v10619_v34 = vld [vmem:[#allocation8 + $0x3d4] sm:$0xf0]  ;;  %v7549_v49 = vld [vmem:[#allocation8 + $0x2a8] sm:$0xf] }
 0x1e9   :  { %6064 = vmatpush.bf16.msra.mxu1 %v10218_v31  ;;  %6029 = vmatpush.bf16.msrb.mxu2 %v9770_v56  ;;  %v10559_v31 = vld [vmem:[#allocation8 + $0x1f4] sm:$0xf0]  ;;  %v10026_v33 = vor.u32 %v11200_v25, %v10023_v12  ;;  %v11232_v56 = vld [vmem:[#allocation8 + $0x1704] sm:$0xf]  ;;  %v7421_v25 = vld [vmem:[#allocation8 + $0x1a8] sm:$0xf]  ;;  %v7550_v5 = vor.u32 %v10583_v63, %v7549_v49 }
 0x1ea   :  { %v7454_v48 = vor.u32 %v10559_v31, %v7453_v2  ;;  %v10154_v4 = vor.u32 %v11232_v56, %v10151_v3  ;;  %v10551_v12 = vld [vmem:[#allocation8 + $0x1b4] sm:$0xf0]  ;;  %v7565_v31 = vld [vmem:[#allocation8 + $0x2c8] sm:$0xf] }
 0x1eb   :  { %6041 = vmatpush.bf16.msrb.mxu3 %v9914_v9  ;;  %v10591_v9 = vld [vmem:[#allocation8 + $0x2f4] sm:$0xf0]  ;;  %v7422_v54 = vor.u32 %v10551_v12, %v7421_v25  ;;  %v7261_v56 = vld [vmem:[#allocation8 + $0x68] sm:$0xf] }
 0x1ec   :  { %6053 = vmatpush.bf16.msra.mxu0 %v10058_v45  ;;  %v10295_v45 = vld [vmem:[#allocation8 + $0x1830] sm:$0xf0]  ;;  %6030 = vmatmul.bf16.vlgmr.msrb.gmra.mxu2 %v11776_v7  ;;  %v10615_v60 = vld [vmem:[#allocation8 + $0x3b4] sm:$0xf0]  ;;  %v7389_v3 = vld [vmem:[#allocation8 + $0x168] sm:$0xf] }
 0x1ed   :  { %6065 = vmatpush.bf16.msra.mxu1 %v10202_v62  ;;  %6078 = vmatpush.bf16.msra.mxu2 %v10330_v8  ;;  %v10298_v62 = vor.u32 %v11268_v43, %v10295_v45  ;;  %v7581_v8 = vld [vmem:[#allocation8 + $0x2e8] sm:$0xf]  ;;  %v10547_v43 = vld [vmem:[#allocation8 + $0x194] sm:$0xf0] }
 0x1ee   :  { %v7582_v11 = vor.u32 %v10591_v9, %v7581_v8  ;;  %v10611_v25 = vld [vmem:[#allocation8 + $0x394] sm:$0xf0]  ;;  %v7245_v12 = vld [vmem:[#allocation8 + $0x48] sm:$0xf] }
 0x1ef   :  { %6042 = vmatpush.bf16.msrb.mxu3 %v9898_v38  ;;  %v7693_v38 = vld [vmem:[#allocation8 + $0x3c8] sm:$0xf]  ;;  %v10535_v49 = vld [vmem:[#allocation8 + $0x134] sm:$0xf0] }
 0x1f0   :  { %6054 = vmatpush.bf16.msra.mxu0 %v10042_v15  ;;  %v7293_v15 = vld [vmem:[#allocation8 + $0xa8] sm:$0xf]  ;;  %v7694_v47 = vor.u32 %v10619_v34, %v7693_v38 }
 0x1f1   :  { %6066 = vmatpush.bf16.msra.mxu1 %v10186_v16  ;;  %6079 = vmatpush.bf16.msra.mxu2 %v10314_v27  ;;  %v7710_v16 = vor.u32 %v10623_v61, %v7709_v10  ;;  %v7294_v2 = vor.u32 %v10519_v18, %v7293_v15  ;;  %v10587_v27 = vld [vmem:[#allocation8 + $0x2d4] sm:$0xf0]  ;;  %v7661_v15 = vld [vmem:[#allocation8 + $0x388] sm:$0xf] }
 0x1f2   :  { %6043 = vmatmul.bf16.vlgmr.msrb.gmra.mxu3 %v11778_v14  ;;  %v7566_v45 = vor.u32 %v10587_v27, %v7565_v31  ;;  %v10579_v61 = vld [vmem:[#allocation8 + $0x294] sm:$0xf0]  ;;  %v7662_v31 = vor.u32 %v10611_v25, %v7661_v15  ;;  %v7517_v38 = vld [vmem:[#allocation8 + $0x268] sm:$0xf] }
 0x1f3   :  { %6087 = vmatpush.bf16.msra.mxu3 %v7326_v52  ;;  %v7405_v52 = vld [vmem:[#allocation8 + $0x188] sm:$0xf]  ;;  %v10655_v25 = vld [vmem:[#allocation8 + $0x4f4] sm:$0xf0] }
 0x1f4   :  { %6055 = vmatpush.bf16.msra.mxu0 %v10026_v33  ;;  %v10515_v33 = vld [vmem:[#allocation8 + $0x94] sm:$0xf0]  ;;  %v7406_v41 = vor.u32 %v10547_v43, %v7405_v52  ;;  %v5849_v8 = vpop.f32.mrf.mxu0  ;;  %v7645_v34 = vld [vmem:[#allocation8 + $0x368] sm:$0xf] }
 0x1f5   :  { %6067 = vmatpush.bf16.msra.mxu1 %v10170_v30  ;;  %6080 = vmatpush.bf16.msra.mxu2 %v10298_v62  ;;  %v7677_v30 = vld [vmem:[#allocation8 + $0x3a8] sm:$0xf]  ;;  %v10511_v62 = vld [vmem:[#allocation8 + $0x74] sm:$0xf0] }
 0x1f6   :  { %v7678_v9 = vor.u32 %v10615_v60, %v7677_v30  ;;  %v7262_v10 = vor.u32 %v10511_v62, %v7261_v56  ;;  %v7229_v52 = vld [vmem:[#allocation8 + $0x28] sm:$0xf]  ;;  %v10503_v43 = vld [vmem:[#allocation8 + $0x34] sm:$0xf0] }
 0x1f7   :  { %6056 = vmatmul.bf16.vlgmr.msra.gmra.mxu0 %v11782_v44  ;;  %6088 = vmatpush.bf16.msra.mxu3 %v7310_v40  ;;  %v5823_v40 = vpop.f32.mrf.mxu2  ;;  %v7501_v30 = vld [vmem:[#allocation8 + $0x248] sm:$0xf] }
 0x1f8   :  { %6100 = vmatpush.bf16.msrb.mxu0 %v7454_v48  ;;  %v7278_v48 = vor.u32 %v10515_v33, %v7277_v35  ;;  %v5824_v18 = vadd.f32 %v5823_v40, %v11824_v19  ;;  %v5836_v19 = vpop.f32.mrf.mxu3  ;;  %v10607_v33 = vld [vmem:[#allocation8 + $0x374] sm:$0xf0] }
 0x1f9   :  { %6068 = vmatpush.bf16.msra.mxu1 %v10154_v4  ;;  %6081 = vmatpush.bf16.msra.mxu2 %v10282_v20  ;;  %v7390_v4 = vor.u32 %v10543_v53, %v7389_v3  ;;  %v10507_v20 = vld [vmem:[#allocation8 + $0x54] sm:$0xf0]  ;;  %v7646_v62 = vor.u32 %v10607_v33, %v7645_v34  ;;  %v7230_v3 = vor.u32 %v10503_v43, %v7229_v52  ;;  %v7613_v34 = vld [vmem:[#allocation8 + $0x328] sm:$0xf] }
 0x1fa   :  { %v7246_v27 = vor.u32 %v10507_v20, %v7245_v12  ;;  %v10571_v53 = vld [vmem:[#allocation8 + $0x254] sm:$0xf0]  ;;  %v7965_v12 = vld [vmem:[#allocation8 + $0x5e8] sm:$0xf] }
 0x1fb   :  { %6089 = vmatpush.bf16.msra.mxu3 %v7294_v2  ;;  %v10603_v40 = vld [vmem:[#allocation8 + $0x354] sm:$0xf0]  ;;  %v7821_v52 = vld [vmem:[#allocation8 + $0x4c8] sm:$0xf] }
 0x1fc   :  { %6101 = vmatpush.bf16.msrb.mxu0 %v7438_v28  ;;  %6069 = vmatmul.bf16.vlgmr.msra.gmra.mxu1 %v11784_v24  ;;  %v7533_v28 = vld [vmem:[#allocation8 + $0x288] sm:$0xf]  ;;  %v5851_v56 = vpop.f32.mrf.mxu0  ;;  %v10687_v20 = vld [vmem:[#allocation8 + $0x5f4] sm:$0xf0] }
 0x1fd   :  { %6113 = vmatpush.bf16.msrb.mxu1 %v7582_v11  ;;  %6126 = vmatpush.bf16.msrb.mxu2 %v7710_v16  ;;  %v7373_v11 = vld [vmem:[#allocation8 + $0x148] sm:$0xf]  ;;  %v10539_v16 = vld [vmem:[#allocation8 + $0x154] sm:$0xf0]  ;;  %v7534_v2 = vor.u32 %v10579_v61, %v7533_v28  ;;  %v7966_v33 = vor.u32 %v10687_v20, %v7965_v12 }
 0x1fe   :  { %10340 = vmatmul.msk.bf16.vlgmr.msra.gmra.mxu2 %vm5433_vm1, %v11789_v46  ;;  %v7374_v35 = vor.u32 %v10539_v16, %v7373_v11  ;;  %v10499_v28 = vld [vmem:[#allocation8 + $0x14] sm:$0xf0]  ;;  %v7341_v61 = vld [vmem:[#allocation8 + $0x108] sm:$0xf] }
 0x1ff   :  { %6090 = vmatpush.bf16.msra.mxu3 %v7278_v48  ;;  %v7357_v48 = vld [vmem:[#allocation8 + $0x128] sm:$0xf]  ;;  %v5825_v60 = vpop.f32.mrf.mxu2  ;;  %v10651_v43 = vld [vmem:[#allocation8 + $0x4d4] sm:$0xf0] }
 0x200   :  { %6102 = vmatpush.bf16.msrb.mxu0 %v7422_v54  ;;  %v10575_v54 = vld [vmem:[#allocation8 + $0x274] sm:$0xf0]  ;;  %v7822_v56 = vor.u32 %v10651_v43, %v7821_v52  ;;  %v8077_v20 = vld [vmem:[#allocation8 + $0x6c8] sm:$0xf] }
 0x201   :  { %6114 = vmatpush.bf16.msrb.mxu1 %v7566_v45  ;;  %6127 = vmatpush.bf16.msrb.mxu2 %v7694_v47  ;;  %v5837_v45 = vadd.f32 %v5836_v19, %v5824_v18  ;;  %v5862_v47 = vpop.f32.mrf.mxu1  ;;  %v7518_v63 = vor.u32 %v10575_v54, %v7517_v38  ;;  %v10531_v18 = vld [vmem:[#allocation8 + $0x114] sm:$0xf0]  ;;  %v8061_v52 = vld [vmem:[#allocation8 + $0x6a8] sm:$0xf] }
 0x202   :  { %v7342_v38 = vor.u32 %v10531_v18, %v7341_v61  ;;  %v10599_v19 = vld [vmem:[#allocation8 + $0x334] sm:$0xf0]  ;;  %v7933_v61 = vld [vmem:[#allocation8 + $0x5a8] sm:$0xf] }
 0x203   :  { %6091 = vmatpush.bf16.msra.mxu3 %v7262_v10  ;;  %v7213_v10 = vld [vmem:[#allocation8 + $0x8] sm:$0xf]  ;;  %v10595_v60 = vld [vmem:[#allocation8 + $0x314] sm:$0xf0] }
 0x204   :  { %6103 = vmatpush.bf16.msrb.mxu0 %v7406_v41  ;;  %v5850_v41 = vadd.f32 %v5849_v8, %v5837_v45  ;;  %v7502_v8 = vor.u32 %v10571_v53, %v7501_v30  ;;  %v7214_v16 = vor.u32 %v10499_v28, %v7213_v10  ;;  %v10563_v30 = vld [vmem:[#allocation8 + $0x214] sm:$0xf0]  ;;  %v8221_v53 = vld [vmem:[#allocation8 + $0x7e8] sm:$0xf] }
 0x205   :  { %6115 = vmatpush.bf16.msrb.mxu1 %v7550_v5  ;;  %6128 = vmatpush.bf16.msrb.mxu2 %v7678_v9  ;;  %v7629_v5 = vld [vmem:[#allocation8 + $0x348] sm:$0xf]  ;;  %v7358_v9 = vor.u32 %v10535_v49, %v7357_v48  ;;  %v10683_v48 = vld [vmem:[#allocation8 + $0x5d4] sm:$0xf0] }
 0x206   :  { %v11833_v15 = vadd.f32 %v5862_v47, %v5850_v41  ;;  %v7630_v11 = vor.u32 %v10603_v40, %v7629_v5  ;;  %v7949_v47 = vld [vmem:[#allocation8 + $0x5c8] sm:$0xf]  ;;  %v10751_v40 = vld [vmem:[#allocation8 + $0x7f4] sm:$0xf0] }
 0x207   :  { %6092 = vmatpush.bf16.msra.mxu3 %v7246_v27  ;;  %v5838_v27 = vpop.f32.mrf.mxu3  ;;  %v7469_v49 = vld [vmem:[#allocation8 + $0x208] sm:$0xf]  ;;  %v7950_v5 = vor.u32 %v10683_v48, %v7949_v47  ;;  %v10647_v10 = vld [vmem:[#allocation8 + $0x4b4] sm:$0xf0] }
 0x208   :  { %6104 = vmatpush.bf16.msrb.mxu0 %v7390_v4  ;;  %v7837_v4 = vld [vmem:[#allocation8 + $0x4e8] sm:$0xf]  ;;  %v7470_v28 = vor.u32 %v10563_v30, %v7469_v49  ;;  %v10679_v18 = vld [vmem:[#allocation8 + $0x5b4] sm:$0xf0] }
 0x209   :  { %6116 = vmatpush.bf16.msrb.mxu1 %v7534_v2  ;;  %6129 = vmatpush.bf16.msrb.mxu2 %v7662_v31  ;;  %v7485_v2 = vld [vmem:[#allocation8 + $0x228] sm:$0xf]  ;;  %v10567_v31 = vld [vmem:[#allocation8 + $0x234] sm:$0xf0]  ;;  %v7838_v54 = vor.u32 %v10655_v25, %v7837_v4 }
 0x20a   :  { %v7486_v45 = vor.u32 %v10567_v31, %v7485_v2  ;;  %v7597_v41 = vld [vmem:[#allocation8 + $0x308] sm:$0xf]  ;;  %v7934_v2 = vor.u32 %v10679_v18, %v7933_v61  ;;  %v10747_v31 = vld [vmem:[#allocation8 + $0x7d4] sm:$0xf0] }
 0x20b   :  { %6093 = vmatpush.bf16.msra.mxu3 %v7230_v3  ;;  %v10719_v3 = vld [vmem:[#allocation8 + $0x6f4] sm:$0xf0]  ;;  %v7598_v4 = vor.u32 %v10595_v60, %v7597_v41  ;;  %v7789_v27 = vld [vmem:[#allocation8 + $0x488] sm:$0xf] }
 0x20c   :  { %6105 = vmatpush.bf16.msrb.mxu0 %v7374_v35  ;;  %v5864_v35 = vpop.f32.mrf.mxu1  ;;  %v10711_v43 = vld [vmem:[#allocation8 + $0x6b4] sm:$0xf0]  ;;  %v7773_v49 = vld [vmem:[#allocation8 + $0x468] sm:$0xf] }
 0x20d   :  { %6117 = vmatpush.bf16.msrb.mxu1 %v7518_v63  ;;  %6130 = vmatpush.bf16.msrb.mxu2 %v7646_v62  ;;  %v7614_v63 = vor.u32 %v10599_v19, %v7613_v34  ;;  %v8093_v62 = vld [vmem:[#allocation8 + $0x6e8] sm:$0xf]  ;;  %v10675_v34 = vld [vmem:[#allocation8 + $0x594] sm:$0xf0]  ;;  %v8062_v60 = vor.u32 %v10711_v43, %v8061_v52 }
 0x20e   :  { %v8094_v25 = vor.u32 %v10719_v3, %v8093_v62  ;;  %v10743_v48 = vld [vmem:[#allocation8 + $0x7b4] sm:$0xf0]  ;;  %v7901_v30 = vld [vmem:[#allocation8 + $0x568] sm:$0xf] }
 0x20f   :  { %6094 = vmatpush.bf16.msra.mxu3 %v7214_v16  ;;  %v8205_v16 = vld [vmem:[#allocation8 + $0x7c8] sm:$0xf]  ;;  %v10671_v41 = vld [vmem:[#allocation8 + $0x574] sm:$0xf0] }
 0x210   :  { %6106 = vmatpush.bf16.msrb.mxu0 %v7358_v9  ;;  %v7805_v9 = vld [vmem:[#allocation8 + $0x4a8] sm:$0xf]  ;;  %v8206_v35 = vor.u32 %v10747_v31, %v8205_v16  ;;  %v10739_v61 = vld [vmem:[#allocation8 + $0x794] sm:$0xf0] }
 0x211   :  { %6118 = vmatpush.bf16.msrb.mxu1 %v7502_v8  ;;  %6131 = vmatpush.bf16.msrb.mxu2 %v7630_v11  ;;  %v8222_v8 = vor.u32 %v10751_v40, %v8221_v53  ;;  %v7806_v12 = vor.u32 %v10647_v10, %v7805_v9  ;;  %v10715_v11 = vld [vmem:[#allocation8 + $0x6d4] sm:$0xf0]  ;;  %v8173_v9 = vld [vmem:[#allocation8 + $0x788] sm:$0xf] }
 0x212   :  { %6095 = vmatmul.bf16.vlgmr.msra.gmra.mxu3 %v11666_v26  ;;  %v8078_v19 = vor.u32 %v10715_v11, %v8077_v20  ;;  %v10707_v40 = vld [vmem:[#allocation8 + $0x694] sm:$0xf0]  ;;  %v7757_v18 = vld [vmem:[#allocation8 + $0x448] sm:$0xf]  ;;  %v8174_v20 = vor.u32 %v10739_v61, %v8173_v9 }
 0x213   :  { %6139 = vmatpush.bf16.msrb.mxu3 %v7838_v54  ;;  %v7917_v54 = vld [vmem:[#allocation8 + $0x588] sm:$0xf]  ;;  %v10663_v52 = vld [vmem:[#allocation8 + $0x534] sm:$0xf0] }
 0x214   :  { %6107 = vmatpush.bf16.msrb.mxu0 %v7342_v38  ;;  %v10643_v38 = vld [vmem:[#allocation8 + $0x494] sm:$0xf0]  ;;  %v7918_v47 = vor.u32 %v10675_v34, %v7917_v54  ;;  %v5901_v62 = vpop.f32.mrf.mxu0  ;;  %v8029_v16 = vld [vmem:[#allocation8 + $0x668] sm:$0xf] }
 0x215   :  { %6119 = vmatpush.bf16.msrb.mxu1 %v7486_v45  ;;  %6132 = vmatpush.bf16.msrb.mxu2 %v7614_v63  ;;  %v8189_v45 = vld [vmem:[#allocation8 + $0x7a8] sm:$0xf]  ;;  %v10639_v63 = vld [vmem:[#allocation8 + $0x474] sm:$0xf0] }
 0x216   :  { %v8190_v3 = vor.u32 %v10743_v48, %v8189_v45  ;;  %v7774_v53 = vor.u32 %v10639_v63, %v7773_v49  ;;  %v8157_v31 = vld [vmem:[#allocation8 + $0x768] sm:$0xf]  ;;  %v10631_v34 = vld [vmem:[#allocation8 + $0x434] sm:$0xf0] }
 0x217   :  { %6108 = vmatmul.bf16.vlgmr.msrb.gmra.mxu0 %v11668_v32  ;;  %6140 = vmatpush.bf16.msrb.mxu3 %v7822_v56  ;;  %v5875_v56 = vpop.f32.mrf.mxu2  ;;  %v7741_v54 = vld [vmem:[#allocation8 + $0x428] sm:$0xf]  ;;  %v10783_v61 = vld [vmem:[#allocation8 + $0x8f4] sm:$0xf0] }
 0x218   :  { %6152 = vmatpush.bf16.msra.mxu0 %v7966_v33  ;;  %v7790_v33 = vor.u32 %v10643_v38, %v7789_v27  ;;  %v5876_v10 = vadd.f32 %v5875_v56, %v11833_v15  ;;  %v5888_v27 = vpop.f32.mrf.mxu3  ;;  %v10735_v15 = vld [vmem:[#allocation8 + $0x774] sm:$0xf0]  ;;  %v8013_v45 = vld [vmem:[#allocation8 + $0x648] sm:$0xf] }
 0x219   :  { %6120 = vmatpush.bf16.msrb.mxu1 %v7470_v28  ;;  %6133 = vmatpush.bf16.msrb.mxu2 %v7598_v4  ;;  %v7902_v28 = vor.u32 %v10671_v41, %v7901_v30  ;;  %v10635_v4 = vld [vmem:[#allocation8 + $0x454] sm:$0xf0]  ;;  %v8158_v63 = vor.u32 %v10735_v15, %v8157_v31  ;;  %v7742_v30 = vor.u32 %v10631_v34, %v7741_v54  ;;  %v8125_v31 = vld [vmem:[#allocation8 + $0x728] sm:$0xf] }
 0x21a   :  { %v7758_v11 = vor.u32 %v10635_v4, %v7757_v18  ;;  %v10699_v41 = vld [vmem:[#allocation8 + $0x654] sm:$0xf0]  ;;  %v8477_v18 = vld [vmem:[#allocation8 + $0x9e8] sm:$0xf] }
 0x21b   :  { %6141 = vmatpush.bf16.msrb.mxu3 %v7806_v12  ;;  %v10731_v56 = vld [vmem:[#allocation8 + $0x754] sm:$0xf0]  ;;  %v8333_v54 = vld [vmem:[#allocation8 + $0x8c8] sm:$0xf] }
 0x21c   :  { %6153 = vmatpush.bf16.msra.mxu0 %v7950_v5  ;;  %6121 = vmatmul.bf16.vlgmr.msrb.gmra.mxu1 %v11673_v57  ;;  %v8045_v5 = vld [vmem:[#allocation8 + $0x688] sm:$0xf]  ;;  %v5903_v49 = vpop.f32.mrf.mxu0  ;;  %v10815_v4 = vld [vmem:[#allocation8 + $0x9f4] sm:$0xf0] }
 0x21d   :  { %6165 = vmatpush.bf16.msra.mxu1 %v8094_v25  ;;  %6178 = vmatpush.bf16.msra.mxu2 %v8222_v8  ;;  %v7885_v25 = vld [vmem:[#allocation8 + $0x548] sm:$0xf]  ;;  %v10667_v8 = vld [vmem:[#allocation8 + $0x554] sm:$0xf0]  ;;  %v8046_v12 = vor.u32 %v10707_v40, %v8045_v5  ;;  %v8478_v15 = vor.u32 %v10815_v4, %v8477_v18 }
 0x21e   :  { %6134 = vmatmul.bf16.vlgmr.msrb.gmra.mxu2 %v11675_v0  ;;  %v7886_v38 = vor.u32 %v10667_v8, %v7885_v25  ;;  %v10627_v5 = vld [vmem:[#allocation8 + $0x414] sm:$0xf0]  ;;  %v7853_v40 = vld [vmem:[#allocation8 + $0x508] sm:$0xf] }
 0x21f   :  { %6142 = vmatpush.bf16.msrb.mxu3 %v7790_v33  ;;  %v7869_v33 = vld [vmem:[#allocation8 + $0x528] sm:$0xf]  ;;  %v5877_v48 = vpop.f32.mrf.mxu2  ;;  %v10779_v34 = vld [vmem:[#allocation8 + $0x8d4] sm:$0xf0] }
 0x220   :  { %6154 = vmatpush.bf16.msra.mxu0 %v7934_v2  ;;  %v10703_v2 = vld [vmem:[#allocation8 + $0x674] sm:$0xf0]  ;;  %v8334_v49 = vor.u32 %v10779_v34, %v8333_v54  ;;  %v8589_v4 = vld [vmem:[#allocation8 + $0xac8] sm:$0xf] }
 0x221   :  { %6166 = vmatpush.bf16.msra.mxu1 %v8078_v19  ;;  %6179 = vmatpush.bf16.msra.mxu2 %v8206_v35  ;;  %v5889_v19 = vadd.f32 %v5888_v27, %v5876_v10  ;;  %v5914_v35 = vpop.f32.mrf.mxu1  ;;  %v8030_v43 = vor.u32 %v10703_v2, %v8029_v16  ;;  %v10659_v10 = vld [vmem:[#allocation8 + $0x514] sm:$0xf0]  ;;  %v8573_v54 = vld [vmem:[#allocation8 + $0xaa8] sm:$0xf] }
 0x222   :  { %v7854_v16 = vor.u32 %v10659_v10, %v7853_v40  ;;  %v10727_v27 = vld [vmem:[#allocation8 + $0x734] sm:$0xf0]  ;;  %v8445_v40 = vld [vmem:[#allocation8 + $0x9a8] sm:$0xf] }
 0x223   :  { %6143 = vmatpush.bf16.msrb.mxu3 %v7774_v53  ;;  %v7725_v53 = vld [vmem:[#allocation8 + $0x408] sm:$0xf]  ;;  %v10723_v48 = vld [vmem:[#allocation8 + $0x714] sm:$0xf0] }
 0x224   :  { %6155 = vmatpush.bf16.msra.mxu0 %v7918_v47  ;;  %v5902_v47 = vadd.f32 %v5901_v62, %v5889_v19  ;;  %v8014_v62 = vor.u32 %v10699_v41, %v8013_v45  ;;  %v7726_v8 = vor.u32 %v10627_v5, %v7725_v53  ;;  %v10691_v45 = vld [vmem:[#allocation8 + $0x614] sm:$0xf0]  ;;  %v8733_v41 = vld [vmem:[#allocation8 + $0xbe8] sm:$0xf] }
 0x225   :  { %6167 = vmatpush.bf16.msra.mxu1 %v8062_v60  ;;  %6180 = vmatpush.bf16.msra.mxu2 %v8190_v3  ;;  %v8141_v60 = vld [vmem:[#allocation8 + $0x748] sm:$0xf]  ;;  %v7870_v3 = vor.u32 %v10663_v52, %v7869_v33  ;;  %v10811_v33 = vld [vmem:[#allocation8 + $0x9d4] sm:$0xf0] }
 0x226   :  { %v11840_v9 = vadd.f32 %v5914_v35, %v5902_v47  ;;  %v8142_v25 = vor.u32 %v10731_v56, %v8141_v60  ;;  %v8461_v35 = vld [vmem:[#allocation8 + $0x9c8] sm:$0xf]  ;;  %v10879_v56 = vld [vmem:[#allocation8 + $0xbf4] sm:$0xf0] }
 0x227   :  { %6144 = vmatpush.bf16.msrb.mxu3 %v7758_v11  ;;  %v5890_v11 = vpop.f32.mrf.mxu3  ;;  %v7981_v52 = vld [vmem:[#allocation8 + $0x608] sm:$0xf]  ;;  %v8462_v60 = vor.u32 %v10811_v33, %v8461_v35  ;;  %v10775_v53 = vld [vmem:[#allocation8 + $0x8b4] sm:$0xf0] }
 0x228   :  { %6156 = vmatpush.bf16.msra.mxu0 %v7902_v28  ;;  %v8349_v28 = vld [vmem:[#allocation8 + $0x8e8] sm:$0xf]  ;;  %v7982_v5 = vor.u32 %v10691_v45, %v7981_v52  ;;  %v10807_v10 = vld [vmem:[#allocation8 + $0x9b4] sm:$0xf0] }
 0x229   :  { %6168 = vmatpush.bf16.msra.mxu1 %v8046_v12  ;;  %6181 = vmatpush.bf16.msra.mxu2 %v8174_v20  ;;  %v7997_v12 = vld [vmem:[#allocation8 + $0x628] sm:$0xf]  ;;  %v10695_v20 = vld [vmem:[#allocation8 + $0x634] sm:$0xf0]  ;;  %v8350_v2 = vor.u32 %v10783_v61, %v8349_v28 }
 0x22a   :  { %v7998_v19 = vor.u32 %v10695_v20, %v7997_v12  ;;  %v8109_v47 = vld [vmem:[#allocation8 + $0x708] sm:$0xf]  ;;  %v8446_v12 = vor.u32 %v10807_v10, %v8445_v40  ;;  %v10875_v20 = vld [vmem:[#allocation8 + $0xbd4] sm:$0xf0] }
 0x22b   :  { %6145 = vmatpush.bf16.msrb.mxu3 %v7742_v30  ;;  %v10847_v30 = vld [vmem:[#allocation8 + $0xaf4] sm:$0xf0]  ;;  %v8110_v28 = vor.u32 %v10723_v48, %v8109_v47  ;;  %v8301_v11 = vld [vmem:[#allocation8 + $0x888] sm:$0xf] }
 0x22c   :  { %6157 = vmatpush.bf16.msra.mxu0 %v7886_v38  ;;  %v5916_v38 = vpop.f32.mrf.mxu1  ;;  %v10839_v34 = vld [vmem:[#allocation8 + $0xab4] sm:$0xf0]  ;;  %v8285_v52 = vld [vmem:[#allocation8 + $0x868] sm:$0xf] }
 0x22d   :  { %6169 = vmatpush.bf16.msra.mxu1 %v8030_v43  ;;  %6182 = vmatpush.bf16.msra.mxu2 %v8158_v63  ;;  %v8126_v43 = vor.u32 %v10727_v27, %v8125_v31  ;;  %v8605_v63 = vld [vmem:[#allocation8 + $0xae8] sm:$0xf]  ;;  %v10803_v31 = vld [vmem:[#allocation8 + $0x994] sm:$0xf0]  ;;  %v8574_v48 = vor.u32 %v10839_v34, %v8573_v54 }
 0x22e   :  { %v8606_v61 = vor.u32 %v10847_v30, %v8605_v63  ;;  %v10871_v33 = vld [vmem:[#allocation8 + $0xbb4] sm:$0xf0]  ;;  %v8413_v45 = vld [vmem:[#allocation8 + $0x968] sm:$0xf] }
 0x22f   :  { %6146 = vmatpush.bf16.msrb.mxu3 %v7726_v8  ;;  %v8717_v8 = vld [vmem:[#allocation8 + $0xbc8] sm:$0xf]  ;;  %v10799_v47 = vld [vmem:[#allocation8 + $0x974] sm:$0xf0] }
 0x230   :  { %6158 = vmatpush.bf16.msra.mxu0 %v7870_v3  ;;  %v8317_v3 = vld [vmem:[#allocation8 + $0x8a8] sm:$0xf]  ;;  %v8718_v38 = vor.u32 %v10875_v20, %v8717_v8  ;;  %v10867_v40 = vld [vmem:[#allocation8 + $0xb94] sm:$0xf0] }
 0x231   :  { %6170 = vmatpush.bf16.msra.mxu1 %v8014_v62  ;;  %6183 = vmatpush.bf16.msra.mxu2 %v8142_v25  ;;  %v8734_v62 = vor.u32 %v10879_v56, %v8733_v41  ;;  %v8318_v18 = vor.u32 %v10775_v53, %v8317_v3  ;;  %v10843_v25 = vld [vmem:[#allocation8 + $0xad4] sm:$0xf0]  ;;  %v8685_v3 = vld [vmem:[#allocation8 + $0xb88] sm:$0xf] }
 0x232   :  { %6147 = vmatmul.bf16.vlgmr.msrb.gmra.mxu3 %v11681_v36  ;;  %v8590_v27 = vor.u32 %v10843_v25, %v8589_v4  ;;  %v10835_v56 = vld [vmem:[#allocation8 + $0xa94] sm:$0xf0]  ;;  %v8269_v10 = vld [vmem:[#allocation8 + $0x848] sm:$0xf]  ;;  %v8686_v4 = vor.u32 %v10867_v40, %v8685_v3 }
 0x233   :  { %6191 = vmatpush.bf16.msra.mxu3 %v8350_v2  ;;  %v8429_v2 = vld [vmem:[#allocation8 + $0x988] sm:$0xf]  ;;  %v10791_v54 = vld [vmem:[#allocation8 + $0x934] sm:$0xf0] }
 0x234   :  { %6159 = vmatpush.bf16.msra.mxu0 %v7854_v16  ;;  %v10771_v16 = vld [vmem:[#allocation8 + $0x894] sm:$0xf0]  ;;  %v8430_v35 = vor.u32 %v10803_v31, %v8429_v2  ;;  %v5953_v63 = vpop.f32.mrf.mxu0  ;;  %v8541_v8 = vld [vmem:[#allocation8 + $0xa68] sm:$0xf] }
 0x235   :  { %6171 = vmatpush.bf16.msra.mxu1 %v7998_v19  ;;  %6184 = vmatpush.bf16.msra.mxu2 %v8126_v43  ;;  %v8701_v19 = vld [vmem:[#allocation8 + $0xba8] sm:$0xf]  ;;  %v10767_v43 = vld [vmem:[#allocation8 + $0x874] sm:$0xf0] }
 0x236   :  { %v8702_v30 = vor.u32 %v10871_v33, %v8701_v19  ;;  %v8286_v41 = vor.u32 %v10767_v43, %v8285_v52  ;;  %v8669_v20 = vld [vmem:[#allocation8 + $0xb68] sm:$0xf]  ;;  %v10759_v31 = vld [vmem:[#allocation8 + $0x834] sm:$0xf0] }
 0x237   :  { %6160 = vmatmul.bf16.vlgmr.msra.gmra.mxu0 %v11684_v42  ;;  %6192 = vmatpush.bf16.msra.mxu3 %v8334_v49  ;;  %v5927_v49 = vpop.f32.mrf.mxu2  ;;  %v8253_v2 = vld [vmem:[#allocation8 + $0x828] sm:$0xf]  ;;  %v10911_v40 = vld [vmem:[#allocation8 + $0xcf4] sm:$0xf0] }
 0x238   :  { %6204 = vmatpush.bf16.msrb.mxu0 %v8478_v15  ;;  %v8302_v15 = vor.u32 %v10771_v16, %v8301_v11  ;;  %v5928_v53 = vadd.f32 %v5927_v49, %v11840_v9  ;;  %v5940_v11 = vpop.f32.mrf.mxu3  ;;  %v10863_v9 = vld [vmem:[#allocation8 + $0xb74] sm:$0xf0]  ;;  %v8525_v19 = vld [vmem:[#allocation8 + $0xa48] sm:$0xf] }
 0x239   :  { %6172 = vmatpush.bf16.msra.mxu1 %v7982_v5  ;;  %6185 = vmatpush.bf16.msra.mxu2 %v8110_v28  ;;  %v8414_v5 = vor.u32 %v10799_v47, %v8413_v45  ;;  %v10763_v28 = vld [vmem:[#allocation8 + $0x854] sm:$0xf0]  ;;  %v8670_v43 = vor.u32 %v10863_v9, %v8669_v20  ;;  %v8254_v45 = vor.u32 %v10759_v31, %v8253_v2  ;;  %v8637_v20 = vld [vmem:[#allocation8 + $0xb28] sm:$0xf] }
 0x23a   :  { %v8270_v25 = vor.u32 %v10763_v28, %v8269_v10  ;;  %v10827_v47 = vld [vmem:[#allocation8 + $0xa54] sm:$0xf0]  ;;  %v8989_v10 = vld [vmem:[#allocation8 + $0xde8] sm:$0xf] }
 0x23b   :  { %6193 = vmatpush.bf16.msra.mxu3 %v8318_v18  ;;  %v10859_v49 = vld [vmem:[#allocation8 + $0xb54] sm:$0xf0]  ;;  %v8845_v2 = vld [vmem:[#allocation8 + $0xcc8] sm:$0xf] }
 0x23c   :  { %6205 = vmatpush.bf16.msrb.mxu0 %v8462_v60  ;;  %6173 = vmatmul.bf16.vlgmr.msra.gmra.mxu1 %v11690_v6  ;;  %v8557_v60 = vld [vmem:[#allocation8 + $0xa88] sm:$0xf]  ;;  %v5955_v52 = vpop.f32.mrf.mxu0  ;;  %v10943_v28 = vld [vmem:[#allocation8 + $0xdf4] sm:$0xf0] }
 0x23d   :  { %6217 = vmatpush.bf16.msrb.mxu1 %v8606_v61  ;;  %6230 = vmatpush.bf16.msrb.mxu2 %v8734_v62  ;;  %v8397_v61 = vld [vmem:[#allocation8 + $0x948] sm:$0xf]  ;;  %v10795_v62 = vld [vmem:[#allocation8 + $0x954] sm:$0xf0]  ;;  %v8558_v18 = vor.u32 %v10835_v56, %v8557_v60  ;;  %v8990_v9 = vor.u32 %v10943_v28, %v8989_v10 }
 0x23e   :  { %6186 = vmatmul.bf16.vlgmr.msra.gmra.mxu2 %v11694_v13  ;;  %v8398_v16 = vor.u32 %v10795_v62, %v8397_v61  ;;  %v10755_v60 = vld [vmem:[#allocation8 + $0x814] sm:$0xf0]  ;;  %v8365_v56 = vld [vmem:[#allocation8 + $0x908] sm:$0xf] }
 0x23f   :  { %6194 = vmatpush.bf16.msra.mxu3 %v8302_v15  ;;  %v8381_v15 = vld [vmem:[#allocation8 + $0x928] sm:$0xf]  ;;  %v5929_v33 = vpop.f32.mrf.mxu2  ;;  %v10907_v31 = vld [vmem:[#allocation8 + $0xcd4] sm:$0xf0] }
 0x240   :  { %6206 = vmatpush.bf16.msrb.mxu0 %v8446_v12  ;;  %v10831_v12 = vld [vmem:[#allocation8 + $0xa74] sm:$0xf0]  ;;  %v8846_v52 = vor.u32 %v10907_v31, %v8845_v2  ;;  %v9101_v28 = vld [vmem:[#allocation8 + $0xec8] sm:$0xf] }
 0x241   :  { %6218 = vmatpush.bf16.msrb.mxu1 %v8590_v27  ;;  %6231 = vmatpush.bf16.msrb.mxu2 %v8718_v38  ;;  %v5941_v27 = vadd.f32 %v5940_v11, %v5928_v53  ;;  %v5966_v38 = vpop.f32.mrf.mxu1  ;;  %v8542_v34 = vor.u32 %v10831_v12, %v8541_v8  ;;  %v10787_v53 = vld [vmem:[#allocation8 + $0x914] sm:$0xf0]  ;;  %v9085_v2 = vld [vmem:[#allocation8 + $0xea8] sm:$0xf] }
 0x242   :  { %v8366_v8 = vor.u32 %v10787_v53, %v8365_v56  ;;  %v10855_v11 = vld [vmem:[#allocation8 + $0xb34] sm:$0xf0]  ;;  %v8957_v56 = vld [vmem:[#allocation8 + $0xda8] sm:$0xf] }
 0x243   :  { %6195 = vmatpush.bf16.msra.mxu3 %v8286_v41  ;;  %v8237_v41 = vld [vmem:[#allocation8 + $0x808] sm:$0xf]  ;;  %v10851_v33 = vld [vmem:[#allocation8 + $0xb14] sm:$0xf0] }
 0x244   :  { %6207 = vmatpush.bf16.msrb.mxu0 %v8430_v35  ;;  %v5954_v35 = vadd.f32 %v5953_v63, %v5941_v27  ;;  %v8526_v63 = vor.u32 %v10827_v47, %v8525_v19  ;;  %v8238_v62 = vor.u32 %v10755_v60, %v8237_v41  ;;  %v10819_v19 = vld [vmem:[#allocation8 + $0xa14] sm:$0xf0]  ;;  %v9245_v47 = vld [vmem:[#allocation8 + $0xfe8] sm:$0xf] }
 0x245   :  { %6219 = vmatpush.bf16.msrb.mxu1 %v8574_v48  ;;  %6232 = vmatpush.bf16.msrb.mxu2 %v8702_v30  ;;  %v8653_v48 = vld [vmem:[#allocation8 + $0xb48] sm:$0xf]  ;;  %v8382_v30 = vor.u32 %v10791_v54, %v8381_v15  ;;  %v10939_v15 = vld [vmem:[#allocation8 + $0xdd4] sm:$0xf0] }
 0x246   :  { %v11847_v3 = vadd.f32 %v5966_v38, %v5954_v35  ;;  %v8654_v61 = vor.u32 %v10859_v49, %v8653_v48  ;;  %v8973_v38 = vld [vmem:[#allocation8 + $0xdc8] sm:$0xf]  ;;  %v11007_v49 = vld [vmem:[#allocation8 + $0xff4] sm:$0xf0] }
 0x247   :  { %6196 = vmatpush.bf16.msra.mxu3 %v8270_v25  ;;  %v5942_v25 = vpop.f32.mrf.mxu3  ;;  %v8493_v54 = vld [vmem:[#allocation8 + $0xa08] sm:$0xf]  ;;  %v8974_v48 = vor.u32 %v10939_v15, %v8973_v38  ;;  %v10903_v41 = vld [vmem:[#allocation8 + $0xcb4] sm:$0xf0] }
 0x248   :  { %6208 = vmatpush.bf16.msrb.mxu0 %v8414_v5  ;;  %v8861_v5 = vld [vmem:[#allocation8 + $0xce8] sm:$0xf]  ;;  %v8494_v60 = vor.u32 %v10819_v19, %v8493_v54  ;;  %v10935_v53 = vld [vmem:[#allocation8 + $0xdb4] sm:$0xf0] }
 0x249   :  { %6220 = vmatpush.bf16.msrb.mxu1 %v8558_v18  ;;  %6233 = vmatpush.bf16.msrb.mxu2 %v8686_v4  ;;  %v8509_v18 = vld [vmem:[#allocation8 + $0xa28] sm:$0xf]  ;;  %v10823_v4 = vld [vmem:[#allocation8 + $0xa34] sm:$0xf0]  ;;  %v8862_v12 = vor.u32 %v10911_v40, %v8861_v5 }
 0x24a   :  { %v8510_v27 = vor.u32 %v10823_v4, %v8509_v18  ;;  %v8621_v35 = vld [vmem:[#allocation8 + $0xb08] sm:$0xf]  ;;  %v8958_v18 = vor.u32 %v10935_v53, %v8957_v56  ;;  %v11003_v4 = vld [vmem:[#allocation8 + $0xfd4] sm:$0xf0] }
 0x24b   :  { %6197 = vmatpush.bf16.msra.mxu3 %v8254_v45  ;;  %v10975_v45 = vld [vmem:[#allocation8 + $0xef4] sm:$0xf0]  ;;  %v8622_v5 = vor.u32 %v10851_v33, %v8621_v35  ;;  %v8813_v25 = vld [vmem:[#allocation8 + $0xc88] sm:$0xf] }
 0x24c   :  { %6209 = vmatpush.bf16.msrb.mxu0 %v8398_v16  ;;  %v5968_v16 = vpop.f32.mrf.mxu1  ;;  %v10967_v31 = vld [vmem:[#allocation8 + $0xeb4] sm:$0xf0]  ;;  %v8797_v54 = vld [vmem:[#allocation8 + $0xc68] sm:$0xf] }
 0x24d   :  { %6221 = vmatpush.bf16.msrb.mxu1 %v8542_v34  ;;  %6234 = vmatpush.bf16.msrb.mxu2 %v8670_v43  ;;  %v8638_v34 = vor.u32 %v10855_v11, %v8637_v20  ;;  %v9117_v43 = vld [vmem:[#allocation8 + $0xee8] sm:$0xf]  ;;  %v10931_v20 = vld [vmem:[#allocation8 + $0xd94] sm:$0xf0]  ;;  %v9086_v33 = vor.u32 %v10967_v31, %v9085_v2 }
 0x24e   :  { %v9118_v40 = vor.u32 %v10975_v45, %v9117_v43  ;;  %v10999_v15 = vld [vmem:[#allocation8 + $0xfb4] sm:$0xf0]  ;;  %v8925_v19 = vld [vmem:[#allocation8 + $0xd68] sm:$0xf] }
 0x24f   :  { %6198 = vmatpush.bf16.msra.mxu3 %v8238_v62  ;;  %v9229_v62 = vld [vmem:[#allocation8 + $0xfc8] sm:$0xf]  ;;  %v10927_v35 = vld [vmem:[#allocation8 + $0xd74] sm:$0xf0] }
 0x250   :  { %6210 = vmatpush.bf16.msrb.mxu0 %v8382_v30  ;;  %v8829_v30 = vld [vmem:[#allocation8 + $0xca8] sm:$0xf]  ;;  %v9230_v16 = vor.u32 %v11003_v4, %v9229_v62  ;;  %v10995_v56 = vld [vmem:[#allocation8 + $0xf94] sm:$0xf0] }
 0x251   :  { %6222 = vmatpush.bf16.msrb.mxu1 %v8526_v63  ;;  %6235 = vmatpush.bf16.msrb.mxu2 %v8654_v61  ;;  %v9246_v63 = vor.u32 %v11007_v49, %v9245_v47  ;;  %v8830_v10 = vor.u32 %v10903_v41, %v8829_v30  ;;  %v10971_v61 = vld [vmem:[#allocation8 + $0xed4] sm:$0xf0]  ;;  %v9197_v30 = vld [vmem:[#allocation8 + $0xf88] sm:$0xf] }
 0x252   :  { %6199 = vmatmul.bf16.vlgmr.msra.gmra.mxu3 %v11699_v58  ;;  %v9102_v11 = vor.u32 %v10971_v61, %v9101_v28  ;;  %v10963_v49 = vld [vmem:[#allocation8 + $0xe94] sm:$0xf0]  ;;  %v8781_v53 = vld [vmem:[#allocation8 + $0xc48] sm:$0xf]  ;;  %v9198_v28 = vor.u32 %v10995_v56, %v9197_v30 }
 0x253   :  { %6243 = vmatpush.bf16.msrb.mxu3 %v8862_v12  ;;  %v8941_v12 = vld [vmem:[#allocation8 + $0xd88] sm:$0xf]  ;;  %v10919_v2 = vld [vmem:[#allocation8 + $0xd34] sm:$0xf0] }
 0x254   :  { %6211 = vmatpush.bf16.msrb.mxu0 %v8366_v8  ;;  %v10899_v8 = vld [vmem:[#allocation8 + $0xc94] sm:$0xf0]  ;;  %v8942_v38 = vor.u32 %v10931_v20, %v8941_v12  ;;  %v6005_v43 = vpop.f32.mrf.mxu0  ;;  %v9053_v62 = vld [vmem:[#allocation8 + $0xe68] sm:$0xf] }
 0x255   :  { %6223 = vmatpush.bf16.msrb.mxu1 %v8510_v27  ;;  %6236 = vmatpush.bf16.msrb.mxu2 %v8638_v34  ;;  %v9213_v27 = vld [vmem:[#allocation8 + $0xfa8] sm:$0xf]  ;;  %v10895_v34 = vld [vmem:[#allocation8 + $0xc74] sm:$0xf0] }
 0x256   :  { %v9214_v45 = vor.u32 %v10999_v15, %v9213_v27  ;;  %v8798_v47 = vor.u32 %v10895_v34, %v8797_v54  ;;  %v9181_v4 = vld [vmem:[#allocation8 + $0xf68] sm:$0xf]  ;;  %v10887_v20 = vld [vmem:[#allocation8 + $0xc34] sm:$0xf0] }
 0x257   :  { %6212 = vmatmul.bf16.vlgmr.msrb.gmra.mxu0 %v11702_v1  ;;  %6244 = vmatpush.bf16.msrb.mxu3 %v8846_v52  ;;  %v5979_v52 = vpop.f32.mrf.mxu2  ;;  %v8765_v12 = vld [vmem:[#allocation8 + $0xc28] sm:$0xf]  ;;  %v11039_v56 = vld [vmem:[#allocation8 + $0x10f4] sm:$0xf0] }
 0x258   :  { %6256 = vmatpush.bf16.msra.mxu0 %v8990_v9  ;;  %v8814_v9 = vor.u32 %v10899_v8, %v8813_v25  ;;  %v5980_v41 = vadd.f32 %v5979_v52, %v11847_v3  ;;  %v5992_v25 = vpop.f32.mrf.mxu3  ;;  %v10991_v3 = vld [vmem:[#allocation8 + $0xf74] sm:$0xf0]  ;;  %v9037_v27 = vld [vmem:[#allocation8 + $0xe48] sm:$0xf] }
 0x259   :  { %6224 = vmatpush.bf16.msrb.mxu1 %v8494_v60  ;;  %6237 = vmatpush.bf16.msrb.mxu2 %v8622_v5  ;;  %v8926_v60 = vor.u32 %v10927_v35, %v8925_v19  ;;  %v10891_v5 = vld [vmem:[#allocation8 + $0xc54] sm:$0xf0]  ;;  %v9182_v34 = vor.u32 %v10991_v3, %v9181_v4  ;;  %v8766_v19 = vor.u32 %v10887_v20, %v8765_v12  ;;  %v9149_v4 = vld [vmem:[#allocation8 + $0xf28] sm:$0xf] }
 0x25a   :  { %v8782_v61 = vor.u32 %v10891_v5, %v8781_v53  ;;  %v10955_v35 = vld [vmem:[#allocation8 + $0xe54] sm:$0xf0]  ;;  %v9501_v53 = vld [vmem:[#allocation8 + $0x11e8] sm:$0xf] }
 0x25b   :  { %6245 = vmatpush.bf16.msrb.mxu3 %v8830_v10  ;;  %v10987_v52 = vld [vmem:[#allocation8 + $0xf54] sm:$0xf0]  ;;  %v9357_v12 = vld [vmem:[#allocation8 + $0x10c8] sm:$0xf] }
 0x25c   :  { %6257 = vmatpush.bf16.msra.mxu0 %v8974_v48  ;;  %6225 = vmatmul.bf16.vlgmr.msrb.gmra.mxu1 %v11706_v37  ;;  %v9069_v48 = vld [vmem:[#allocation8 + $0xe88] sm:$0xf]  ;;  %v6007_v54 = vpop.f32.mrf.mxu0  ;;  %v11071_v5 = vld [vmem:[#allocation8 + $0x11f4] sm:$0xf0] }
 0x25d   :  { %6269 = vmatpush.bf16.msra.mxu1 %v9118_v40  ;;  %6282 = vmatpush.bf16.msra.mxu2 %v9246_v63  ;;  %v8909_v40 = vld [vmem:[#allocation8 + $0xd48] sm:$0xf]  ;;  %v10923_v63 = vld [vmem:[#allocation8 + $0xd54] sm:$0xf0]  ;;  %v9070_v10 = vor.u32 %v10963_v49, %v9069_v48  ;;  %v9502_v3 = vor.u32 %v11071_v5, %v9501_v53 }
 0x25e   :  { %6238 = vmatmul.bf16.vlgmr.msrb.gmra.mxu2 %v11708_v39  ;;  %v8910_v8 = vor.u32 %v10923_v63, %v8909_v40  ;;  %v10883_v48 = vld [vmem:[#allocation8 + $0xc14] sm:$0xf0]  ;;  %v8877_v49 = vld [vmem:[#allocation8 + $0xd08] sm:$0xf] }
 0x25f   :  { %6246 = vmatpush.bf16.msrb.mxu3 %v8814_v9  ;;  %v8893_v9 = vld [vmem:[#allocation8 + $0xd28] sm:$0xf]  ;;  %v5981_v15 = vpop.f32.mrf.mxu2  ;;  %v11035_v20 = vld [vmem:[#allocation8 + $0x10d4] sm:$0xf0] }
 0x260   :  { %6258 = vmatpush.bf16.msra.mxu0 %v8958_v18  ;;  %v10959_v18 = vld [vmem:[#allocation8 + $0xe74] sm:$0xf0]  ;;  %v9358_v54 = vor.u32 %v11035_v20, %v9357_v12  ;;  %v9613_v5 = vld [vmem:[#allocation8 + $0x12c8] sm:$0xf] }
 0x261   :  { %6270 = vmatpush.bf16.msra.mxu1 %v9102_v11  ;;  %6283 = vmatpush.bf16.msra.mxu2 %v9230_v16  ;;  %v5993_v11 = vadd.f32 %v5992_v25, %v5980_v41  ;;  %v6018_v16 = vpop.f32.mrf.mxu1  ;;  %v9054_v31 = vor.u32 %v10959_v18, %v9053_v62  ;;  %v10915_v41 = vld [vmem:[#allocation8 + $0xd14] sm:$0xf0]  ;;  %v9597_v12 = vld [vmem:[#allocation8 + $0x12a8] sm:$0xf] }
 0x262   :  { %v8878_v62 = vor.u32 %v10915_v41, %v8877_v49  ;;  %v10983_v25 = vld [vmem:[#allocation8 + $0xf34] sm:$0xf0]  ;;  %v9469_v49 = vld [vmem:[#allocation8 + $0x11a8] sm:$0xf] }
 0x263   :  { %6247 = vmatpush.bf16.msrb.mxu3 %v8798_v47  ;;  %v8749_v47 = vld [vmem:[#allocation8 + $0xc08] sm:$0xf]  ;;  %v10979_v15 = vld [vmem:[#allocation8 + $0xf14] sm:$0xf0] }
 0x264   :  { %6259 = vmatpush.bf16.msra.mxu0 %v8942_v38  ;;  %v6006_v38 = vadd.f32 %v6005_v43, %v5993_v11  ;;  %v9038_v43 = vor.u32 %v10955_v35, %v9037_v27  ;;  %v8750_v63 = vor.u32 %v10883_v48, %v8749_v47  ;;  %v10947_v27 = vld [vmem:[#allocation8 + $0xe14] sm:$0xf0]  ;;  %v9757_v35 = vld [vmem:[#allocation8 + $0x13e8] sm:$0xf] }
 0x265   :  { %6271 = vmatpush.bf16.msra.mxu1 %v9086_v33  ;;  %6284 = vmatpush.bf16.msra.mxu2 %v9214_v45  ;;  %v9165_v33 = vld [vmem:[#allocation8 + $0xf48] sm:$0xf]  ;;  %v8894_v45 = vor.u32 %v10919_v2, %v8893_v9  ;;  %v11067_v9 = vld [vmem:[#allocation8 + $0x11d4] sm:$0xf0] }
 0x266   :  { %v11854_v30 = vadd.f32 %v6018_v16, %v6006_v38  ;;  %v9166_v40 = vor.u32 %v10987_v52, %v9165_v33  ;;  %v9485_v16 = vld [vmem:[#allocation8 + $0x11c8] sm:$0xf]  ;;  %v11135_v52 = vld [vmem:[#allocation8 + $0x13f4] sm:$0xf0] }
 0x267   :  { %6248 = vmatpush.bf16.msrb.mxu3 %v8782_v61  ;;  %v5994_v61 = vpop.f32.mrf.mxu3  ;;  %v9005_v2 = vld [vmem:[#allocation8 + $0xe08] sm:$0xf]  ;;  %v9486_v33 = vor.u32 %v11067_v9, %v9485_v16  ;;  %v11031_v47 = vld [vmem:[#allocation8 + $0x10b4] sm:$0xf0] }
 0x268   :  { %6260 = vmatpush.bf16.msra.mxu0 %v8926_v60  ;;  %v9373_v60 = vld [vmem:[#allocation8 + $0x10e8] sm:$0xf]  ;;  %v9006_v48 = vor.u32 %v10947_v27, %v9005_v2  ;;  %v11063_v41 = vld [vmem:[#allocation8 + $0x11b4] sm:$0xf0] }
 0x269   :  { %6272 = vmatpush.bf16.msra.mxu1 %v9070_v10  ;;  %6285 = vmatpush.bf16.msra.mxu2 %v9198_v28  ;;  %v9021_v10 = vld [vmem:[#allocation8 + $0xe28] sm:$0xf]  ;;  %v10951_v28 = vld [vmem:[#allocation8 + $0xe34] sm:$0xf0]  ;;  %v9374_v18 = vor.u32 %v11039_v56, %v9373_v60 }
 0x26a   :  { %v9022_v11 = vor.u32 %v10951_v28, %v9021_v10  ;;  %v9133_v38 = vld [vmem:[#allocation8 + $0xf08] sm:$0xf]  ;;  %v9470_v10 = vor.u32 %v11063_v41, %v9469_v49  ;;  %v11131_v28 = vld [vmem:[#allocation8 + $0x13d4] sm:$0xf0] }
 0x26b   :  { %6249 = vmatpush.bf16.msrb.mxu3 %v8766_v19  ;;  %v11103_v19 = vld [vmem:[#allocation8 + $0x12f4] sm:$0xf0]  ;;  %v9134_v60 = vor.u32 %v10979_v15, %v9133_v38  ;;  %v9325_v61 = vld [vmem:[#allocation8 + $0x1088] sm:$0xf] }
 0x26c   :  { %6261 = vmatpush.bf16.msra.mxu0 %v8910_v8  ;;  %v6020_v8 = vpop.f32.mrf.mxu1  ;;  %v11095_v20 = vld [vmem:[#allocation8 + $0x12b4] sm:$0xf0]  ;;  %v9309_v2 = vld [vmem:[#allocation8 + $0x1068] sm:$0xf] }
 0x26d   :  { %6273 = vmatpush.bf16.msra.mxu1 %v9054_v31  ;;  %6286 = vmatpush.bf16.msra.mxu2 %v9182_v34  ;;  %v9150_v31 = vor.u32 %v10983_v25, %v9149_v4  ;;  %v9629_v34 = vld [vmem:[#allocation8 + $0x12e8] sm:$0xf]  ;;  %v11059_v4 = vld [vmem:[#allocation8 + $0x1194] sm:$0xf0]  ;;  %v9598_v15 = vor.u32 %v11095_v20, %v9597_v12 }
 0x26e   :  { %v9630_v56 = vor.u32 %v11103_v19, %v9629_v34  ;;  %v11127_v9 = vld [vmem:[#allocation8 + $0x13b4] sm:$0xf0]  ;;  %v9437_v27 = vld [vmem:[#allocation8 + $0x1168] sm:$0xf] }
 0x26f   :  { %6250 = vmatpush.bf16.msrb.mxu3 %v8750_v63  ;;  %v9741_v63 = vld [vmem:[#allocation8 + $0x13c8] sm:$0xf]  ;;  %v11055_v38 = vld [vmem:[#allocation8 + $0x1174] sm:$0xf0] }
 0x270   :  { %6262 = vmatpush.bf16.msra.mxu0 %v8894_v45  ;;  %v9341_v45 = vld [vmem:[#allocation8 + $0x10a8] sm:$0xf]  ;;  %v9742_v8 = vor.u32 %v11131_v28, %v9741_v63  ;;  %v11123_v49 = vld [vmem:[#allocation8 + $0x1394] sm:$0xf0] }
 0x271   :  { %6274 = vmatpush.bf16.msra.mxu1 %v9038_v43  ;;  %6287 = vmatpush.bf16.msra.mxu2 %v9166_v40  ;;  %v9758_v43 = vor.u32 %v11135_v52, %v9757_v35  ;;  %v9342_v53 = vor.u32 %v11031_v47, %v9341_v45  ;;  %v11099_v40 = vld [vmem:[#allocation8 + $0x12d4] sm:$0xf0]  ;;  %v9709_v45 = vld [vmem:[#allocation8 + $0x1388] sm:$0xf] }
 0x272   :  { %6251 = vmatmul.bf16.vlgmr.msrb.gmra.mxu3 %v11722_v29  ;;  %v9614_v25 = vor.u32 %v11099_v40, %v9613_v5  ;;  %v11091_v52 = vld [vmem:[#allocation8 + $0x1294] sm:$0xf0]  ;;  %v9293_v41 = vld [vmem:[#allocation8 + $0x1048] sm:$0xf]  ;;  %v9710_v5 = vor.u32 %v11123_v49, %v9709_v45 }
 0x273   :  { %6295 = vmatpush.bf16.msra.mxu3 %v9374_v18  ;;  %v9453_v18 = vld [vmem:[#allocation8 + $0x1188] sm:$0xf]  ;;  %v11047_v12 = vld [vmem:[#allocation8 + $0x1134] sm:$0xf0] }
 0x274   :  { %6263 = vmatpush.bf16.msra.mxu0 %v8878_v62  ;;  %v11027_v62 = vld [vmem:[#allocation8 + $0x1094] sm:$0xf0]  ;;  %v9454_v16 = vor.u32 %v11059_v4, %v9453_v18  ;;  %v6057_v34 = vpop.f32.mrf.mxu0  ;;  %v9565_v63 = vld [vmem:[#allocation8 + $0x1268] sm:$0xf] }
 0x275   :  { %6275 = vmatpush.bf16.msra.mxu1 %v9022_v11  ;;  %6288 = vmatpush.bf16.msra.mxu2 %v9150_v31  ;;  %v9725_v11 = vld [vmem:[#allocation8 + $0x13a8] sm:$0xf]  ;;  %v11023_v31 = vld [vmem:[#allocation8 + $0x1074] sm:$0xf0] }
 0x276   :  { %v9726_v19 = vor.u32 %v11127_v9, %v9725_v11  ;;  %v9310_v35 = vor.u32 %v11023_v31, %v9309_v2  ;;  %v9693_v28 = vld [vmem:[#allocation8 + $0x1368] sm:$0xf]  ;;  %v11015_v4 = vld [vmem:[#allocation8 + $0x1034] sm:$0xf0] }
 0x277   :  { %6264 = vmatmul.bf16.vlgmr.msra.gmra.mxu0 %v11720_v22  ;;  %6296 = vmatpush.bf16.msra.mxu3 %v9358_v54  ;;  %v6031_v54 = vpop.f32.mrf.mxu2  ;;  %v9277_v18 = vld [vmem:[#allocation8 + $0x1028] sm:$0xf]  ;;  %v11167_v49 = vld [vmem:[#allocation8 + $0x14f4] sm:$0xf0] }
 0x278   :  { %6308 = vmatpush.bf16.msrb.mxu0 %v9502_v3  ;;  %v9326_v3 = vor.u32 %v11027_v62, %v9325_v61  ;;  %v6032_v47 = vadd.f32 %v6031_v54, %v11854_v30  ;;  %v6044_v61 = vpop.f32.mrf.mxu3  ;;  %v11119_v30 = vld [vmem:[#allocation8 + $0x1374] sm:$0xf0]  ;;  %v9549_v11 = vld [vmem:[#allocation8 + $0x1248] sm:$0xf] }
 0x279   :  { %6276 = vmatpush.bf16.msra.mxu1 %v9006_v48  ;;  %6289 = vmatpush.bf16.msra.mxu2 %v9134_v60  ;;  %v9438_v48 = vor.u32 %v11055_v38, %v9437_v27  ;;  %v11019_v60 = vld [vmem:[#allocation8 + $0x1054] sm:$0xf0]  ;;  %v9694_v31 = vor.u32 %v11119_v30, %v9693_v28  ;;  %v9278_v27 = vor.u32 %v11015_v4, %v9277_v18  ;;  %v9661_v28 = vld [vmem:[#allocation8 + $0x1328] sm:$0xf] }
 0x27a   :  { %v9294_v40 = vor.u32 %v11019_v60, %v9293_v41  ;;  %v11083_v38 = vld [vmem:[#allocation8 + $0x1254] sm:$0xf0]  ;;  %v10013_v41 = vld [vmem:[#allocation8 + $0x15e8] sm:$0xf] }
 0x27b   :  { %6297 = vmatpush.bf16.msra.mxu3 %v9342_v53  ;;  %v11115_v54 = vld [vmem:[#allocation8 + $0x1354] sm:$0xf0]  ;;  %v9869_v18 = vld [vmem:[#allocation8 + $0x14c8] sm:$0xf] }
 0x27c   :  { %6309 = vmatpush.bf16.msrb.mxu0 %v9486_v33  ;;  %6277 = vmatmul.bf16.vlgmr.msra.gmra.mxu1 %v11726_v51  ;;  %v9581_v33 = vld [vmem:[#allocation8 + $0x1288] sm:$0xf]  ;;  %v6059_v2 = vpop.f32.mrf.mxu0  ;;  %v11199_v60 = vld [vmem:[#allocation8 + $0x15f4] sm:$0xf0] }
 0x27d   :  { %6321 = vmatpush.bf16.msrb.mxu1 %v9630_v56  ;;  %6334 = vmatpush.bf16.msrb.mxu2 %v9758_v43  ;;  %v9421_v56 = vld [vmem:[#allocation8 + $0x1148] sm:$0xf]  ;;  %v11051_v43 = vld [vmem:[#allocation8 + $0x1154] sm:$0xf0]  ;;  %v9582_v53 = vor.u32 %v11091_v52, %v9581_v33  ;;  %v10014_v30 = vor.u32 %v11199_v60, %v10013_v41 }
 0x27e   :  { %6290 = vmatmul.bf16.vlgmr.msra.gmra.mxu2 %v11730_v55  ;;  %v9422_v62 = vor.u32 %v11051_v43, %v9421_v56  ;;  %v11011_v33 = vld [vmem:[#allocation8 + $0x1014] sm:$0xf0]  ;;  %v9389_v52 = vld [vmem:[#allocation8 + $0x1108] sm:$0xf] }
 0x27f   :  { %6298 = vmatpush.bf16.msra.mxu3 %v9326_v3  ;;  %v9405_v3 = vld [vmem:[#allocation8 + $0x1128] sm:$0xf]  ;;  %v6033_v9 = vpop.f32.mrf.mxu2  ;;  %v11163_v4 = vld [vmem:[#allocation8 + $0x14d4] sm:$0xf0] }
 0x280   :  { %6310 = vmatpush.bf16.msrb.mxu0 %v9470_v10  ;;  %v11087_v10 = vld [vmem:[#allocation8 + $0x1274] sm:$0xf0]  ;;  %v9645_v9 = vld [vmem:[#allocation8 + $0x1308] sm:$0xf] }
 0x281   :  { %6322 = vmatpush.bf16.msrb.mxu1 %v9614_v25  ;;  %6335 = vmatpush.bf16.msrb.mxu2 %v9742_v8  ;;  %v6045_v25 = vadd.f32 %v6044_v61, %v6032_v47  ;;  %v6070_v8 = vpop.f32.mrf.mxu1  ;;  %v9566_v20 = vor.u32 %v11087_v10, %v9565_v63  ;;  %v11043_v47 = vld [vmem:[#allocation8 + $0x1114] sm:$0xf0] }
 0x282   :  { %v9390_v63 = vor.u32 %v11043_v47, %v9389_v52  ;;  %v11111_v61 = vld [vmem:[#allocation8 + $0x1334] sm:$0xf0] }
 0x283   :  { %6299 = vmatpush.bf16.msra.mxu3 %v9310_v35  ;;  %v9261_v35 = vld [vmem:[#allocation8 + $0x1008] sm:$0xf]  ;;  %v11107_v2 = vld [vmem:[#allocation8 + $0x1314] sm:$0xf0] }
 0x284   :  { %6311 = vmatpush.bf16.msrb.mxu0 %v9454_v16  ;;  %v6058_v16 = vadd.f32 %v6057_v34, %v6045_v25  ;;  %v9550_v34 = vor.u32 %v11083_v38, %v9549_v11  ;;  %v9262_v43 = vor.u32 %v11011_v33, %v9261_v35  ;;  %v9662_v11 = vor.u32 %v11111_v61, %v9661_v28  ;;  %v10141_v38 = vld [vmem:[#allocation8 + $0x16e8] sm:$0xf]  ;;  %v11263_v35 = vld [vmem:[#allocation8 + $0x17f4] sm:$0xf0] }
 0x285   :  { %6323 = vmatpush.bf16.msrb.mxu1 %v9598_v15  ;;  %6336 = vmatpush.bf16.msrb.mxu2 %v9726_v19  ;;  %v9677_v15 = vld [vmem:[#allocation8 + $0x1348] sm:$0xf]  ;;  %v9406_v19 = vor.u32 %v11047_v12, %v9405_v3  ;;  %v11195_v3 = vld [vmem:[#allocation8 + $0x15d4] sm:$0xf0] }
 0x286   :  { %v6071_v45 = vadd.f32 %v6070_v8, %v6058_v16  ;;  %v9678_v56 = vor.u32 %v11115_v54, %v9677_v15  ;;  %v9997_v8 = vld [vmem:[#allocation8 + $0x15c8] sm:$0xf]  ;;  %v11075_v16 = vld [vmem:[#allocation8 + $0x1214] sm:$0xf0] }
 0x287   :  { %6300 = vmatpush.bf16.msra.mxu3 %v9294_v40  ;;  %v6046_v40 = vpop.f32.mrf.mxu3  ;;  %v9517_v12 = vld [vmem:[#allocation8 + $0x1208] sm:$0xf]  ;;  %v11231_v15 = vld [vmem:[#allocation8 + $0x16f4] sm:$0xf0] }
 0x288   :  { %6312 = vmatpush.bf16.msrb.mxu0 %v9438_v48  ;;  %v9885_v48 = vld [vmem:[#allocation8 + $0x14e8] sm:$0xf]  ;;  %v11159_v52 = vld [vmem:[#allocation8 + $0x14b4] sm:$0xf0]  ;;  %v9518_v47 = vor.u32 %v11075_v16, %v9517_v12 }
 0x289   :  { %6324 = vmatpush.bf16.msrb.mxu1 %v9582_v53  ;;  %6337 = vmatpush.bf16.msrb.mxu2 %v9710_v5  ;;  %v9533_v53 = vld [vmem:[#allocation8 + $0x1228] sm:$0xf]  ;;  %v11079_v5 = vld [vmem:[#allocation8 + $0x1234] sm:$0xf0]  ;;  %v9886_v10 = vor.u32 %v11167_v49, %v9885_v48 }
 0x28a   :  { %v9534_v25 = vor.u32 %v11079_v5, %v9533_v53  ;;  %v10269_v54 = vld [vmem:[#allocation8 + $0x17e8] sm:$0xf]  ;;  %v11191_v49 = vld [vmem:[#allocation8 + $0x15b4] sm:$0xf0] }
 0x28b   :  { %6301 = vmatpush.bf16.msra.mxu3 %v9278_v27  ;;  %v9870_v27 = vor.u32 %v11163_v4, %v9869_v18  ;;  %v9853_v33 = vld [vmem:[#allocation8 + $0x14a8] sm:$0xf]  ;;  %v10270_v41 = vor.u32 %v11263_v35, %v10269_v54  ;;  %v11259_v40 = vld [vmem:[#allocation8 + $0x17d4] sm:$0xf0] }
 0x28c   :  { %6313 = vmatpush.bf16.msrb.mxu0 %v9422_v62  ;;  %v6072_v62 = vpop.f32.mrf.mxu1  ;;  %v9981_v48 = vld [vmem:[#allocation8 + $0x15a8] sm:$0xf]  ;;  %v9854_v60 = vor.u32 %v11159_v52, %v9853_v33  ;;  %v11187_v61 = vld [vmem:[#allocation8 + $0x1594] sm:$0xf0] }
 0x28d   :  { %6325 = vmatpush.bf16.msrb.mxu1 %v9566_v20  ;;  %6338 = vmatpush.bf16.msrb.mxu2 %v9694_v31  ;;  %v6083_v20 = vpop.f32.mrf.mxu2  ;;  %v10253_v53 = vld [vmem:[#allocation8 + $0x17c8] sm:$0xf]  ;;  %v9982_v5 = vor.u32 %v11191_v49, %v9981_v48  ;;  %v11151_v16 = vld [vmem:[#allocation8 + $0x1474] sm:$0xf0] }
 0x28e   :  { %v11861_v31 = vadd.f32 %v6083_v20, %v6071_v45  ;;  %v9646_v45 = vor.u32 %v11107_v2, %v9645_v9  ;;  %v9965_v28 = vld [vmem:[#allocation8 + $0x1588] sm:$0xf]  ;;  %v10254_v18 = vor.u32 %v11259_v40, %v10253_v53  ;;  %v11255_v20 = vld [vmem:[#allocation8 + $0x17b4] sm:$0xf0] }
 0x28f   :  { %6302 = vmatpush.bf16.msra.mxu3 %v9262_v43  ;;  %v11227_v43 = vld [vmem:[#allocation8 + $0x16d4] sm:$0xf0]  ;;  %v9966_v12 = vor.u32 %v11187_v61, %v9965_v28  ;;  %v9949_v9 = vld [vmem:[#allocation8 + $0x1568] sm:$0xf] }
 0x290   :  { %6314 = vmatpush.bf16.msrb.mxu0 %v9406_v19  ;;  %v9998_v19 = vor.u32 %v11195_v3, %v9997_v8  ;;  %v11223_v8 = vld [vmem:[#allocation8 + $0x16b4] sm:$0xf0]  ;;  %v10237_v3 = vld [vmem:[#allocation8 + $0x17a8] sm:$0xf] }
 0x291   :  { %6326 = vmatpush.bf16.msrb.mxu1 %v9550_v34  ;;  %6339 = vmatpush.bf16.msrb.mxu2 %v9678_v56  ;;  %v10142_v34 = vor.u32 %v11231_v15, %v10141_v38  ;;  %v10125_v56 = vld [vmem:[#allocation8 + $0x16c8] sm:$0xf]  ;;  %v11183_v2 = vld [vmem:[#allocation8 + $0x1574] sm:$0xf0]  ;;  %v10238_v15 = vor.u32 %v11255_v20, %v10237_v3 }
 0x292   :  { %6303 = vmatmul.bf16.vlgmr.msra.gmra.mxu3 %v11754_v17  ;;  %v11219_v35 = vld [vmem:[#allocation8 + $0x1694] sm:$0xf0]  ;;  %v10221_v33 = vld [vmem:[#allocation8 + $0x1788] sm:$0xf]  ;;  %v9950_v52 = vor.u32 %v11183_v2, %v9949_v9 }
 0x293   :  { %6347 = vmatpush.bf16.msrb.mxu3 %v9886_v10  ;;  %v11155_v10 = vld [vmem:[#allocation8 + $0x1494] sm:$0xf0]  ;;  %v9805_v48 = vld [vmem:[#allocation8 + $0x1448] sm:$0xf] }
 0x294   :  { %6315 = vmatpush.bf16.msrb.mxu0 %v9390_v63  ;;  %v9837_v63 = vld [vmem:[#allocation8 + $0x1488] sm:$0xf]  ;;  %v6109_v38 = vpop.f32.mrf.mxu0  ;;  %v11147_v49 = vld [vmem:[#allocation8 + $0x1454] sm:$0xf0] }
 0x295   :  { %6327 = vmatpush.bf16.msrb.mxu1 %v9534_v25  ;;  %6340 = vmatpush.bf16.msrb.mxu2 %v9662_v11  ;;  %v6085_v62 = vpop.f32.mrf.mxu2  ;;  %v9838_v4 = vor.u32 %v11155_v10, %v9837_v63  ;;  %v10109_v25 = vld [vmem:[#allocation8 + $0x16a8] sm:$0xf]  ;;  %v9806_v53 = vor.u32 %v11147_v49, %v9805_v48  ;;  %v11215_v40 = vld [vmem:[#allocation8 + $0x1674] sm:$0xf0]  ;;  %v6096_v10 = vpop.f32.mrf.mxu3 }
 0x296   :  { %v9821_v11 = vld [vmem:[#allocation8 + $0x1468] sm:$0xf]  ;;  %v11247_v61 = vld [vmem:[#allocation8 + $0x1774] sm:$0xf0] }
 0x297   :  { %6316 = vmatmul.bf16.vlgmr.msrb.gmra.mxu0 %v11758_v21  ;;  %6348 = vmatpush.bf16.msrb.mxu3 %v9870_v27  ;;  %v10110_v27 = vor.u32 %v11223_v8, %v10109_v25  ;;  %v9822_v54 = vor.u32 %v11151_v16, %v9821_v11  ;;  %v10205_v63 = vld [vmem:[#allocation8 + $0x1768] sm:$0xf]  ;;  %v11175_v8 = vld [vmem:[#allocation8 + $0x1534] sm:$0xf0] }
 0x298   :  { %6360 = vmatpush.bf16.msra.mxu0 %v10014_v30  ;;  %v10126_v30 = vor.u32 %v11227_v43, %v10125_v56  ;;  %v9789_v62 = vld [vmem:[#allocation8 + $0x1428] sm:$0xf]  ;;  %v10206_v16 = vor.u32 %v11247_v61, %v10205_v63  ;;  %v11211_v2 = vld [vmem:[#allocation8 + $0x1654] sm:$0xf0] }
 0x299   :  { %6328 = vmatpush.bf16.msrb.mxu1 %v9518_v47  ;;  %6341 = vmatpush.bf16.msrb.mxu2 %v9646_v45  ;;  %v11251_v47 = vld [vmem:[#allocation8 + $0x1794] sm:$0xf0]  ;;  %v11329_v45 = vld [vmem:[#allocation10] sm:$0xf]  ;;  %v9917_v25 = vld [vmem:[#allocation8 + $0x1528] sm:$0xf] }
 0x29a   :  { %v10222_v43 = vor.u32 %v11251_v47, %v10221_v33  ;;  %v9901_v33 = vld [vmem:[#allocation8 + $0x1508] sm:$0xf]  ;;  %v11171_v47 = vld [vmem:[#allocation8 + $0x1514] sm:$0xf0] }
 0x29b   :  { %6349 = vmatpush.bf16.msrb.mxu3 %v9854_v60  ;;  %v11179_v60 = vld [vmem:[#allocation8 + $0x1554] sm:$0xf0]  ;;  %v10333_v48 = vld [vmem:[#allocation8 + $0x1868] sm:$0xf] }
 0x29c   :  { %6361 = vmatpush.bf16.msra.mxu0 %v9998_v19  ;;  %6329 = vmatmul.bf16.vlgmr.msrb.gmra.mxu1 %v11762_v50  ;;  %v10093_v19 = vld [vmem:[#allocation8 + $0x1688] sm:$0xf]  ;;  %v6111_v11 = vpop.f32.mrf.mxu0  ;;  %v11279_v49 = vld [vmem:[#allocation8 + $0x1874] sm:$0xf0] }
 0x29d   :  { %6373 = vmatpush.bf16.msra.mxu1 %v10142_v34  ;;  %6386 = vmatpush.bf16.msra.mxu2 %v10270_v41  ;;  %v1507_v34 = vperm.slane %v11329_v45, 2  ;;  %v9933_v41 = vld [vmem:[#allocation8 + $0x1548] sm:$0xf]  ;;  %v10094_v56 = vor.u32 %v11219_v35, %v10093_v19  ;;  %v11139_v35 = vld [vmem:[#allocation8 + $0x1414] sm:$0xf0]  ;;  %v10334_v63 = vor.u32 %v11279_v49, %v10333_v48 }
 0x29e   :  { %6342 = vmatmul.bf16.vlgmr.msrb.gmra.mxu2 %v11764_v59  ;;  %v9934_v28 = vor.u32 %v11179_v60, %v9933_v41  ;;  %v9773_v19 = vld [vmem:[#allocation8 + $0x1408] sm:$0xf]  ;;  %v11203_v11 = vld [vmem:[#allocation8 + $0x1614] sm:$0xf0]  ;;  %v10517_v48 = vld [vmem:[#allocation8 + $0xac] sm:$0xf] }
 0x29f   :  { %6350 = vmatpush.bf16.msrb.mxu3 %v9838_v4  ;;  %v6122_v4 = vpop.f32.mrf.mxu1  ;;  %v9774_v60 = vor.u32 %v11139_v35, %v9773_v19  ;;  %v7583_v35 = vld [vmem:[#allocation8 + $0x2f8] sm:$0xf0] }
 0x2a0   :  { %6362 = vmatpush.bf16.msra.mxu0 %v9982_v5  ;;  %v10077_v5 = vld [vmem:[#allocation8 + $0x1668] sm:$0xf]  ;;  %v7295_v49 = vld [vmem:[#allocation8 + $0xb8] sm:$0xf0] }
 0x2a1   :  { %6374 = vmatpush.bf16.msra.mxu1 %v10126_v30  ;;  %6387 = vmatpush.bf16.msra.mxu2 %v10254_v18  ;;  %v11143_v30 = vld [vmem:[#allocation8 + $0x1434] sm:$0xf0]  ;;  %v6097_v18 = vadd.f32 %v6096_v10, %v1507_v34  ;;  %v10078_v3 = vor.u32 %v11215_v40, %v10077_v5  ;;  %v7327_v34 = vld [vmem:[#allocation8 + $0xf8] sm:$0xf0]  ;;  %v6098_v5 = vpop.f32.mrf.mxu3  ;;  %v9902_v40 = vor.u32 %v11171_v47, %v9901_v33  ;;  %v10173_v10 = vld [vmem:[#allocation8 + $0x1728] sm:$0xf] }
 0x2a2   :  { %v9790_v9 = vor.u32 %v11143_v30, %v9789_v62  ;;  %v10301_v33 = vld [vmem:[#allocation8 + $0x1828] sm:$0xf]  ;;  %v7567_v5 = vld [vmem:[#allocation8 + $0x2d8] sm:$0xf0] }
 0x2a3   :  { %6351 = vmatpush.bf16.msrb.mxu3 %v9822_v54  ;;  %v6110_v20 = vadd.f32 %v6109_v38, %v6097_v18  ;;  %v9918_v54 = vor.u32 %v11175_v8, %v9917_v25  ;;  %v10525_v38 = vld [vmem:[#allocation8 + $0xec] sm:$0xf]  ;;  %v10317_v18 = vld [vmem:[#allocation8 + $0x1848] sm:$0xf] }
 0x2a4   :  { %6363 = vmatpush.bf16.msra.mxu0 %v9966_v12  ;;  %v10061_v12 = vld [vmem:[#allocation8 + $0x1648] sm:$0xf]  ;;  %v7330_v30 = vor.u32 %v10525_v38, %v7327_v34  ;;  %v10521_v8 = vld [vmem:[#allocation8 + $0xcc] sm:$0xf] }
 0x2a5   :  { %6375 = vmatpush.bf16.msra.mxu1 %v10110_v27  ;;  %6388 = vmatpush.bf16.msra.mxu2 %v10238_v15  ;;  %v10189_v27 = vld [vmem:[#allocation8 + $0x1748] sm:$0xf]  ;;  %v11243_v15 = vld [vmem:[#allocation8 + $0x1754] sm:$0xf0]  ;;  %v10062_v45 = vor.u32 %v11211_v2, %v10061_v12  ;;  %v10553_v34 = vld [vmem:[#allocation8 + $0x1cc] sm:$0xf] }
 0x2a6   :  { %v10190_v41 = vor.u32 %v11243_v15, %v10189_v27  ;;  %v10029_v12 = vld [vmem:[#allocation8 + $0x1608] sm:$0xf]  ;;  %v10557_v27 = vld [vmem:[#allocation8 + $0x1ec] sm:$0xf]  ;;  %v7455_v15 = vld [vmem:[#allocation8 + $0x1f8] sm:$0xf0] }
 0x2a7   :  { %6352 = vmatpush.bf16.msrb.mxu3 %v9806_v53  ;;  %v6135_v53 = vpop.f32.mrf.mxu2  ;;  %v6124_v62 = vpop.f32.mrf.mxu1  ;;  %v10030_v47 = vor.u32 %v11203_v11, %v10029_v12  ;;  %v7458_v38 = vor.u32 %v10557_v27, %v7455_v15  ;;  %v7423_v12 = vld [vmem:[#allocation8 + $0x1b8] sm:$0xf0]  ;;  %v10617_v15 = vld [vmem:[#allocation8 + $0x3cc] sm:$0xf] }
 0x2a8   :  { %6364 = vmatpush.bf16.msra.mxu0 %v9950_v52  ;;  %v6123_v52 = vadd.f32 %v6122_v4, %v6110_v20  ;;  %v11275_v4 = vld [vmem:[#allocation8 + $0x1854] sm:$0xf0]  ;;  %v7279_v62 = vld [vmem:[#allocation8 + $0x98] sm:$0xf0] }
 0x2a9   :  { %6376 = vmatpush.bf16.msra.mxu1 %v10094_v56  ;;  %6389 = vmatpush.bf16.msra.mxu2 %v10222_v43  ;;  %v10045_v56 = vld [vmem:[#allocation8 + $0x1628] sm:$0xf]  ;;  %v11207_v43 = vld [vmem:[#allocation8 + $0x1634] sm:$0xf0]  ;;  %v10318_v2 = vor.u32 %v11275_v4, %v10317_v18  ;;  %v7711_v18 = vld [vmem:[#allocation8 + $0x3f8] sm:$0xf0] }
 0x2aa   :  { %v11867_v61 = vadd.f32 %v6135_v53, %v6123_v52  ;;  %v10046_v25 = vor.u32 %v11207_v43, %v10045_v56  ;;  %v11271_v52 = vld [vmem:[#allocation8 + $0x1834] sm:$0xf0]  ;;  %v7439_v43 = vld [vmem:[#allocation8 + $0x1d8] sm:$0xf0]  ;;  %v10585_v53 = vld [vmem:[#allocation8 + $0x2cc] sm:$0xf] }
 0x2ab   :  { %6353 = vmatpush.bf16.msrb.mxu3 %v9790_v9  ;;  %v11235_v9 = vld [vmem:[#allocation8 + $0x1714] sm:$0xf0]  ;;  %v10302_v56 = vor.u32 %v11271_v52, %v10301_v33  ;;  %v7442_v4 = vor.u32 %v10553_v34, %v7439_v43  ;;  %v7263_v27 = vld [vmem:[#allocation8 + $0x78] sm:$0xf0]  ;;  %v10545_v52 = vld [vmem:[#allocation8 + $0x18c] sm:$0xf] }
 0x2ac   :  { %6365 = vmatpush.bf16.msra.mxu0 %v9934_v28  ;;  %v11239_v28 = vld [vmem:[#allocation8 + $0x1734] sm:$0xf0]  ;;  %v10505_v34 = vld [vmem:[#allocation8 + $0x4c] sm:$0xf] }
 0x2ad   :  { %6377 = vmatpush.bf16.msra.mxu1 %v10078_v3  ;;  %6390 = vmatpush.bf16.msra.mxu2 %v10206_v16  ;;  %v7311_v3 = vld [vmem:[#allocation8 + $0xd8] sm:$0xf0]  ;;  %v10174_v20 = vor.u32 %v11239_v28, %v10173_v10  ;;  %v10157_v16 = vld [vmem:[#allocation8 + $0x1708] sm:$0xf]  ;;  %v11267_v10 = vld [vmem:[#allocation8 + $0x1814] sm:$0xf0] }
 0x2ae   :  { %v7314_v19 = vor.u32 %v10521_v8, %v7311_v3  ;;  %v10513_v28 = vld [vmem:[#allocation8 + $0x8c] sm:$0xf] }
 0x2af   :  { %6354 = vmatpush.bf16.msrb.mxu3 %v9774_v60  ;;  %v10549_v3 = vld [vmem:[#allocation8 + $0x1ac] sm:$0xf] }
 0x2b0   :  { %6366 = vmatpush.bf16.msra.mxu0 %v9918_v54  ;;  %v10589_v54 = vld [vmem:[#allocation8 + $0x2ec] sm:$0xf] }
 0x2b1   :  { %6378 = vmatpush.bf16.msra.mxu1 %v10062_v45  ;;  %6391 = vmatpush.bf16.msra.mxu2 %v10190_v41  ;;  %v10158_v45 = vor.u32 %v11235_v9, %v10157_v16  ;;  %v6137_v41 = vpop.f32.mrf.mxu2  ;;  %v7586_v60 = vor.u32 %v10589_v54, %v7583_v35  ;;  %v10581_v16 = vld [vmem:[#allocation8 + $0x2ac] sm:$0xf]  ;;  %v7551_v9 = vld [vmem:[#allocation8 + $0x2b8] sm:$0xf0] }
 0x2b2   :  { %6355 = vmatmul.bf16.vlgmr.msrb.gmra.mxu3 %v11776_v7  ;;  %v7695_v54 = vld [vmem:[#allocation8 + $0x3d8] sm:$0xf0]  ;;  %v7554_v33 = vor.u32 %v10581_v16, %v7551_v9 }
 0x2b3   :  { %6403 = vmatpush.bf16.msra.mxu3 %v10334_v63  ;;  %v10285_v63 = vld [vmem:[#allocation8 + $0x1808] sm:$0xf]  ;;  %v7247_v41 = vld [vmem:[#allocation8 + $0x58] sm:$0xf0] }
 0x2b4   :  { %6367 = vmatpush.bf16.msra.mxu0 %v9902_v40  ;;  %v7298_v40 = vor.u32 %v10517_v48, %v7295_v49  ;;  %v10286_v8 = vor.u32 %v11267_v10, %v10285_v63  ;;  %v6161_v35 = vpop.f32.mrf.mxu0  ;;  %v7698_v49 = vor.u32 %v10617_v15, %v7695_v54  ;;  %v7250_v10 = vor.u32 %v10505_v34, %v7247_v41  ;;  %v10533_v41 = vld [vmem:[#allocation8 + $0x12c] sm:$0xf] }
 0x2b5   :  { %6379 = vmatpush.bf16.msra.mxu1 %v10046_v25  ;;  %6392 = vmatpush.bf16.msra.mxu2 %v10174_v20  ;;  %v7570_v25 = vor.u32 %v10585_v53, %v7567_v5  ;;  %v7282_v20 = vor.u32 %v10513_v28, %v7279_v62  ;;  %v10541_v5 = vld [vmem:[#allocation8 + $0x16c] sm:$0xf]  ;;  %v6148_v63 = vpop.f32.mrf.mxu3 }
 0x2b6   :  { %v10573_v62 = vld [vmem:[#allocation8 + $0x26c] sm:$0xf] }
 0x2b7   :  { %6368 = vmatmul.bf16.vlgmr.msra.gmra.mxu0 %v11778_v14  ;;  %6404 = vmatpush.bf16.msra.mxu3 %v10318_v2  ;;  %v10509_v2 = vld [vmem:[#allocation8 + $0x6c] sm:$0xf] }
 0x2b8   :  { %6412 = vmatpush.bf16.msrb.mxu0 %v7330_v30  ;;  %v10621_v30 = vld [vmem:[#allocation8 + $0x3ec] sm:$0xf]  ;;  %v7266_v48 = vor.u32 %v10509_v2, %v7263_v27  ;;  %v7375_v27 = vld [vmem:[#allocation8 + $0x158] sm:$0xf0] }
 0x2b9   :  { %6380 = vmatpush.bf16.msra.mxu1 %v10030_v47  ;;  %6393 = vmatpush.bf16.msra.mxu2 %v10158_v45  ;;  %v7714_v11 = vor.u32 %v10621_v30, %v7711_v18  ;;  %v7407_v47 = vld [vmem:[#allocation8 + $0x198] sm:$0xf0]  ;;  %v10577_v45 = vld [vmem:[#allocation8 + $0x28c] sm:$0xf] }
 0x2ba   :  { %v7410_v43 = vor.u32 %v10545_v52, %v7407_v47  ;;  %v7519_v30 = vld [vmem:[#allocation8 + $0x278] sm:$0xf0]  ;;  %v10501_v18 = vld [vmem:[#allocation8 + $0x2c] sm:$0xf] }
 0x2bb   :  { %6405 = vmatpush.bf16.msra.mxu3 %v10302_v56  ;;  %v7679_v56 = vld [vmem:[#allocation8 + $0x3b8] sm:$0xf0]  ;;  %v7522_v9 = vor.u32 %v10573_v62, %v7519_v30  ;;  %v10537_v2 = vld [vmem:[#allocation8 + $0x14c] sm:$0xf] }
 0x2bc   :  { %6413 = vmatpush.bf16.msrb.mxu0 %v7314_v19  ;;  %6381 = vmatmul.bf16.vlgmr.msra.gmra.mxu1 %v11782_v44  ;;  %v7426_v19 = vor.u32 %v10549_v3, %v7423_v12  ;;  %v10609_v3 = vld [vmem:[#allocation8 + $0x38c] sm:$0xf]  ;;  %v7663_v12 = vld [vmem:[#allocation8 + $0x398] sm:$0xf0]  ;;  %v6163_v16 = vpop.f32.mrf.mxu0 }
 0x2bd   :  { %6425 = vmatpush.bf16.msrb.mxu1 %v7458_v38  ;;  %6438 = vmatpush.bf16.msrb.mxu2 %v7586_v60  ;;  %v7535_v38 = vld [vmem:[#allocation8 + $0x298] sm:$0xf0]  ;;  %v10613_v60 = vld [vmem:[#allocation8 + $0x3ac] sm:$0xf]  ;;  %v7666_v54 = vor.u32 %v10609_v3, %v7663_v12 }
 0x2be   :  { %6394 = vmatmul.bf16.vlgmr.msra.gmra.mxu2 %v11784_v24  ;;  %v7538_v53 = vor.u32 %v10577_v45, %v7535_v38  ;;  %v7682_v28 = vor.u32 %v10613_v60, %v7679_v56  ;;  %v7215_v47 = vld [vmem:[#allocation8 + $0x18] sm:$0xf0]  ;;  %v7378_v45 = vor.u32 %v10537_v2, %v7375_v27  ;;  %v10653_v38 = vld [vmem:[#allocation8 + $0x4ec] sm:$0xf] }
 0x2bf   :  { %6406 = vmatpush.bf16.msra.mxu3 %v10286_v8  ;;  %v7231_v8 = vld [vmem:[#allocation8 + $0x38] sm:$0xf0]  ;;  %v10601_v30 = vld [vmem:[#allocation8 + $0x34c] sm:$0xf] }
 0x2c0   :  { %6414 = vmatpush.bf16.msrb.mxu0 %v7298_v40  ;;  %v7391_v40 = vld [vmem:[#allocation8 + $0x178] sm:$0xf0]  ;;  %v7234_v15 = vor.u32 %v10501_v18, %v7231_v8  ;;  %v10529_v3 = vld [vmem:[#allocation8 + $0x10c] sm:$0xf] }
 0x2c1   :  { %6426 = vmatpush.bf16.msrb.mxu1 %v7442_v4  ;;  %6439 = vmatpush.bf16.msrb.mxu2 %v7570_v25  ;;  %v6149_v4 = vadd.f32 %v6148_v63, %v11867_v61  ;;  %v6174_v25 = vpop.f32.mrf.mxu1  ;;  %v10569_v61 = vld [vmem:[#allocation8 + $0x24c] sm:$0xf]  ;;  %v7359_v60 = vld [vmem:[#allocation8 + $0x138] sm:$0xf0]  ;;  %v6187_v56 = vpop.f32.mrf.mxu2 }
 0x2c2   :  { %10341 = vmatmul.msk.bf16.vlgmr.msra.gmra.mxu3 %vm5433_vm1, %v11789_v46  ;;  %v7487_v63 = vld [vmem:[#allocation8 + $0x238] sm:$0xf0]  ;;  %v10685_v2 = vld [vmem:[#allocation8 + $0x5ec] sm:$0xf] }
 0x2c3   :  { %6451 = vmatpush.bf16.msrb.mxu3 %v7714_v11  ;;  %v6162_v11 = vadd.f32 %v6161_v35, %v6149_v4  ;;  %v7839_v35 = vld [vmem:[#allocation8 + $0x4f8] sm:$0xf0]  ;;  %v7362_v4 = vor.u32 %v10533_v41, %v7359_v60 }
 0x2c4   :  { %6415 = vmatpush.bf16.msrb.mxu0 %v7282_v20  ;;  %v7394_v20 = vor.u32 %v10541_v5, %v7391_v40  ;;  %v10565_v40 = vld [vmem:[#allocation8 + $0x22c] sm:$0xf]  ;;  %v7842_v62 = vor.u32 %v10653_v38, %v7839_v35  ;;  %v7631_v18 = vld [vmem:[#allocation8 + $0x358] sm:$0xf0] }
 0x2c5   :  { %6427 = vmatpush.bf16.msrb.mxu1 %v7426_v19  ;;  %6440 = vmatpush.bf16.msrb.mxu2 %v7554_v33  ;;  %v7503_v19 = vld [vmem:[#allocation8 + $0x258] sm:$0xf0]  ;;  %v10497_v33 = vld [vmem:[#allocation8 + $0xc] sm:$0xf]  ;;  %v6175_v52 = vadd.f32 %v6174_v25, %v6162_v11  ;;  %v7490_v12 = vor.u32 %v10565_v40, %v7487_v63 }
 0x2c6   :  { %v7506_v34 = vor.u32 %v10569_v61, %v7503_v19  ;;  %v10649_v25 = vld [vmem:[#allocation8 + $0x4cc] sm:$0xf]  ;;  %v7823_v8 = vld [vmem:[#allocation8 + $0x4d8] sm:$0xf0] }
 0x2c7   :  { %6452 = vmatpush.bf16.msrb.mxu3 %v7698_v49  ;;  %v7647_v49 = vld [vmem:[#allocation8 + $0x378] sm:$0xf0]  ;;  %v10561_v11 = vld [vmem:[#allocation8 + $0x20c] sm:$0xf] }
 0x2c8   :  { %6416 = vmatpush.bf16.msrb.mxu0 %v7266_v48  ;;  %v10605_v48 = vld [vmem:[#allocation8 + $0x36c] sm:$0xf]  ;;  %v7471_v16 = vld [vmem:[#allocation8 + $0x218] sm:$0xf0] }
 0x2c9   :  { %6428 = vmatpush.bf16.msrb.mxu1 %v7410_v43  ;;  %6441 = vmatpush.bf16.msrb.mxu2 %v7538_v53  ;;  %v6150_v43 = vpop.f32.mrf.mxu3  ;;  %v7218_v53 = vor.u32 %v10497_v33, %v7215_v47  ;;  %v7650_v5 = vor.u32 %v10605_v48, %v7647_v49  ;;  %v7967_v27 = vld [vmem:[#allocation8 + $0x5f8] sm:$0xf0]  ;;  %v10597_v19 = vld [vmem:[#allocation8 + $0x32c] sm:$0xf]  ;;  %v7474_v49 = vor.u32 %v10561_v11, %v7471_v16  ;;  %v6189_v35 = vpop.f32.mrf.mxu2 }
 0x2ca   :  { %v8095_v61 = vld [vmem:[#allocation8 + $0x6f8] sm:$0xf0]  ;;  %v10645_v47 = vld [vmem:[#allocation8 + $0x4ac] sm:$0xf] }
 0x2cb   :  { %6453 = vmatpush.bf16.msrb.mxu3 %v7682_v28  ;;  %v6176_v28 = vpop.f32.mrf.mxu1  ;;  %v7615_v33 = vld [vmem:[#allocation8 + $0x338] sm:$0xf0]  ;;  %v10681_v38 = vld [vmem:[#allocation8 + $0x5cc] sm:$0xf] }
 0x2cc   :  { %6417 = vmatpush.bf16.msrb.mxu0 %v7250_v10  ;;  %v11876_v10 = vadd.f32 %v6187_v56, %v6175_v52  ;;  %v7807_v48 = vld [vmem:[#allocation8 + $0x4b8] sm:$0xf0]  ;;  %v7618_v41 = vor.u32 %v10597_v19, %v7615_v33  ;;  %v10713_v56 = vld [vmem:[#allocation8 + $0x6cc] sm:$0xf] }
 0x2cd   :  { %6429 = vmatpush.bf16.msrb.mxu1 %v7394_v20  ;;  %6442 = vmatpush.bf16.msrb.mxu2 %v7522_v9  ;;  %v7343_v20 = vld [vmem:[#allocation8 + $0x118] sm:$0xf0]  ;;  %v7634_v9 = vor.u32 %v10601_v30, %v7631_v18  ;;  %v10641_v63 = vld [vmem:[#allocation8 + $0x48c] sm:$0xf] }
 0x2ce   :  { %v7346_v52 = vor.u32 %v10529_v3, %v7343_v20  ;;  %v7951_v60 = vld [vmem:[#allocation8 + $0x5d8] sm:$0xf0]  ;;  %v10709_v20 = vld [vmem:[#allocation8 + $0x6ac] sm:$0xf] }
 0x2cf   :  { %6454 = vmatpush.bf16.msrb.mxu3 %v7666_v54  ;;  %v7826_v54 = vor.u32 %v10649_v25, %v7823_v8  ;;  %v8079_v43 = vld [vmem:[#allocation8 + $0x6d8] sm:$0xf0]  ;;  %v7954_v30 = vor.u32 %v10681_v38, %v7951_v60  ;;  %v10677_v25 = vld [vmem:[#allocation8 + $0x5ac] sm:$0xf] }
 0x2d0   :  { %6418 = vmatpush.bf16.msrb.mxu0 %v7234_v15  ;;  %v10717_v15 = vld [vmem:[#allocation8 + $0x6ec] sm:$0xf]  ;;  %v7599_v40 = vld [vmem:[#allocation8 + $0x318] sm:$0xf0]  ;;  %v8082_v18 = vor.u32 %v10713_v56, %v8079_v43 }
 0x2d1   :  { %6430 = vmatpush.bf16.msrb.mxu1 %v7378_v45  ;;  %6443 = vmatpush.bf16.msrb.mxu2 %v7506_v34  ;;  %v7970_v45 = vor.u32 %v10685_v2, %v7967_v27  ;;  %v8098_v34 = vor.u32 %v10717_v15, %v8095_v61  ;;  %v7791_v28 = vld [vmem:[#allocation8 + $0x498] sm:$0xf0]  ;;  %v10637_v16 = vld [vmem:[#allocation8 + $0x46c] sm:$0xf] }
 0x2d2   :  { %v7935_v8 = vld [vmem:[#allocation8 + $0x5b8] sm:$0xf0]  ;;  %v7794_v3 = vor.u32 %v10641_v63, %v7791_v28  ;;  %v10745_v2 = vld [vmem:[#allocation8 + $0x7cc] sm:$0xf] }
 0x2d3   :  { %6455 = vmatpush.bf16.msrb.mxu3 %v7650_v5  ;;  %v10593_v5 = vld [vmem:[#allocation8 + $0x30c] sm:$0xf]  ;;  %v8063_v11 = vld [vmem:[#allocation8 + $0x6b8] sm:$0xf0]  ;;  %v7938_v15 = vor.u32 %v10677_v25, %v7935_v8 }
 0x2d4   :  { %6419 = vmatpush.bf16.msrb.mxu0 %v7218_v53  ;;  %v7810_v53 = vor.u32 %v10645_v47, %v7807_v48  ;;  %v8207_v27 = vld [vmem:[#allocation8 + $0x7d8] sm:$0xf0]  ;;  %v8066_v61 = vor.u32 %v10709_v20, %v8063_v11  ;;  %v10673_v19 = vld [vmem:[#allocation8 + $0x58c] sm:$0xf] }
 0x2d5   :  { %6431 = vmatpush.bf16.msrb.mxu1 %v7362_v4  ;;  %6444 = vmatpush.bf16.msrb.mxu2 %v7490_v12  ;;  %v7602_v4 = vor.u32 %v10593_v5, %v7599_v40  ;;  %v7919_v33 = vld [vmem:[#allocation8 + $0x598] sm:$0xf0]  ;;  %v10705_v47 = vld [vmem:[#allocation8 + $0x68c] sm:$0xf]  ;;  %v6200_v56 = vpop.f32.mrf.mxu3 }
 0x2d6   :  { %v8047_v48 = vld [vmem:[#allocation8 + $0x698] sm:$0xf0]  ;;  %v7922_v35 = vor.u32 %v10673_v19, %v7919_v33  ;;  %v10701_v5 = vld [vmem:[#allocation8 + $0x66c] sm:$0xf]  ;;  %v6201_v28 = vadd.f32 %v6200_v56, %v11876_v10 }
 0x2d7   :  { %6420 = vmatmul.bf16.vlgmr.msrb.gmra.mxu0 %v11666_v26  ;;  %6456 = vmatpush.bf16.msrb.mxu3 %v7634_v9  ;;  %v8223_v26 = vld [vmem:[#allocation8 + $0x7f8] sm:$0xf0]  ;;  %v10629_v63 = vld [vmem:[#allocation8 + $0x42c] sm:$0xf] }
 0x2d8   :  { %6464 = vmatpush.bf16.msra.mxu0 %v7842_v62  ;;  %v10749_v62 = vld [vmem:[#allocation8 + $0x7ec] sm:$0xf]  ;;  %v7775_v9 = vld [vmem:[#allocation8 + $0x478] sm:$0xf0] }
 0x2d9   :  { %6432 = vmatpush.bf16.msrb.mxu1 %v7346_v52  ;;  %6445 = vmatpush.bf16.msrb.mxu2 %v7474_v49  ;;  %v8226_v12 = vor.u32 %v10749_v62, %v8223_v26  ;;  %v8210_v52 = vor.u32 %v10745_v2, %v8207_v27  ;;  %v10633_v49 = vld [vmem:[#allocation8 + $0x44c] sm:$0xf]  ;;  %v8191_v38 = vld [vmem:[#allocation8 + $0x7b8] sm:$0xf0]  ;;  %v6226_v62 = vpop.f32.mrf.mxu1 }
 0x2da   :  { %v7903_v60 = vld [vmem:[#allocation8 + $0x578] sm:$0xf0]  ;;  %v10625_v2 = vld [vmem:[#allocation8 + $0x40c] sm:$0xf] }
 0x2db   :  { %6457 = vmatpush.bf16.msrb.mxu3 %v7618_v41  ;;  %v10669_v41 = vld [vmem:[#allocation8 + $0x56c] sm:$0xf]  ;;  %v8031_v40 = vld [vmem:[#allocation8 + $0x678] sm:$0xf0] }
 0x2dc   :  { %6465 = vmatpush.bf16.msra.mxu0 %v7826_v54  ;;  %6433 = vmatmul.bf16.vlgmr.msrb.gmra.mxu1 %v11668_v32  ;;  %v6213_v54 = vpop.f32.mrf.mxu0  ;;  %v7778_v32 = vor.u32 %v10637_v16, %v7775_v9  ;;  %v7743_v26 = vld [vmem:[#allocation8 + $0x438] sm:$0xf0]  ;;  %v8034_v8 = vor.u32 %v10701_v5, %v8031_v40  ;;  %v10697_v16 = vld [vmem:[#allocation8 + $0x64c] sm:$0xf] }
 0x2dd   :  { %6477 = vmatpush.bf16.msra.mxu1 %v7970_v45  ;;  %6490 = vmatpush.bf16.msra.mxu2 %v8098_v34  ;;  %v7759_v45 = vld [vmem:[#allocation8 + $0x458] sm:$0xf0]  ;;  %v8050_v34 = vor.u32 %v10705_v47, %v8047_v48  ;;  %v7746_v20 = vor.u32 %v10629_v63, %v7743_v26  ;;  %v10781_v33 = vld [vmem:[#allocation8 + $0x8ec] sm:$0xf] }
 0x2de   :  { %6446 = vmatmul.bf16.vlgmr.msrb.gmra.mxu2 %v11673_v57  ;;  %v10741_v57 = vld [vmem:[#allocation8 + $0x7ac] sm:$0xf]  ;;  %v7762_v43 = vor.u32 %v10633_v49, %v7759_v45  ;;  %v8015_v9 = vld [vmem:[#allocation8 + $0x658] sm:$0xf0]  ;;  %v6202_v49 = vpop.f32.mrf.mxu3 }
 0x2df   :  { %6458 = vmatpush.bf16.msrb.mxu3 %v7602_v4  ;;  %v6214_v4 = vadd.f32 %v6213_v54, %v6201_v28  ;;  %v7727_v27 = vld [vmem:[#allocation8 + $0x418] sm:$0xf0]  ;;  %v10729_v56 = vld [vmem:[#allocation8 + $0x74c] sm:$0xf] }
 0x2e0   :  { %6466 = vmatpush.bf16.msra.mxu0 %v7810_v53  ;;  %v8194_v53 = vor.u32 %v10741_v57, %v8191_v38  ;;  %v8351_v54 = vld [vmem:[#allocation8 + $0x8f8] sm:$0xf0]  ;;  %v7730_v45 = vor.u32 %v10625_v2, %v7727_v27  ;;  %v10693_v38 = vld [vmem:[#allocation8 + $0x62c] sm:$0xf] }
 0x2e1   :  { %6478 = vmatpush.bf16.msra.mxu1 %v7954_v30  ;;  %6491 = vmatpush.bf16.msra.mxu2 %v8082_v18  ;;  %v10737_v30 = vld [vmem:[#allocation8 + $0x78c] sm:$0xf]  ;;  %v7906_v18 = vor.u32 %v10669_v41, %v7903_v60  ;;  %v6227_v10 = vadd.f32 %v6226_v62, %v6214_v4  ;;  %v7871_v47 = vld [vmem:[#allocation8 + $0x538] sm:$0xf0]  ;;  %v6239_v48 = vpop.f32.mrf.mxu2  ;;  %v6228_v41 = vpop.f32.mrf.mxu1  ;;  %v8354_v60 = vor.u32 %v10781_v33, %v8351_v54 }
 0x2e2   :  { %6459 = vmatmul.bf16.vlgmr.msrb.gmra.mxu3 %v11675_v0  ;;  %v8175_v0 = vld [vmem:[#allocation8 + $0x798] sm:$0xf0]  ;;  %v10777_v5 = vld [vmem:[#allocation8 + $0x8cc] sm:$0xf] }
 0x2e3   :  { %6503 = vmatpush.bf16.msra.mxu3 %v8226_v12  ;;  %v7887_v12 = vld [vmem:[#allocation8 + $0x558] sm:$0xf0]  ;;  %v8178_v11 = vor.u32 %v10737_v30, %v8175_v0  ;;  %v10657_v63 = vld [vmem:[#allocation8 + $0x50c] sm:$0xf] }
 0x2e4   :  { %6467 = vmatpush.bf16.msra.mxu0 %v7794_v3  ;;  %v6215_v25 = vpop.f32.mrf.mxu0  ;;  %v10665_v3 = vld [vmem:[#allocation8 + $0x54c] sm:$0xf]  ;;  %v8335_v40 = vld [vmem:[#allocation8 + $0x8d8] sm:$0xf0] }
 0x2e5   :  { %6479 = vmatpush.bf16.msra.mxu1 %v7938_v15  ;;  %6492 = vmatpush.bf16.msra.mxu2 %v8066_v61  ;;  %v10733_v15 = vld [vmem:[#allocation8 + $0x76c] sm:$0xf]  ;;  %v8159_v61 = vld [vmem:[#allocation8 + $0x778] sm:$0xf0]  ;;  %v7890_v19 = vor.u32 %v10665_v3, %v7887_v12 }
 0x2e6   :  { %v8162_v57 = vor.u32 %v10733_v15, %v8159_v61  ;;  %v7855_v62 = vld [vmem:[#allocation8 + $0x518] sm:$0xf0]  ;;  %v10689_v26 = vld [vmem:[#allocation8 + $0x60c] sm:$0xf] }
 0x2e7   :  { %6504 = vmatpush.bf16.msra.mxu3 %v8210_v52  ;;  %v10661_v52 = vld [vmem:[#allocation8 + $0x52c] sm:$0xf]  ;;  %v7983_v30 = vld [vmem:[#allocation8 + $0x618] sm:$0xf0] }
 0x2e8   :  { %6468 = vmatpush.bf16.msra.mxu0 %v7778_v32  ;;  %v8018_v32 = vor.u32 %v10697_v16, %v8015_v9  ;;  %v8479_v4 = vld [vmem:[#allocation8 + $0x9f8] sm:$0xf0]  ;;  %v10845_v25 = vld [vmem:[#allocation8 + $0xaec] sm:$0xf]  ;;  %v7986_v2 = vor.u32 %v10689_v26, %v7983_v30 }
 0x2e9   :  { %6480 = vmatpush.bf16.msra.mxu1 %v7922_v35  ;;  %6493 = vmatpush.bf16.msra.mxu2 %v8050_v34  ;;  %v7999_v35 = vld [vmem:[#allocation8 + $0x638] sm:$0xf0]  ;;  %v11883_v34 = vadd.f32 %v6239_v48, %v6227_v10  ;;  %v10725_v12 = vld [vmem:[#allocation8 + $0x72c] sm:$0xf]  ;;  %v6241_v15 = vpop.f32.mrf.mxu2 }
 0x2ea   :  { %v8002_v28 = vor.u32 %v10693_v38, %v7999_v35  ;;  %v8607_v3 = vld [vmem:[#allocation8 + $0xaf8] sm:$0xf0]  ;;  %v10773_v16 = vld [vmem:[#allocation8 + $0x8ac] sm:$0xf] }
 0x2eb   :  { %6505 = vmatpush.bf16.msra.mxu3 %v8194_v53  ;;  %v7874_v53 = vor.u32 %v10661_v52, %v7871_v47  ;;  %v8319_v9 = vld [vmem:[#allocation8 + $0x8b8] sm:$0xf0]  ;;  %v10809_v27 = vld [vmem:[#allocation8 + $0x9cc] sm:$0xf]  ;;  %v8610_v61 = vor.u32 %v10845_v25, %v8607_v3 }
 0x2ec   :  { %6469 = vmatpush.bf16.msra.mxu0 %v7762_v43  ;;  %v8143_v43 = vld [vmem:[#allocation8 + $0x758] sm:$0xf0]  ;;  %v10841_v54 = vld [vmem:[#allocation8 + $0xacc] sm:$0xf]  ;;  %v8322_v52 = vor.u32 %v10773_v16, %v8319_v9 }
 0x2ed   :  { %6481 = vmatpush.bf16.msra.mxu1 %v7906_v18  ;;  %6494 = vmatpush.bf16.msra.mxu2 %v8034_v8  ;;  %v8146_v0 = vor.u32 %v10729_v56, %v8143_v43  ;;  %v10813_v18 = vld [vmem:[#allocation8 + $0x9ec] sm:$0xf]  ;;  %v8338_v8 = vor.u32 %v10777_v5, %v8335_v40  ;;  %v8463_v33 = vld [vmem:[#allocation8 + $0x9d8] sm:$0xf0] }
 0x2ee   :  { %v8482_v10 = vor.u32 %v10813_v18, %v8479_v4  ;;  %v10721_v47 = vld [vmem:[#allocation8 + $0x70c] sm:$0xf]  ;;  %v8111_v48 = vld [vmem:[#allocation8 + $0x718] sm:$0xf0]  ;;  %v8466_v38 = vor.u32 %v10809_v27, %v8463_v33 }
 0x2ef   :  { %6506 = vmatpush.bf16.msra.mxu3 %v8178_v11  ;;  %v7858_v11 = vor.u32 %v10657_v63, %v7855_v62  ;;  %v10769_v49 = vld [vmem:[#allocation8 + $0x88c] sm:$0xf]  ;;  %v8114_v41 = vor.u32 %v10721_v47, %v8111_v48  ;;  %v8447_v56 = vld [vmem:[#allocation8 + $0x9b8] sm:$0xf0] }
 0x2f0   :  { %6470 = vmatpush.bf16.msra.mxu0 %v7746_v20  ;;  %v8127_v20 = vld [vmem:[#allocation8 + $0x738] sm:$0xf0]  ;;  %v10837_v5 = vld [vmem:[#allocation8 + $0xaac] sm:$0xf] }
 0x2f1   :  { %6482 = vmatpush.bf16.msra.mxu1 %v7890_v19  ;;  %6495 = vmatpush.bf16.msra.mxu2 %v8018_v32  ;;  %v8130_v19 = vor.u32 %v10725_v12, %v8127_v20  ;;  %v8591_v32 = vld [vmem:[#allocation8 + $0xad8] sm:$0xf0]  ;;  %v10765_v63 = vld [vmem:[#allocation8 + $0x86c] sm:$0xf] }
 0x2f2   :  { %v8594_v35 = vor.u32 %v10841_v54, %v8591_v32  ;;  %v8575_v40 = vld [vmem:[#allocation8 + $0xab8] sm:$0xf0]  ;;  %v10873_v62 = vld [vmem:[#allocation8 + $0xbcc] sm:$0xf] }
 0x2f3   :  { %6507 = vmatpush.bf16.msra.mxu3 %v8162_v57  ;;  %v10877_v57 = vld [vmem:[#allocation8 + $0xbec] sm:$0xf]  ;;  %v8719_v26 = vld [vmem:[#allocation8 + $0xbd8] sm:$0xf0]  ;;  %v8578_v18 = vor.u32 %v10837_v5, %v8575_v40 }
 0x2f4   :  { %6471 = vmatpush.bf16.msra.mxu0 %v7730_v45  ;;  %v8303_v45 = vld [vmem:[#allocation8 + $0x898] sm:$0xf0]  ;;  %v10801_v4 = vld [vmem:[#allocation8 + $0x98c] sm:$0xf] }
 0x2f5   :  { %6483 = vmatpush.bf16.msra.mxu1 %v7874_v53  ;;  %6496 = vmatpush.bf16.msra.mxu2 %v8002_v28  ;;  %v8306_v43 = vor.u32 %v10769_v49, %v8303_v45  ;;  %v8287_v28 = vld [vmem:[#allocation8 + $0x878] sm:$0xf0]  ;;  %v10833_v3 = vld [vmem:[#allocation8 + $0xa8c] sm:$0xf]  ;;  %v6252_v15 = vpop.f32.mrf.mxu3 }
 0x2f6   :  { %v8431_v25 = vld [vmem:[#allocation8 + $0x998] sm:$0xf0]  ;;  %v10761_v20 = vld [vmem:[#allocation8 + $0x84c] sm:$0xf] }
 0x2f7   :  { %6472 = vmatmul.bf16.vlgmr.msra.gmra.mxu0 %v11681_v36  ;;  %6508 = vmatpush.bf16.msra.mxu3 %v8146_v0  ;;  %v8735_v36 = vld [vmem:[#allocation8 + $0xbf8] sm:$0xf0]  ;;  %v6265_v0 = vpop.f32.mrf.mxu0  ;;  %v8434_v9 = vor.u32 %v10801_v4, %v8431_v25  ;;  %v10829_v33 = vld [vmem:[#allocation8 + $0xa6c] sm:$0xf] }
 0x2f8   :  { %6516 = vmatpush.bf16.msrb.mxu0 %v8354_v60  ;;  %v10805_v60 = vld [vmem:[#allocation8 + $0x9ac] sm:$0xf]  ;;  %v8738_v53 = vor.u32 %v10877_v57, %v8735_v36  ;;  %v8559_v12 = vld [vmem:[#allocation8 + $0xa98] sm:$0xf0] }
 0x2f9   :  { %6484 = vmatpush.bf16.msra.mxu1 %v7858_v11  ;;  %6497 = vmatpush.bf16.msra.mxu2 %v7986_v2  ;;  %v8450_v30 = vor.u32 %v10805_v60, %v8447_v56  ;;  %v8271_v11 = vld [vmem:[#allocation8 + $0x858] sm:$0xf0]  ;;  %v8562_v2 = vor.u32 %v10833_v3, %v8559_v12  ;;  %v10757_v32 = vld [vmem:[#allocation8 + $0x82c] sm:$0xf]  ;;  %v6278_v47 = vpop.f32.mrf.mxu1 }
 0x2fa   :  { %v8703_v16 = vld [vmem:[#allocation8 + $0xbb8] sm:$0xf0]  ;;  %v10865_v49 = vld [vmem:[#allocation8 + $0xb8c] sm:$0xf] }
 0x2fb   :  { %6509 = vmatpush.bf16.msra.mxu3 %v8130_v19  ;;  %v8415_v27 = vld [vmem:[#allocation8 + $0x978] sm:$0xf0]  ;;  %v10753_v5 = vld [vmem:[#allocation8 + $0x80c] sm:$0xf] }
 0x2fc   :  { %6517 = vmatpush.bf16.msrb.mxu0 %v8338_v8  ;;  %6485 = vmatmul.bf16.vlgmr.msra.gmra.mxu1 %v11684_v42  ;;  %v8290_v42 = vor.u32 %v10765_v63, %v8287_v28  ;;  %v8722_v8 = vor.u32 %v10873_v62, %v8719_v26  ;;  %v8543_v54 = vld [vmem:[#allocation8 + $0xa78] sm:$0xf0]  ;;  %v10861_v63 = vld [vmem:[#allocation8 + $0xb6c] sm:$0xf] }
 0x2fd   :  { %6529 = vmatpush.bf16.msrb.mxu1 %v8482_v10  ;;  %6542 = vmatpush.bf16.msrb.mxu2 %v8610_v61  ;;  %v10797_v10 = vld [vmem:[#allocation8 + $0x96c] sm:$0xf]  ;;  %v8274_v61 = vor.u32 %v10761_v20, %v8271_v11  ;;  %v8255_v48 = vld [vmem:[#allocation8 + $0x838] sm:$0xf0] }
 0x2fe   :  { %6498 = vmatmul.bf16.vlgmr.msra.gmra.mxu2 %v11690_v6  ;;  %v10869_v6 = vld [vmem:[#allocation8 + $0xbac] sm:$0xf]  ;;  %v8418_v45 = vor.u32 %v10797_v10, %v8415_v27  ;;  %v8258_v60 = vor.u32 %v10757_v32, %v8255_v48  ;;  %v8239_v40 = vld [vmem:[#allocation8 + $0x818] sm:$0xf0] }
 0x2ff   :  { %6510 = vmatpush.bf16.msra.mxu3 %v8114_v41  ;;  %v8706_v19 = vor.u32 %v10869_v6, %v8703_v16  ;;  %v6267_v36 = vpop.f32.mrf.mxu0  ;;  %v8399_v41 = vld [vmem:[#allocation8 + $0x958] sm:$0xf0]  ;;  %v10909_v26 = vld [vmem:[#allocation8 + $0xcec] sm:$0xf] }
 0x300   :  { %6518 = vmatpush.bf16.msrb.mxu0 %v8322_v52  ;;  %v6253_v52 = vadd.f32 %v6252_v15, %v11883_v34  ;;  %v8671_v28 = vld [vmem:[#allocation8 + $0xb78] sm:$0xf0]  ;;  %v10821_v12 = vld [vmem:[#allocation8 + $0xa2c] sm:$0xf] }
 0x301   :  { %6530 = vmatpush.bf16.msrb.mxu1 %v8466_v38  ;;  %6543 = vmatpush.bf16.msrb.mxu2 %v8594_v35  ;;  %v8546_v38 = vor.u32 %v10829_v33, %v8543_v54  ;;  %v10793_v35 = vld [vmem:[#allocation8 + $0x94c] sm:$0xf]  ;;  %v8383_v4 = vld [vmem:[#allocation8 + $0x938] sm:$0xf0]  ;;  %v6291_v25 = vpop.f32.mrf.mxu2  ;;  %v8674_v3 = vor.u32 %v10861_v63, %v8671_v28  ;;  %v6280_v6 = vpop.f32.mrf.mxu1 }
 0x302   :  { %6511 = vmatmul.bf16.vlgmr.msra.gmra.mxu3 %v11694_v13  ;;  %v8687_v13 = vld [vmem:[#allocation8 + $0xb98] sm:$0xf0]  ;;  %v6266_v57 = vadd.f32 %v6265_v0, %v6253_v52  ;;  %v8402_v62 = vor.u32 %v10793_v35, %v8399_v41  ;;  %v10905_v27 = vld [vmem:[#allocation8 + $0xccc] sm:$0xf] }
 0x303   :  { %6555 = vmatpush.bf16.msrb.mxu3 %v8738_v53  ;;  %v8690_v56 = vor.u32 %v10865_v49, %v8687_v13  ;;  %v8527_v53 = vld [vmem:[#allocation8 + $0xa58] sm:$0xf0]  ;;  %v10817_v54 = vld [vmem:[#allocation8 + $0xa0c] sm:$0xf] }
 0x304   :  { %6519 = vmatpush.bf16.msrb.mxu0 %v8306_v43  ;;  %v10825_v43 = vld [vmem:[#allocation8 + $0xa4c] sm:$0xf]  ;;  %v6279_v34 = vadd.f32 %v6278_v47, %v6266_v57  ;;  %v8511_v20 = vld [vmem:[#allocation8 + $0xa38] sm:$0xf0] }
 0x305   :  { %6531 = vmatpush.bf16.msrb.mxu1 %v8450_v30  ;;  %6544 = vmatpush.bf16.msrb.mxu2 %v8578_v18  ;;  %v8863_v30 = vld [vmem:[#allocation8 + $0xcf8] sm:$0xf0]  ;;  %v8530_v0 = vor.u32 %v10825_v43, %v8527_v53  ;;  %v10789_v18 = vld [vmem:[#allocation8 + $0x92c] sm:$0xf] }
 0x306   :  { %v11890_v11 = vadd.f32 %v6291_v25, %v6279_v34  ;;  %v8866_v16 = vor.u32 %v10909_v26, %v8863_v30  ;;  %v8386_v10 = vor.u32 %v10789_v18, %v8383_v4  ;;  %v8847_v15 = vld [vmem:[#allocation8 + $0xcd8] sm:$0xf0]  ;;  %v10941_v47 = vld [vmem:[#allocation8 + $0xdec] sm:$0xf] }
 0x307   :  { %6556 = vmatpush.bf16.msrb.mxu3 %v8722_v8  ;;  %v8242_v8 = vor.u32 %v10753_v5, %v8239_v40  ;;  %v8367_v33 = vld [vmem:[#allocation8 + $0x918] sm:$0xf0]  ;;  %v10973_v49 = vld [vmem:[#allocation8 + $0xeec] sm:$0xf]  ;;  %v8850_v13 = vor.u32 %v10905_v27, %v8847_v15 }
 0x308   :  { %6520 = vmatpush.bf16.msrb.mxu0 %v8290_v42  ;;  %v6254_v42 = vpop.f32.mrf.mxu3  ;;  %v8495_v32 = vld [vmem:[#allocation8 + $0xa18] sm:$0xf0]  ;;  %v10853_v57 = vld [vmem:[#allocation8 + $0xb2c] sm:$0xf] }
 0x309   :  { %6532 = vmatpush.bf16.msrb.mxu1 %v8434_v9  ;;  %6545 = vmatpush.bf16.msrb.mxu2 %v8562_v2  ;;  %v10857_v9 = vld [vmem:[#allocation8 + $0xb4c] sm:$0xf]  ;;  %v8655_v2 = vld [vmem:[#allocation8 + $0xb58] sm:$0xf0]  ;;  %v6293_v53 = vpop.f32.mrf.mxu2 }
 0x30a   :  { %v8658_v52 = vor.u32 %v10857_v9, %v8655_v2  ;;  %v8991_v48 = vld [vmem:[#allocation8 + $0xdf8] sm:$0xf0]  ;;  %v10901_v35 = vld [vmem:[#allocation8 + $0xcac] sm:$0xf] }
 0x30b   :  { %6557 = vmatpush.bf16.msrb.mxu3 %v8706_v19  ;;  %v8514_v19 = vor.u32 %v10821_v12, %v8511_v20  ;;  %v8639_v36 = vld [vmem:[#allocation8 + $0xb38] sm:$0xf0]  ;;  %v10937_v43 = vld [vmem:[#allocation8 + $0xdcc] sm:$0xf] }
 0x30c   :  { %6521 = vmatpush.bf16.msrb.mxu0 %v8274_v61  ;;  %v10785_v61 = vld [vmem:[#allocation8 + $0x90c] sm:$0xf]  ;;  %v8831_v41 = vld [vmem:[#allocation8 + $0xcb8] sm:$0xf0]  ;;  %v8642_v34 = vor.u32 %v10853_v57, %v8639_v36 }
 0x30d   :  { %6533 = vmatpush.bf16.msrb.mxu1 %v8418_v45  ;;  %6546 = vmatpush.bf16.msrb.mxu2 %v8546_v38  ;;  %v9119_v45 = vld [vmem:[#allocation8 + $0xef8] sm:$0xf0]  ;;  %v8370_v38 = vor.u32 %v10785_v61, %v8367_v33  ;;  %v10969_v63 = vld [vmem:[#allocation8 + $0xecc] sm:$0xf] }
 0x30e   :  { %v9122_v5 = vor.u32 %v10973_v49, %v9119_v45  ;;  %v8975_v40 = vld [vmem:[#allocation8 + $0xdd8] sm:$0xf0]  ;;  %v10849_v26 = vld [vmem:[#allocation8 + $0xb0c] sm:$0xf] }
 0x30f   :  { %6558 = vmatpush.bf16.msrb.mxu3 %v8690_v56  ;;  %v8994_v56 = vor.u32 %v10941_v47, %v8991_v48  ;;  %v9103_v28 = vld [vmem:[#allocation8 + $0xed8] sm:$0xf0]  ;;  %v11005_v4 = vld [vmem:[#allocation8 + $0xfec] sm:$0xf]  ;;  %v8978_v25 = vor.u32 %v10937_v43, %v8975_v40 }
 0x310   :  { %6522 = vmatpush.bf16.msrb.mxu0 %v8258_v60  ;;  %v8498_v60 = vor.u32 %v10817_v54, %v8495_v32  ;;  %v8623_v30 = vld [vmem:[#allocation8 + $0xb18] sm:$0xf0]  ;;  %v9106_v42 = vor.u32 %v10969_v63, %v9103_v28  ;;  %v10893_v2 = vld [vmem:[#allocation8 + $0xc6c] sm:$0xf] }
 0x311   :  { %6534 = vmatpush.bf16.msrb.mxu1 %v8402_v62  ;;  %6547 = vmatpush.bf16.msrb.mxu2 %v8530_v0  ;;  %v8834_v62 = vor.u32 %v10901_v35, %v8831_v41  ;;  %v10897_v0 = vld [vmem:[#allocation8 + $0xc8c] sm:$0xf]  ;;  %v8815_v18 = vld [vmem:[#allocation8 + $0xc98] sm:$0xf0] }
 0x312   :  { %v8959_v12 = vld [vmem:[#allocation8 + $0xdb8] sm:$0xf0]  ;;  %v8818_v20 = vor.u32 %v10897_v0, %v8815_v18  ;;  %v11001_v27 = vld [vmem:[#allocation8 + $0xfcc] sm:$0xf] }
 0x313   :  { %6559 = vmatpush.bf16.msrb.mxu3 %v8674_v3  ;;  %v10933_v3 = vld [vmem:[#allocation8 + $0xdac] sm:$0xf]  ;;  %v9087_v9 = vld [vmem:[#allocation8 + $0xeb8] sm:$0xf0] }
 0x314   :  { %6523 = vmatpush.bf16.msrb.mxu0 %v8242_v8  ;;  %v8626_v8 = vor.u32 %v10849_v26, %v8623_v30  ;;  %v9231_v15 = vld [vmem:[#allocation8 + $0xfd8] sm:$0xf0]  ;;  %v8962_v61 = vor.u32 %v10933_v3, %v8959_v12  ;;  %v10929_v54 = vld [vmem:[#allocation8 + $0xd8c] sm:$0xf] }
 0x315   :  { %6535 = vmatpush.bf16.msrb.mxu1 %v8386_v10  ;;  %6548 = vmatpush.bf16.msrb.mxu2 %v8514_v19  ;;  %v8799_v10 = vld [vmem:[#allocation8 + $0xc78] sm:$0xf0]  ;;  %v6317_v19 = vpop.f32.mrf.mxu0  ;;  %v10961_v47 = vld [vmem:[#allocation8 + $0xe8c] sm:$0xf]  ;;  %v6304_v41 = vpop.f32.mrf.mxu3 }
 0x316   :  { %v8943_v32 = vld [vmem:[#allocation8 + $0xd98] sm:$0xf0]  ;;  %v10889_v49 = vld [vmem:[#allocation8 + $0xc4c] sm:$0xf] }
 0x317   :  { %6524 = vmatmul.bf16.vlgmr.msrb.gmra.mxu0 %v11699_v58  ;;  %6560 = vmatpush.bf16.msrb.mxu3 %v8658_v52  ;;  %v9247_v58 = vld [vmem:[#allocation8 + $0xff8] sm:$0xf0]  ;;  %v9234_v52 = vor.u32 %v11001_v27, %v9231_v15  ;;  %v8946_v57 = vor.u32 %v10929_v54, %v8943_v32  ;;  %v10957_v43 = vld [vmem:[#allocation8 + $0xe6c] sm:$0xf] }
 0x318   :  { %6568 = vmatpush.bf16.msra.mxu0 %v8866_v16  ;;  %v9250_v6 = vor.u32 %v11005_v4, %v9247_v58  ;;  %v10965_v16 = vld [vmem:[#allocation8 + $0xeac] sm:$0xf]  ;;  %v9071_v48 = vld [vmem:[#allocation8 + $0xe98] sm:$0xf0] }
 0x319   :  { %6536 = vmatpush.bf16.msrb.mxu1 %v8370_v38  ;;  %6549 = vmatpush.bf16.msrb.mxu2 %v8498_v60  ;;  %v9090_v33 = vor.u32 %v10965_v16, %v9087_v9  ;;  %v9215_v45 = vld [vmem:[#allocation8 + $0xfb8] sm:$0xf0]  ;;  %v9074_v36 = vor.u32 %v10961_v47, %v9071_v48  ;;  %v10925_v38 = vld [vmem:[#allocation8 + $0xd6c] sm:$0xf]  ;;  %v6330_v40 = vpop.f32.mrf.mxu1 }
 0x31a   :  { %v8927_v35 = vld [vmem:[#allocation8 + $0xd78] sm:$0xf0]  ;;  %v10993_v28 = vld [vmem:[#allocation8 + $0xf8c] sm:$0xf] }
 0x31b   :  { %6561 = vmatpush.bf16.msrb.mxu3 %v8642_v34  ;;  %v9055_v53 = vld [vmem:[#allocation8 + $0xe78] sm:$0xf0]  ;;  %v6305_v34 = vadd.f32 %v6304_v41, %v11890_v11  ;;  %v10921_v18 = vld [vmem:[#allocation8 + $0xd4c] sm:$0xf] }
 0x31c   :  { %6569 = vmatpush.bf16.msra.mxu0 %v8850_v13  ;;  %6537 = vmatmul.bf16.vlgmr.msrb.gmra.mxu1 %v11702_v1  ;;  %v8802_v1 = vor.u32 %v10893_v2, %v8799_v10  ;;  %v8783_v13 = vld [vmem:[#allocation8 + $0xc58] sm:$0xf0]  ;;  %v9058_v0 = vor.u32 %v10957_v43, %v9055_v53  ;;  %v10881_v3 = vld [vmem:[#allocation8 + $0xc0c] sm:$0xf] }
 0x31d   :  { %6581 = vmatpush.bf16.msra.mxu1 %v8994_v56  ;;  %6594 = vmatpush.bf16.msra.mxu2 %v9122_v5  ;;  %v8786_v60 = vor.u32 %v10889_v49, %v8783_v13  ;;  %v10885_v5 = vld [vmem:[#allocation8 + $0xc2c] sm:$0xf]  ;;  %v8767_v63 = vld [vmem:[#allocation8 + $0xc38] sm:$0xf0]  ;;  %v6318_v26 = vadd.f32 %v6317_v19, %v6305_v34  ;;  %v6319_v30 = vpop.f32.mrf.mxu0  ;;  %v6306_v19 = vpop.f32.mrf.mxu3 }
 0x31e   :  { %6550 = vmatmul.bf16.vlgmr.msrb.gmra.mxu2 %v11706_v37  ;;  %v10997_v37 = vld [vmem:[#allocation8 + $0xfac] sm:$0xf]  ;;  %v8911_v4 = vld [vmem:[#allocation8 + $0xd58] sm:$0xf0]  ;;  %v8770_v58 = vor.u32 %v10885_v5, %v8767_v63 }
 0x31f   :  { %6562 = vmatpush.bf16.msrb.mxu3 %v8626_v8  ;;  %v9218_v56 = vor.u32 %v10997_v37, %v9215_v45  ;;  %v9039_v8 = vld [vmem:[#allocation8 + $0xe58] sm:$0xf0]  ;;  %v6331_v11 = vadd.f32 %v6330_v40, %v6318_v26  ;;  %v8914_v16 = vor.u32 %v10921_v18, %v8911_v4  ;;  %v11037_v9 = vld [vmem:[#allocation8 + $0x10ec] sm:$0xf] }
 0x320   :  { %6570 = vmatpush.bf16.msra.mxu0 %v8834_v62  ;;  %v8930_v62 = vor.u32 %v10925_v38, %v8927_v35  ;;  %v8751_v12 = vld [vmem:[#allocation8 + $0xc18] sm:$0xf0]  ;;  %v10917_v27 = vld [vmem:[#allocation8 + $0xd2c] sm:$0xf] }
 0x321   :  { %6582 = vmatpush.bf16.msra.mxu1 %v8978_v25  ;;  %6595 = vmatpush.bf16.msra.mxu2 %v9106_v42  ;;  %v10953_v42 = vld [vmem:[#allocation8 + $0xe4c] sm:$0xf]  ;;  %v9375_v2 = vld [vmem:[#allocation8 + $0x10f8] sm:$0xf0]  ;;  %v6332_v47 = vpop.f32.mrf.mxu1 }
 0x322   :  { %6563 = vmatmul.bf16.vlgmr.msrb.gmra.mxu3 %v11708_v39  ;;  %v9199_v39 = vld [vmem:[#allocation8 + $0xf98] sm:$0xf0]  ;;  %v9042_v10 = vor.u32 %v10953_v42, %v9039_v8  ;;  %v10949_v32 = vld [vmem:[#allocation8 + $0xe2c] sm:$0xf]  ;;  %v9378_v48 = vor.u32 %v11037_v9, %v9375_v2 }
 0x323   :  { %6607 = vmatpush.bf16.msra.mxu3 %v9250_v6  ;;  %v9202_v25 = vor.u32 %v10993_v28, %v9199_v39  ;;  %v9183_v6 = vld [vmem:[#allocation8 + $0xf78] sm:$0xf0]  ;;  %v10985_v49 = vld [vmem:[#allocation8 + $0xf4c] sm:$0xf] }
 0x324   :  { %6571 = vmatpush.bf16.msra.mxu0 %v8818_v20  ;;  %v10989_v20 = vld [vmem:[#allocation8 + $0xf6c] sm:$0xf]  ;;  %v8895_v15 = vld [vmem:[#allocation8 + $0xd38] sm:$0xf0] }
 0x325   :  { %6583 = vmatpush.bf16.msra.mxu1 %v8962_v61  ;;  %6596 = vmatpush.bf16.msra.mxu2 %v9090_v33  ;;  %v6343_v61 = vpop.f32.mrf.mxu2  ;;  %v8754_v33 = vor.u32 %v10881_v3, %v8751_v12  ;;  %v9186_v54 = vor.u32 %v10989_v20, %v9183_v6  ;;  %v9167_v13 = vld [vmem:[#allocation8 + $0xf58] sm:$0xf0]  ;;  %v8898_v37 = vor.u32 %v10917_v27, %v8895_v15  ;;  %v11033_v45 = vld [vmem:[#allocation8 + $0x10cc] sm:$0xf] }
 0x326   :  { %v8879_v35 = vld [vmem:[#allocation8 + $0xd18] sm:$0xf0]  ;;  %v10945_v41 = vld [vmem:[#allocation8 + $0xe0c] sm:$0xf] }
 0x327   :  { %6608 = vmatpush.bf16.msra.mxu3 %v9234_v52  ;;  %v11897_v52 = vadd.f32 %v6343_v61, %v6331_v11  ;;  %v11069_v43 = vld [vmem:[#allocation8 + $0x11ec] sm:$0xf]  ;;  %v9503_v53 = vld [vmem:[#allocation8 + $0x11f8] sm:$0xf0] }
 0x328   :  { %6572 = vmatpush.bf16.msra.mxu0 %v8802_v1  ;;  %v9023_v1 = vld [vmem:[#allocation8 + $0xe38] sm:$0xf0]  ;;  %v11101_v5 = vld [vmem:[#allocation8 + $0x12ec] sm:$0xf] }
 0x329   :  { %6584 = vmatpush.bf16.msra.mxu1 %v8946_v57  ;;  %6597 = vmatpush.bf16.msra.mxu2 %v9074_v36  ;;  %v9359_v57 = vld [vmem:[#allocation8 + $0x10d8] sm:$0xf0]  ;;  %v10913_v36 = vld [vmem:[#allocation8 + $0xd0c] sm:$0xf]  ;;  %v9026_v38 = vor.u32 %v10949_v32, %v9023_v1 }
 0x32a   :  { %v9362_v34 = vor.u32 %v11033_v45, %v9359_v57  ;;  %v9631_v40 = vld [vmem:[#allocation8 + $0x12f8] sm:$0xf0]  ;;  %v10981_v63 = vld [vmem:[#allocation8 + $0xf2c] sm:$0xf]  ;;  %v8882_v39 = vor.u32 %v10913_v36, %v8879_v35 }
 0x32b   :  { %6609 = vmatpush.bf16.msra.mxu3 %v9218_v56  ;;  %v9170_v56 = vor.u32 %v10985_v49, %v9167_v13  ;;  %v9151_v28 = vld [vmem:[#allocation8 + $0xf38] sm:$0xf0]  ;;  %v11065_v18 = vld [vmem:[#allocation8 + $0x11cc] sm:$0xf] }
 0x32c   :  { %6573 = vmatpush.bf16.msra.mxu0 %v8786_v60  ;;  %v9007_v60 = vld [vmem:[#allocation8 + $0xe18] sm:$0xf0]  ;;  %v11097_v8 = vld [vmem:[#allocation8 + $0x12cc] sm:$0xf] }
 0x32d   :  { %6585 = vmatpush.bf16.msra.mxu1 %v8930_v62  ;;  %6598 = vmatpush.bf16.msra.mxu2 %v9058_v0  ;;  %v11029_v62 = vld [vmem:[#allocation8 + $0x10ac] sm:$0xf]  ;;  %v9343_v26 = vld [vmem:[#allocation8 + $0x10b8] sm:$0xf0]  ;;  %v9010_v30 = vor.u32 %v10945_v41, %v9007_v60  ;;  %v9506_v0 = vor.u32 %v11069_v43, %v9503_v53  ;;  %v6345_v4 = vpop.f32.mrf.mxu2 }
 0x32e   :  { %v9487_v42 = vld [vmem:[#allocation8 + $0x11d8] sm:$0xf0]  ;;  %v9346_v11 = vor.u32 %v11029_v62, %v9343_v26  ;;  %v10977_v12 = vld [vmem:[#allocation8 + $0xf0c] sm:$0xf] }
 0x32f   :  { %6610 = vmatpush.bf16.msra.mxu3 %v9202_v25  ;;  %v9154_v25 = vor.u32 %v10981_v63, %v9151_v28  ;;  %v9615_v3 = vld [vmem:[#allocation8 + $0x12d8] sm:$0xf0]  ;;  %v11025_v6 = vld [vmem:[#allocation8 + $0x108c] sm:$0xf]  ;;  %v9490_v2 = vor.u32 %v11065_v18, %v9487_v42 }
 0x330   :  { %6574 = vmatpush.bf16.msra.mxu0 %v8770_v58  ;;  %v9634_v58 = vor.u32 %v11101_v5, %v9631_v40  ;;  %v9135_v20 = vld [vmem:[#allocation8 + $0xf18] sm:$0xf0]  ;;  %v11133_v9 = vld [vmem:[#allocation8 + $0x13ec] sm:$0xf] }
 0x331   :  { %6586 = vmatpush.bf16.msra.mxu1 %v8914_v16  ;;  %6599 = vmatpush.bf16.msra.mxu2 %v9042_v10  ;;  %v9327_v16 = vld [vmem:[#allocation8 + $0x1098] sm:$0xf0]  ;;  %v9618_v10 = vor.u32 %v11097_v8, %v9615_v3  ;;  %v9138_v27 = vor.u32 %v10977_v12, %v9135_v20  ;;  %v11061_v15 = vld [vmem:[#allocation8 + $0x11ac] sm:$0xf] }
 0x332   :  { %v9471_v61 = vld [vmem:[#allocation8 + $0x11b8] sm:$0xf0]  ;;  %v9330_v19 = vor.u32 %v11025_v6, %v9327_v16  ;;  %v11021_v1 = vld [vmem:[#allocation8 + $0x106c] sm:$0xf] }
 0x333   :  { %6611 = vmatpush.bf16.msra.mxu3 %v9186_v54  ;;  %v11093_v54 = vld [vmem:[#allocation8 + $0x12ac] sm:$0xf]  ;;  %v9599_v32 = vld [vmem:[#allocation8 + $0x12b8] sm:$0xf0]  ;;  %v9474_v13 = vor.u32 %v11061_v15, %v9471_v61 }
 0x334   :  { %6575 = vmatpush.bf16.msra.mxu0 %v8754_v33  ;;  %v9311_v47 = vld [vmem:[#allocation8 + $0x1078] sm:$0xf0]  ;;  %v9602_v45 = vor.u32 %v11093_v54, %v9599_v32  ;;  %v11057_v57 = vld [vmem:[#allocation8 + $0x118c] sm:$0xf] }
 0x335   :  { %6587 = vmatpush.bf16.msra.mxu1 %v8898_v37  ;;  %6600 = vmatpush.bf16.msra.mxu2 %v9026_v38  ;;  %v9743_v49 = vld [vmem:[#allocation8 + $0x13d8] sm:$0xf0]  ;;  %v6369_v37 = vpop.f32.mrf.mxu0  ;;  %v11089_v35 = vld [vmem:[#allocation8 + $0x128c] sm:$0xf]  ;;  %v6356_v63 = vpop.f32.mrf.mxu3 }
 0x336   :  { %v9455_v36 = vld [vmem:[#allocation8 + $0x1198] sm:$0xf0]  ;;  %v11017_v60 = vld [vmem:[#allocation8 + $0x104c] sm:$0xf] }
 0x337   :  { %6576 = vmatmul.bf16.vlgmr.msra.gmra.mxu0 %v11722_v29  ;;  %6612 = vmatpush.bf16.msra.mxu3 %v9170_v56  ;;  %v9759_v29 = vld [vmem:[#allocation8 + $0x13f8] sm:$0xf0]  ;;  %v9458_v53 = vor.u32 %v11057_v57, %v9455_v36  ;;  %v11085_v62 = vld [vmem:[#allocation8 + $0x126c] sm:$0xf] }
 0x338   :  { %6620 = vmatpush.bf16.msrb.mxu0 %v9378_v48  ;;  %v9762_v33 = vor.u32 %v11133_v9, %v9759_v29  ;;  %v11129_v48 = vld [vmem:[#allocation8 + $0x13cc] sm:$0xf]  ;;  %v9583_v41 = vld [vmem:[#allocation8 + $0x1298] sm:$0xf0] }
 0x339   :  { %6588 = vmatpush.bf16.msra.mxu1 %v8882_v39  ;;  %6601 = vmatpush.bf16.msra.mxu2 %v9010_v30  ;;  %v9746_v38 = vor.u32 %v11129_v48, %v9743_v49  ;;  %v9295_v56 = vld [vmem:[#allocation8 + $0x1058] sm:$0xf0]  ;;  %v9586_v5 = vor.u32 %v11089_v35, %v9583_v41  ;;  %v11013_v30 = vld [vmem:[#allocation8 + $0x102c] sm:$0xf]  ;;  %v6382_v18 = vpop.f32.mrf.mxu1 }
 0x33a   :  { %v9727_v43 = vld [vmem:[#allocation8 + $0x13b8] sm:$0xf0]  ;;  %v9298_v28 = vor.u32 %v11017_v60, %v9295_v56  ;;  %v11081_v16 = vld [vmem:[#allocation8 + $0x124c] sm:$0xf] }
 0x33b   :  { %6613 = vmatpush.bf16.msra.mxu3 %v9154_v25  ;;  %v9439_v40 = vld [vmem:[#allocation8 + $0x1178] sm:$0xf0]  ;;  %v11009_v29 = vld [vmem:[#allocation8 + $0x100c] sm:$0xf] }
 0x33c   :  { %6621 = vmatpush.bf16.msrb.mxu0 %v9362_v34  ;;  %6589 = vmatmul.bf16.vlgmr.msra.gmra.mxu1 %v11720_v22  ;;  %v9314_v22 = vor.u32 %v11021_v1, %v9311_v47  ;;  %v11053_v34 = vld [vmem:[#allocation8 + $0x116c] sm:$0xf]  ;;  %v9567_v26 = vld [vmem:[#allocation8 + $0x1278] sm:$0xf0] }
 0x33d   :  { %6633 = vmatpush.bf16.msrb.mxu1 %v9506_v0  ;;  %6646 = vmatpush.bf16.msrb.mxu2 %v9634_v58  ;;  %v6357_v0 = vadd.f32 %v6356_v63, %v11897_v52  ;;  %v9279_v4 = vld [vmem:[#allocation8 + $0x1038] sm:$0xf0]  ;;  %v11121_v58 = vld [vmem:[#allocation8 + $0x138c] sm:$0xf]  ;;  %v9442_v25 = vor.u32 %v11053_v34, %v9439_v40  ;;  %v6371_v8 = vpop.f32.mrf.mxu0  ;;  %v9570_v3 = vor.u32 %v11085_v62, %v9567_v26  ;;  %v6358_v47 = vpop.f32.mrf.mxu3 }
 0x33e   :  { %6602 = vmatmul.bf16.vlgmr.msra.gmra.mxu2 %v11726_v51  ;;  %v11125_v51 = vld [vmem:[#allocation8 + $0x13ac] sm:$0xf]  ;;  %v9423_v12 = vld [vmem:[#allocation8 + $0x1158] sm:$0xf0]  ;;  %v9282_v20 = vor.u32 %v11013_v30, %v9279_v4 }
 0x33f   :  { %6614 = vmatpush.bf16.msra.mxu3 %v9138_v27  ;;  %v9730_v39 = vor.u32 %v11125_v51, %v9727_v43  ;;  %v6370_v42 = vadd.f32 %v6369_v37, %v6357_v0  ;;  %v9551_v9 = vld [vmem:[#allocation8 + $0x1258] sm:$0xf0]  ;;  %v11165_v61 = vld [vmem:[#allocation8 + $0x14ec] sm:$0xf] }
 0x340   :  { %6622 = vmatpush.bf16.msrb.mxu0 %v9346_v11  ;;  %v11049_v11 = vld [vmem:[#allocation8 + $0x114c] sm:$0xf]  ;;  %v9695_v27 = vld [vmem:[#allocation8 + $0x1378] sm:$0xf0] }
 0x341   :  { %6634 = vmatpush.bf16.msrb.mxu1 %v9490_v2  ;;  %6647 = vmatpush.bf16.msrb.mxu2 %v9618_v10  ;;  %v6383_v52 = vadd.f32 %v6382_v18, %v6370_v42  ;;  %v9263_v2 = vld [vmem:[#allocation8 + $0x1018] sm:$0xf0]  ;;  %v11117_v10 = vld [vmem:[#allocation8 + $0x136c] sm:$0xf]  ;;  %v9426_v15 = vor.u32 %v11049_v11, %v9423_v12  ;;  %v6395_v1 = vpop.f32.mrf.mxu2  ;;  %v6384_v57 = vpop.f32.mrf.mxu1 }
 0x342   :  { %6615 = vmatmul.bf16.vlgmr.msra.gmra.mxu3 %v11730_v55  ;;  %v9711_v55 = vld [vmem:[#allocation8 + $0x1398] sm:$0xf0]  ;;  %v11045_v54 = vld [vmem:[#allocation8 + $0x112c] sm:$0xf]  ;;  %v9266_v48 = vor.u32 %v11009_v29, %v9263_v2  ;;  %v9698_v49 = vor.u32 %v11117_v10, %v9695_v27 }
 0x343   :  { %6659 = vmatpush.bf16.msrb.mxu3 %v9762_v33  ;;  %v9714_v6 = vor.u32 %v11121_v58, %v9711_v55  ;;  %v9554_v33 = vor.u32 %v11081_v16, %v9551_v9  ;;  %v9407_v32 = vld [vmem:[#allocation8 + $0x1138] sm:$0xf0]  ;;  %v11161_v41 = vld [vmem:[#allocation8 + $0x14cc] sm:$0xf] }
 0x344   :  { %6623 = vmatpush.bf16.msrb.mxu0 %v9330_v19  ;;  %v9887_v19 = vld [vmem:[#allocation8 + $0x14f8] sm:$0xf0]  ;;  %v9410_v35 = vor.u32 %v11045_v54, %v9407_v32  ;;  %v11041_v56 = vld [vmem:[#allocation8 + $0x110c] sm:$0xf] }
 0x345   :  { %6635 = vmatpush.bf16.msrb.mxu1 %v9474_v13  ;;  %6648 = vmatpush.bf16.msrb.mxu2 %v9602_v45  ;;  %v11077_v13 = vld [vmem:[#allocation8 + $0x122c] sm:$0xf]  ;;  %v9535_v37 = vld [vmem:[#allocation8 + $0x1238] sm:$0xf0]  ;;  %v11904_v45 = vadd.f32 %v6395_v1, %v6383_v52  ;;  %v9890_v36 = vor.u32 %v11165_v61, %v9887_v19  ;;  %v11907_v8 = vpop.f32.mrf.mxu3 }
 0x346   :  { %v9871_v60 = vld [vmem:[#allocation8 + $0x14d8] sm:$0xf0]  ;;  %v9538_v51 = vor.u32 %v11077_v13, %v9535_v37  ;;  %v11197_v40 = vld [vmem:[#allocation8 + $0x15ec] sm:$0xf] }
 0x347   :  { %6660 = vmatpush.bf16.msrb.mxu3 %v9746_v38  ;;  %v9679_v38 = vld [vmem:[#allocation8 + $0x1358] sm:$0xf0]  ;;  %v11109_v26 = vld [vmem:[#allocation8 + $0x132c] sm:$0xf] }
 0x348   :  { %6624 = vmatpush.bf16.msrb.mxu0 %v9314_v22  ;;  %v11113_v22 = vld [vmem:[#allocation8 + $0x134c] sm:$0xf]  ;;  %v9391_v43 = vld [vmem:[#allocation8 + $0x1118] sm:$0xf0] }
 0x349   :  { %6636 = vmatpush.bf16.msrb.mxu1 %v9458_v53  ;;  %6649 = vmatpush.bf16.msrb.mxu2 %v9586_v5  ;;  %v11073_v53 = vld [vmem:[#allocation8 + $0x120c] sm:$0xf]  ;;  %v9519_v5 = vld [vmem:[#allocation8 + $0x1218] sm:$0xf0]  ;;  %v9682_v34 = vor.u32 %v11113_v22, %v9679_v38  ;;  %v9394_v0 = vor.u32 %v11041_v56, %v9391_v43  ;;  %v6397_v42 = vpop.f32.mrf.mxu2 }
 0x34a   :  { %v10015_v63 = vld [vmem:[#allocation8 + $0x15f8] sm:$0xf0]  ;;  %v11157_v18 = vld [vmem:[#allocation8 + $0x14ac] sm:$0xf]  ;;  %v9522_v58 = vor.u32 %v11073_v53, %v9519_v5 }
 0x34b   :  { %6661 = vmatpush.bf16.msrb.mxu3 %v9730_v39  ;;  %v9874_v39 = vor.u32 %v11161_v41, %v9871_v60  ;;  %v10143_v62 = vld [vmem:[#allocation8 + $0x16f8] sm:$0xf0]  ;;  %v10018_v55 = vor.u32 %v11197_v40, %v10015_v63  ;;  %v11105_v9 = vld [vmem:[#allocation8 + $0x130c] sm:$0xf] }
 0x34c   :  { %6625 = vmatpush.bf16.msrb.mxu0 %v9298_v28  ;;  %v11229_v28 = vld [vmem:[#allocation8 + $0x16ec] sm:$0xf]  ;;  %v9663_v30 = vld [vmem:[#allocation8 + $0x1338] sm:$0xf0] }
 0x34d   :  { %6637 = vmatpush.bf16.msrb.mxu1 %v9442_v25  ;;  %6650 = vmatpush.bf16.msrb.mxu2 %v9570_v3  ;;  %v9855_v4 = vld [vmem:[#allocation8 + $0x14b8] sm:$0xf0]  ;;  %v11193_v25 = vld [vmem:[#allocation8 + $0x15cc] sm:$0xf]  ;;  %v10146_v3 = vor.u32 %v11229_v28, %v10143_v62  ;;  %v9666_v11 = vor.u32 %v11109_v26, %v9663_v30 }
 0x34e   :  { %v9999_v12 = vld [vmem:[#allocation8 + $0x15d8] sm:$0xf0]  ;;  %v9858_v16 = vor.u32 %v11157_v18, %v9855_v4  ;;  %v11153_v52 = vld [vmem:[#allocation8 + $0x148c] sm:$0xf] }
 0x34f   :  { %6662 = vmatpush.bf16.msrb.mxu3 %v9714_v6  ;;  %v10127_v6 = vld [vmem:[#allocation8 + $0x16d8] sm:$0xf0]  ;;  %v11261_v2 = vld [vmem:[#allocation8 + $0x17ec] sm:$0xf]  ;;  %v10002_v27 = vor.u32 %v11193_v25, %v9999_v12 }
 0x350   :  { %6626 = vmatpush.bf16.msrb.mxu0 %v9282_v20  ;;  %v11225_v20 = vld [vmem:[#allocation8 + $0x16cc] sm:$0xf]  ;;  %v9647_v29 = vld [vmem:[#allocation8 + $0x1318] sm:$0xf0] }
 0x351   :  { %6638 = vmatpush.bf16.msrb.mxu1 %v9426_v15  ;;  %6651 = vmatpush.bf16.msrb.mxu2 %v9554_v33  ;;  %v10271_v10 = vld [vmem:[#allocation8 + $0x17f8] sm:$0xf0]  ;;  %v10130_v15 = vor.u32 %v11225_v20, %v10127_v6  ;;  %v9650_v61 = vor.u32 %v11105_v9, %v9647_v29  ;;  %v11189_v19 = vld [vmem:[#allocation8 + $0x15ac] sm:$0xf] }
 0x352   :  { %v9983_v33 = vld [vmem:[#allocation8 + $0x15b8] sm:$0xf0]  ;;  %v10274_v32 = vor.u32 %v11261_v2, %v10271_v10  ;;  %v11221_v1 = vld [vmem:[#allocation8 + $0x16ac] sm:$0xf] }
 0x353   :  { %6663 = vmatpush.bf16.msrb.mxu3 %v9698_v49  ;;  %v10111_v47 = vld [vmem:[#allocation8 + $0x16b8] sm:$0xf0]  ;;  %v11257_v13 = vld [vmem:[#allocation8 + $0x17cc] sm:$0xf]  ;;  %v9986_v57 = vor.u32 %v11189_v19, %v9983_v33 }
 0x354   :  { %6627 = vmatpush.bf16.msrb.mxu0 %v9266_v48  ;;  %v11149_v48 = vld [vmem:[#allocation8 + $0x146c] sm:$0xf]  ;;  %v9823_v49 = vld [vmem:[#allocation8 + $0x1478] sm:$0xf0]  ;;  %v6421_v38 = vpop.f32.mrf.mxu0  ;;  %v10114_v41 = vor.u32 %v11221_v1, %v10111_v47 }
 0x355   :  { %6639 = vmatpush.bf16.msrb.mxu1 %v9410_v35  ;;  %6652 = vmatpush.bf16.msrb.mxu2 %v9538_v51  ;;  %v10255_v37 = vld [vmem:[#allocation8 + $0x17d8] sm:$0xf0]  ;;  %v6410_v35 = vpop.f32.mrf.mxu3  ;;  %v9826_v56 = vor.u32 %v11149_v48, %v9823_v49  ;;  %v11217_v43 = vld [vmem:[#allocation8 + $0x168c] sm:$0xf] }
 0x356   :  { %v9967_v60 = vld [vmem:[#allocation8 + $0x1598] sm:$0xf0]  ;;  %v10258_v51 = vor.u32 %v11257_v13, %v10255_v37  ;;  %v11145_v53 = vld [vmem:[#allocation8 + $0x144c] sm:$0xf] }
 0x357   :  { %6628 = vmatmul.bf16.vlgmr.msrb.gmra.mxu0 %v11754_v17  ;;  %6664 = vmatpush.bf16.msrb.mxu3 %v9682_v34  ;;  %v9839_v17 = vld [vmem:[#allocation8 + $0x1498] sm:$0xf0]  ;;  %v11253_v34 = vld [vmem:[#allocation8 + $0x17ac] sm:$0xf] }
 0x358   :  { %6672 = vmatpush.bf16.msra.mxu0 %v9890_v36  ;;  %v9842_v54 = vor.u32 %v11153_v52, %v9839_v17  ;;  %v11330_v36 = vld [vmem:[#allocation10] sm:$0xf]  ;;  %v9807_v5 = vld [vmem:[#allocation8 + $0x1458] sm:$0xf0]  ;;  %v11213_v18 = vld [vmem:[#allocation8 + $0x166c] sm:$0xf] }
 0x359   :  { %6640 = vmatpush.bf16.msrb.mxu1 %v9394_v0  ;;  %6653 = vmatpush.bf16.msrb.mxu2 %v9522_v58  ;;  %v1508_v22 = vperm.slane %v11330_v36, 3  ;;  %v10239_v40 = vld [vmem:[#allocation8 + $0x17b8] sm:$0xf0]  ;;  %v9810_v30 = vor.u32 %v11145_v53, %v9807_v5  ;;  %v11141_v58 = vld [vmem:[#allocation8 + $0x142c] sm:$0xf] }
 0x35a   :  { %v9951_v62 = vld [vmem:[#allocation8 + $0x1578] sm:$0xf0]  ;;  %v10242_v0 = vor.u32 %v11253_v34, %v10239_v40  ;;  %v11249_v42 = vld [vmem:[#allocation8 + $0x178c] sm:$0xf] }
 0x35b   :  { %6665 = vmatpush.bf16.msrb.mxu3 %v9666_v11  ;;  %v6422_v26 = vadd.f32 %v6421_v38, %v1508_v22  ;;  %v10079_v4 = vld [vmem:[#allocation8 + $0x1678] sm:$0xf0]  ;;  %v11177_v6 = vld [vmem:[#allocation8 + $0x154c] sm:$0xf] }
 0x35c   :  { %6673 = vmatpush.bf16.msra.mxu0 %v9874_v39  ;;  %6641 = vmatmul.bf16.vlgmr.msrb.gmra.mxu1 %v11758_v21  ;;  %v11185_v21 = vld [vmem:[#allocation8 + $0x158c] sm:$0xf]  ;;  %v9791_v25 = vld [vmem:[#allocation8 + $0x1438] sm:$0xf0]  ;;  %v6423_v12 = vpop.f32.mrf.mxu0  ;;  %v10082_v20 = vor.u32 %v11213_v18, %v10079_v4 }
 0x35d   :  { %6685 = vmatpush.bf16.msra.mxu1 %v10018_v55  ;;  %6698 = vmatpush.bf16.msra.mxu2 %v10146_v3  ;;  %v9970_v63 = vor.u32 %v11185_v21, %v9967_v60  ;;  %v11181_v39 = vld [vmem:[#allocation8 + $0x156c] sm:$0xf]  ;;  %v6434_v55 = vpop.f32.mrf.mxu1  ;;  %v10223_v3 = vld [vmem:[#allocation8 + $0x1798] sm:$0xf0]  ;;  %v9794_v9 = vor.u32 %v11141_v58, %v9791_v25  ;;  %v11286_v12 = vld [vmem:[#allocation11 + $0x30] sm:$0xff] }
 0x35e   :  { %6654 = vmatmul.bf16.vlgmr.msrb.gmra.mxu2 %v11762_v50  ;;  %v10095_v50 = vld [vmem:[#allocation8 + $0x1698] sm:$0xf0]  ;;  %v6435_v11 = vadd.f32 %v6434_v55, %v6422_v26  ;;  %v10226_v29 = vor.u32 %v11249_v42, %v10223_v3  ;;  %v11209_v52 = vld [vmem:[#allocation8 + $0x164c] sm:$0xf] }
 0x35f   :  { %6666 = vmatpush.bf16.msrb.mxu3 %v9650_v61  ;;  %v10098_v28 = vor.u32 %v11217_v43, %v10095_v50  ;;  %v10063_v17 = vld [vmem:[#allocation8 + $0x1658] sm:$0xf0]  ;;  %v11137_v2 = vld [vmem:[#allocation8 + $0x140c] sm:$0xf] }
 0x360   :  { %6674 = vmatpush.bf16.msra.mxu0 %v9858_v16  ;;  %v9935_v16 = vld [vmem:[#allocation8 + $0x1558] sm:$0xf0]  ;;  %v11277_v19 = vld [vmem:[#allocation8 + $0x186c] sm:$0xf] }
 0x361   :  { %6686 = vmatpush.bf16.msra.mxu1 %v10002_v27  ;;  %6699 = vmatpush.bf16.msra.mxu2 %v10130_v15  ;;  %v9775_v10 = vld [vmem:[#allocation8 + $0x1418] sm:$0xf0]  ;;  %v11245_v27 = vld [vmem:[#allocation8 + $0x176c] sm:$0xf]  ;;  %v9938_v61 = vor.u32 %v11177_v6, %v9935_v16  ;;  %v6447_v47 = vpop.f32.mrf.mxu2 }
 0x362   :  { %6667 = vmatmul.bf16.vlgmr.msrb.gmra.mxu3 %v11764_v59  ;;  %v9954_v59 = vor.u32 %v11181_v39, %v9951_v62  ;;  %v10207_v15 = vld [vmem:[#allocation8 + $0x1778] sm:$0xf0]  ;;  %v9778_v48 = vor.u32 %v11137_v2, %v9775_v10  ;;  %v11205_v13 = vld [vmem:[#allocation8 + $0x162c] sm:$0xf]  ;;  %v11302_v10 = vld [vmem:[#allocation11 + $0xb0] sm:$0xff] }
 0x363   :  { %6711 = vmatpush.bf16.msra.mxu3 %v10274_v32  ;;  %v10335_v33 = vld [vmem:[#allocation8 + $0x1878] sm:$0xf0]  ;;  %v11173_v32 = vld [vmem:[#allocation8 + $0x152c] sm:$0xf]  ;;  %v10210_v49 = vor.u32 %v11245_v27, %v10207_v15  ;;  %v11284_v27 = vld [vmem:[#allocation11 + $0x20] sm:$0xff] }
 0x364   :  { %6675 = vmatpush.bf16.msra.mxu0 %v9842_v54  ;;  %v10066_v54 = vor.u32 %v11209_v52, %v10063_v17  ;;  %v9919_v1 = vld [vmem:[#allocation8 + $0x1538] sm:$0xf0]  ;;  %v10338_v22 = vor.u32 %v11277_v19, %v10335_v33  ;;  %v11241_v38 = vld [vmem:[#allocation8 + $0x174c] sm:$0xf] }
 0x365   :  { %6687 = vmatpush.bf16.msra.mxu1 %v9986_v57  ;;  %6700 = vmatpush.bf16.msra.mxu2 %v10114_v41  ;;  %v10047_v37 = vld [vmem:[#allocation8 + $0x1638] sm:$0xf0]  ;;  %v6448_v57 = vadd.f32 %v6447_v47, %v6435_v11  ;;  %v6436_v36 = vpop.f32.mrf.mxu1  ;;  %v9922_v41 = vor.u32 %v11173_v32, %v9919_v1  ;;  %v11273_v21 = vld [vmem:[#allocation8 + $0x184c] sm:$0xf]  ;;  %v6460_v34 = vpop.f32.mrf.mxu3  ;;  %v11300_v32 = vld [vmem:[#allocation11 + $0xa0] sm:$0xff] }
 0x366   :  { %v10191_v35 = vld [vmem:[#allocation8 + $0x1758] sm:$0xf0]  ;;  %v11201_v53 = vld [vmem:[#allocation8 + $0x160c] sm:$0xf]  ;;  %v11290_v1 = vld [vmem:[#allocation11 + $0x50] sm:$0xff] }
 0x367   :  { %6712 = vmatpush.bf16.msra.mxu3 %v10258_v51  ;;  %v10319_v60 = vld [vmem:[#allocation8 + $0x1858] sm:$0xf0]  ;;  %v11169_v51 = vld [vmem:[#allocation8 + $0x150c] sm:$0xf]  ;;  %v10194_v50 = vor.u32 %v11241_v38, %v10191_v35  ;;  %v6461_v39 = vadd.f32 %v6460_v34, %v6448_v57  ;;  %v11298_v57 = vld [vmem:[#allocation11 + $0x90] sm:$0xff]  ;;  %v6737_v35 = vmax.f32 %v11818_v23, 0.0 }
 0x368   :  { %6676 = vmatpush.bf16.msra.mxu0 %v9826_v56  ;;  %v10050_v56 = vor.u32 %v11205_v13, %v10047_v37  ;;  %v9903_v43 = vld [vmem:[#allocation8 + $0x1518] sm:$0xf0]  ;;  %v10322_v40 = vor.u32 %v11273_v21, %v10319_v60  ;;  %v11269_v26 = vld [vmem:[#allocation8 + $0x182c] sm:$0xf]  ;;  %v11280_v38 = vld [vmem:[#allocation11] sm:$0xff]  ;;  %v6738_v21 = vmax.f32 %v11861_v31, 0.0 }
 0x369   :  { %6688 = vmatpush.bf16.msra.mxu1 %v9970_v63  ;;  %6701 = vmatpush.bf16.msra.mxu2 %v10098_v28  ;;  %v10031_v5 = vld [vmem:[#allocation8 + $0x1618] sm:$0xf0]  ;;  %v11237_v63 = vld [vmem:[#allocation8 + $0x172c] sm:$0xf]  ;;  %v9906_v62 = vor.u32 %v11169_v51, %v9903_v43  ;;  %v6449_v4 = vpop.f32.mrf.mxu2  ;;  %v6409_v51 = vadd.f32 %v11907_v8, %v11904_v45  ;;  %v6741_v43 = vpack.c.bf16 %v6737_v35, %v6737_v35 }
 0x36a   :  { %v10175_v28 = vld [vmem:[#allocation8 + $0x1738] sm:$0xf0]  ;;  %v11233_v42 = vld [vmem:[#allocation8 + $0x170c] sm:$0xf] }
 0x36b   :  { %6713 = vmatpush.bf16.msra.mxu3 %v10242_v0  ;;  %v10034_v0 = vor.u32 %v11201_v53, %v10031_v5  ;;  %v11287_v18 = vld [vmem:[#allocation11 + $0x38] sm:$0xff]  ;;  %v10178_v55 = vor.u32 %v11237_v63, %v10175_v28  ;;  %v11265_v11 = vld [vmem:[#allocation8 + $0x180c] sm:$0xf]  ;;  %v11296_v53 = vld [vmem:[#allocation11 + $0x80] sm:$0xff]  ;;  %v6739_v5 = vmax.f32 %v6409_v51, 0.0 }
 0x36c   :  { %6677 = vmatpush.bf16.msra.mxu0 %v9810_v30  ;;  %v10303_v30 = vld [vmem:[#allocation8 + $0x1838] sm:$0xf0]  ;;  %v11293_v17 = vld [vmem:[#allocation11 + $0x68] sm:$0xff] }
 0x36d   :  { %6689 = vmatpush.bf16.msra.mxu1 %v9954_v59  ;;  %6702 = vmatpush.bf16.msra.mxu2 %v10082_v20  ;;  %v11295_v58 = vld [vmem:[#allocation11 + $0x78] sm:$0xff]  ;;  %v10306_v25 = vor.u32 %v11269_v26, %v10303_v30  ;;  %v6462_v6 = vpop.f32.mrf.mxu3  ;;  %v11301_v15 = vld [vmem:[#allocation11 + $0xa8] sm:$0xff] }
 0x36e   :  { %v10159_v3 = vld [vmem:[#allocation8 + $0x1718] sm:$0xf0]  ;;  %v11281_v37 = vld [vmem:[#allocation11 + $0x8] sm:$0xff]  ;;  %v11308_v6 = vld [vmem:[#allocation11 + $0xe0] sm:$0xff] }
 0x36f   :  { %6714 = vmatpush.bf16.msra.mxu3 %v10226_v29  ;;  %v10287_v59 = vld [vmem:[#allocation8 + $0x1818] sm:$0xf0]  ;;  %v10162_v20 = vor.u32 %v11233_v42, %v10159_v3  ;;  %v11285_v29 = vld [vmem:[#allocation11 + $0x28] sm:$0xff] }
 0x370   :  { %6678 = vmatpush.bf16.msra.mxu0 %v9794_v9  ;;  %v11303_v16 = vld [vmem:[#allocation11 + $0xb8] sm:$0xff]  ;;  %v10290_v9 = vor.u32 %v11265_v11, %v10287_v59  ;;  %v11310_v59 = vld [vmem:[#allocation11 + $0xf0] sm:$0xff] }
 0x371   :  { %6690 = vmatpush.bf16.msra.mxu1 %v9938_v61  ;;  %6703 = vmatpush.bf16.msra.mxu2 %v10066_v54  ;;  %v11283_v19 = vld [vmem:[#allocation11 + $0x18] sm:$0xff] }
 0x372   :  { %v11291_v54 = vld [vmem:[#allocation11 + $0x58] sm:$0xff] }
 0x373   :  { %6715 = vmatpush.bf16.msra.mxu3 %v10210_v49  ;;  %v11311_v3 = vld [vmem:[#allocation11 + $0xf8] sm:$0xff] }
 0x374   :  { %6679 = vmatpush.bf16.msra.mxu0 %v9778_v48  ;;  %v6473_v52 = vpop.f32.mrf.mxu0  ;;  %v11299_v48 = vld [vmem:[#allocation11 + $0x98] sm:$0xff] }
 0x375   :  { %6691 = vmatpush.bf16.msra.mxu1 %v9922_v41  ;;  %6704 = vmatpush.bf16.msra.mxu2 %v10050_v56  ;;  %v6474_v2 = vadd.f32 %v6473_v52, %v6461_v39  ;;  %v11288_v41 = vld [vmem:[#allocation11 + $0x40] sm:$0xff]  ;;  %v11297_v56 = vld [vmem:[#allocation11 + $0x88] sm:$0xff]  ;;  %v11306_v52 = vld [vmem:[#allocation11 + $0xd0] sm:$0xff] }
 0x377   :  { %6680 = vmatmul.bf16.vlgmr.msra.gmra.mxu0 %v11776_v7  ;;  %6716 = vmatpush.bf16.msra.mxu3 %v10194_v50  ;;  %v11294_v7 = vld [vmem:[#allocation11 + $0x70] sm:$0xff]  ;;  %v6742_v50 = vpack.c.bf16 %v6738_v21, %v6738_v21 }
 0x378   :  { %6728 = vmatpush.bf16.msrb.mxu0 %v10338_v22 }
 0x379   :  { %6692 = vmatpush.bf16.msra.mxu1 %v9906_v62  ;;  %6705 = vmatpush.bf16.msra.mxu2 %v10034_v0  ;;  %v6486_v61 = vpop.f32.mrf.mxu1 }
 0x37b   :  { %6717 = vmatpush.bf16.msra.mxu3 %v10178_v55 }
 0x37c   :  { %6729 = vmatpush.bf16.msrb.mxu0 %v10322_v40  ;;  %6693 = vmatmul.bf16.vlgmr.msra.gmra.mxu1 %v11778_v14  ;;  %v11292_v14 = vld [vmem:[#allocation11 + $0x60] sm:$0xff]  ;;  %v6475_v33 = vpop.f32.mrf.mxu0  ;;  %v6743_v40 = vpack.c.bf16 %v6739_v5, %v6739_v5 }
 0x37d   :  { %7005 = vmatpush.bf16.msrb.mxu1 %v11287_v18  ;;  %7018 = vmatpush.bf16.msrb.mxu2 %v11295_v58 }
 0x37e   :  { %6706 = vmatmul.bf16.vlgmr.msra.gmra.mxu2 %v11782_v44  ;;  %v6487_v44 = vadd.f32 %v6486_v61, %v6474_v2 }
 0x37f   :  { %6718 = vmatpush.bf16.msra.mxu3 %v10162_v20 }
 0x380   :  { %6730 = vmatpush.bf16.msrb.mxu0 %v10306_v25 }
 0x381   :  { %7006 = vmatpush.bf16.msrb.mxu1 %v11286_v12  ;;  %7019 = vmatpush.bf16.msrb.mxu2 %v11294_v7  ;;  %v6499_v47 = vpop.f32.mrf.mxu2  ;;  %v6488_v13 = vpop.f32.mrf.mxu1  ;;  %v11309_v7 = vld [vmem:[#allocation11 + $0xe8] sm:$0xff] }
 0x382   :  { %6719 = vmatmul.bf16.vlgmr.msra.gmra.mxu3 %v11784_v24  ;;  %v11282_v24 = vld [vmem:[#allocation11 + $0x10] sm:$0xff]  ;;  %v6500_v49 = vadd.f32 %v6499_v47, %v6487_v44 }
 0x383   :  { %7031 = vmatpush.bf16.msrb.mxu3 %v11303_v16 }
 0x384   :  { %6731 = vmatpush.bf16.msrb.mxu0 %v10290_v9 }
 0x385   :  { %7007 = vmatpush.bf16.msrb.mxu1 %v11285_v29  ;;  %7020 = vmatpush.bf16.msrb.mxu2 %v11293_v17  ;;  %v6512_v36 = vpop.f32.mrf.mxu3  ;;  %v11307_v29 = vld [vmem:[#allocation11 + $0xd8] sm:$0xff] }
 0x386   :  { %v6513_v22 = vadd.f32 %v6512_v36, %v6500_v49 }
 0x387   :  { %7032 = vmatpush.bf16.msrb.mxu3 %v11302_v10  ;;  %10342 = vmatmul.msk.bf16.vlgmr.msrb.gmra.mxu0 %vm5433_vm1, %v11789_v46  ;;  %v11289_v46 = vld [vmem:[#allocation11 + $0x48] sm:$0xff] }
 0x388   :  { %7044 = vmatpush.bf16.msra.mxu0 %v11311_v3  ;;  %v11305_v10 = vld [vmem:[#allocation11 + $0xc8] sm:$0xff] }
 0x389   :  { %7008 = vmatpush.bf16.msrb.mxu1 %v11284_v27  ;;  %7021 = vmatpush.bf16.msrb.mxu2 %v11292_v14  ;;  %v6501_v60 = vpop.f32.mrf.mxu2  ;;  %v11304_v14 = vld [vmem:[#allocation11 + $0xc0] sm:$0xff] }
 0x38b   :  { %7033 = vmatpush.bf16.msrb.mxu3 %v11301_v15 }
 0x38c   :  { %7045 = vmatpush.bf16.msra.mxu0 %v11310_v59 }
 0x38d   :  { %7009 = vmatpush.bf16.msrb.mxu1 %v11283_v19  ;;  %7022 = vmatpush.bf16.msrb.mxu2 %v11291_v54  ;;  %v6514_v34 = vpop.f32.mrf.mxu3 }
 0x38e   :  { %v11327_v34 = vld [vmem:[#allocation13] ss:$0 sm:$0xff] }
 0x38f   :  { %7034 = vmatpush.bf16.msrb.mxu3 %v11300_v32 }
 0x390   :  { %7046 = vmatpush.bf16.msra.mxu0 %v11309_v7 }
 0x391   :  { %7010 = vmatpush.bf16.msrb.mxu1 %v11282_v24  ;;  %7023 = vmatpush.bf16.msrb.mxu2 %v11290_v1 }
 0x393   :  { %7035 = vmatpush.bf16.msrb.mxu3 %v11299_v48 }
 0x394   :  { %v6525_v23 = vpop.f32.mrf.mxu0  ;;  %7047 = vmatpush.bf16.msra.mxu0 %v11308_v6 }
 0x395   :  { %7011 = vmatpush.bf16.msrb.mxu1 %v11281_v37  ;;  %7024 = vmatpush.bf16.msrb.mxu2 %v11289_v46  ;;  %v6526_v31 = vadd.f32 %v6525_v23, %v6513_v22 }
 0x397   :  { %7036 = vmatpush.bf16.msrb.mxu3 %v11298_v57 }
 0x398   :  { %7048 = vmatpush.bf16.msra.mxu0 %v11307_v29 }
 0x399   :  { %7012 = vmatpush.bf16.msrb.mxu1 %v11280_v38  ;;  %7025 = vmatpush.bf16.msrb.mxu2 %v11288_v41  ;;  %v6538_v63 = vpop.f32.mrf.mxu1 }
 0x39a   :  { %v6539_v28 = vadd.f32 %v6538_v63, %v6526_v31 }
 0x39b   :  { %7037 = vmatpush.bf16.msrb.mxu3 %v11297_v56 }
 0x39c   :  { %7013 = vmatmul.bf16.vlgmr.msrb.gmra.mxu1 %v6741_v43  ;;  %7026 = vmatmul.bf16.vlgmr.msrb.gmra.mxu2 %v6742_v50  ;;  %v6527_v39 = vpop.f32.mrf.mxu0 }
 0x39d   :  { %7049 = vmatpush.bf16.msra.mxu0 %v11306_v52 }
 0x39f   :  { %7038 = vmatpush.bf16.msrb.mxu3 %v11296_v53 }
 0x3a1   :  { %v6551_v62 = vpop.f32.mrf.mxu2  ;;  %v6540_v8 = vpop.f32.mrf.mxu1  ;;  %7050 = vmatpush.bf16.msra.mxu0 %v11305_v10 }
 0x3a2   :  { %7039 = vmatmul.bf16.vlgmr.msrb.gmra.mxu3 %v6743_v40  ;;  %v6552_v45 = vadd.f32 %v6551_v62, %v6539_v28 }
 0x3a5   :  { %v6564_v26 = vpop.f32.mrf.mxu3  ;;  %7051 = vmatpush.bf16.msra.mxu0 %v11304_v14 }
 0x3a6   :  { %v6565_v61 = vadd.f32 %v6564_v26, %v6552_v45 }
 0x3a9   :  { %v6553_v30 = vpop.f32.mrf.mxu2 }
 0x3ad   :  { %v6566_v0 = vpop.f32.mrf.mxu3 }
 0x3b4   :  { %v6577_v18 = vpop.f32.mrf.mxu0 }
 0x3b5   :  { %v6578_v44 = vadd.f32 %v6577_v18, %v6565_v61 }
 0x3b9   :  { %v6590_v4 = vpop.f32.mrf.mxu1 }
 0x3ba   :  { %v6591_v33 = vadd.f32 %v6590_v4, %v6578_v44 }
 0x3bc   :  { %v6579_v58 = vpop.f32.mrf.mxu0 }
 0x3c1   :  { %v6603_v55 = vpop.f32.mrf.mxu2  ;;  %v6592_v25 = vpop.f32.mrf.mxu1 }
 0x3c2   :  { %v6604_v32 = vadd.f32 %v6603_v55, %v6591_v33 }
 0x3c5   :  { %v6616_v42 = vpop.f32.mrf.mxu3 }
 0x3c6   :  { %v6617_v24 = vadd.f32 %v6616_v42, %v6604_v32 }
 0x3c9   :  { %v6605_v11 = vpop.f32.mrf.mxu2 }
 0x3cd   :  { %v6618_v12 = vpop.f32.mrf.mxu3 }
 0x3d4   :  { %v6629_v20 = vpop.f32.mrf.mxu0 }
 0x3d5   :  { %v6630_v1 = vadd.f32 %v6629_v20, %v6617_v24 }
 0x3d9   :  { %v6642_v16 = vpop.f32.mrf.mxu1 }
 0x3da   :  { %v6643_v48 = vadd.f32 %v6642_v16, %v6630_v1 }
 0x3dc   :  { %v6631_v9 = vpop.f32.mrf.mxu0 }
 0x3e1   :  { %v6655_v17 = vpop.f32.mrf.mxu2  ;;  %v6644_v2 = vpop.f32.mrf.mxu1 }
 0x3e2   :  { %v6656_v13 = vadd.f32 %v6655_v17, %v6643_v48 }
 0x3e5   :  { %v6668_v27 = vpop.f32.mrf.mxu3 }
 0x3e6   :  { %v6669_v37 = vadd.f32 %v6668_v27, %v6656_v13 }
 0x3e9   :  { %v6657_v15 = vpop.f32.mrf.mxu2 }
 0x3ed   :  { %v6670_v19 = vpop.f32.mrf.mxu3 }
 0x3f4   :  { %v6681_v54 = vpop.f32.mrf.mxu0 }
 0x3f5   :  { %v6682_v46 = vadd.f32 %v6681_v54, %v6669_v37 }
 0x3f9   :  { %v6694_v47 = vpop.f32.mrf.mxu1 }
 0x3fa   :  { %v6695_v22 = vadd.f32 %v6694_v47, %v6682_v46 }
 0x3fc   :  { %v6683_v49 = vpop.f32.mrf.mxu0 }
 0x401   :  { %v6707_v57 = vpop.f32.mrf.mxu2  ;;  %v6696_v36 = vpop.f32.mrf.mxu1 }
 0x402   :  { %v6708_v35 = vadd.f32 %v6707_v57, %v6695_v22 }
 0x404   :  { %v6733_v38 = vpop.f32.mrf.mxu0 }
 0x405   :  { %v6720_v41 = vpop.f32.mrf.mxu3 }
 0x406   :  { %v6721_v21 = vadd.f32 %v6720_v41, %v6708_v35 }
 0x408   :  { %v6734_v60 = vadd.f32 %v6733_v38, %v6721_v21 }
 0x409   :  { %v6709_v56 = vpop.f32.mrf.mxu2 }
 0x40a   :  { %v6740_v51 = vmax.f32 %v6734_v60, 0.0 }
 0x40c   :  { %v6735_v43 = vpop.f32.mrf.mxu0  ;;  %v6744_v50 = vpack.c.bf16 %v6740_v51, %v6740_v51 }
 0x40d   :  { %v6722_v53 = vpop.f32.mrf.mxu3 }
 0x40e   :  { %7052 = vmatmul.bf16.vlgmr.msra.gmra.mxu0 %v6744_v50 }
 0x419   :  { %v7014_v5 = vpop.f32.mrf.mxu1 }
 0x41a   :  { %v7015_v23 = vadd.f32 %v11327_v34, %v7014_v5 }
 0x41f   :  { %v7027_v40 = vpop.f32.mrf.mxu2 }
 0x420   :  { %v7028_v31 = vadd.f32 %v7027_v40, %v7015_v23 }
 0x421   :  { %v7016_v63 = vpop.f32.mrf.mxu1 }
 0x425   :  { %v7040_v28 = vpop.f32.mrf.mxu3 }
 0x426   :  { %v7041_v39 = vadd.f32 %v7040_v28, %v7028_v31 }
 0x427   :  { %v7029_v62 = vpop.f32.mrf.mxu2 }
 0x42d   :  { %v7042_v45 = vpop.f32.mrf.mxu3 }
 0x48b   :  { %v7053_v8 = vpop.f32.mrf.mxu0 }
 0x48c   :  { %v7054_v26 = vadd.f32 %v7053_v8, %v7041_v39 }
 0x48e   :  { %7057 = vst [vmem:[#allocation14] sm:$0xff] %v7054_v26 }
 0x48f   :  { %7068 = dma.vmem_to_hbm [thread:$0]  %s7064_s6, 128, %s7066_s15, [#allocation4]  }
 0x493   :  { %v7055_v30 = vpop.f32.mrf.mxu0 }
 0x494   :  { %11531 = dma.done.wait [#allocation4], 128  }
 0x495   :  { %11532 = vsyncadd [#allocation4], 4294967168 }
 0x496   :  { %7073 = vsyncpa [#allocation3], 1 }
 0x497   :  { %7074 = vsyncpa [#allocation6], 1 }
 0x498   :  { %7075 = vsyncpa [#allocation9], 1 }
 0x499   :  { %7076 = vsyncpa [#allocation12], 1 }
 0x49a   :  { %7077 = vsyncpa [#allocation4], 1 }

</bundles_post_ra>
